<compile_context>
chip_gen: v6e
topology: v6e:2x2x1
jax: 0.10.0
libtpu: 0.0.40
codegen_flags: <defaults>
</compile_context>

<pallas_src>
import jax
import jax.numpy as jnp
from jax.experimental import pallas as pl
from jax.experimental.pallas import tpu as pltpu

LATENT_DIM = 100
K_PAD = 128          # latent/contraction dim padded for MXU-friendly tiling
EPS = 1e-5
D1, D2, D3 = 256, 512, 1024
OUT_DIM = 784
OUT_PAD = 896        # 7 * 128 -> lane-dense output stores


def _bn_relu(h, gamma, beta):
    """Training-mode BatchNorm1d (biased batch variance) + ReLU, f32 math."""
    mu = jnp.mean(h, axis=0, keepdims=True)
    d = h - mu
    var = jnp.mean(d * d, axis=0, keepdims=True)      # two-pass (stable) variance
    hn = d * jax.lax.rsqrt(var + EPS)
    return jnp.maximum(hn * gamma + beta, 0.0)


def generator_kernel(z_ref, w1_ref, vec_ref, w2_hbm, w3_hbm, w4_hbm,
                     out_ref, w2_buf, w3_buf, w4_buf, sems):
    # Launch all three big-weight HBM->VMEM copies up front so they overlap the
    # earlier layers' compute; each is waited on right before its matmul.
    w2_copy = pltpu.make_async_copy(w2_hbm, w2_buf, sems.at[0])
    w3_copy = pltpu.make_async_copy(w3_hbm, w3_buf, sems.at[1])
    w4_copy = pltpu.make_async_copy(w4_hbm, w4_buf, sems.at[2])
    w2_copy.start()
    w3_copy.start()
    w4_copy.start()

    vec = vec_ref[...]                                 # (8, 1024) packed vectors
    x = z_ref[...]                                     # (B, 128) f32, zero-padded

    # Layer 1: Linear(100->256) [bias folded into BN] + BN + ReLU
    h1 = jnp.dot(x.astype(jnp.bfloat16), w1_ref[...],
                 preferred_element_type=jnp.float32)
    x1 = _bn_relu(h1, vec[0:1, 0:D1], vec[1:2, 0:D1])

    # Layer 2: Linear(256->512) + BN + ReLU
    w2_copy.wait()
    h2 = jnp.dot(x1.astype(jnp.bfloat16), w2_buf[...],
                 preferred_element_type=jnp.float32)
    x2 = _bn_relu(h2, vec[2:3, 0:D2], vec[3:4, 0:D2])

    # Layer 3: Linear(512->1024) + BN + ReLU
    w3_copy.wait()
    h3 = jnp.dot(x2.astype(jnp.bfloat16), w3_buf[...],
                 preferred_element_type=jnp.float32)
    x3 = _bn_relu(h3, vec[4:5, 0:D3], vec[5:6, 0:D3])

    # Layer 4: Linear(1024->784, padded to 896) + Tanh
    w4_copy.wait()
    y = jnp.dot(x3.astype(jnp.bfloat16), w4_buf[...],
                preferred_element_type=jnp.float32) + vec[6:7, 0:OUT_PAD]
    out_ref[...] = jnp.tanh(y).astype(out_ref.dtype)


def init_generator_params(key):
    """Deterministic synthetic params (f32, weights stored as (in, out))."""
    dims = [(LATENT_DIM, D1), (D1, D2), (D2, D3), (D3, OUT_DIM)]
    params = []
    for i, (din, dout) in enumerate(dims):
        kw, kb, key = jax.random.split(key, 3)
        bound = 1.0 / jnp.sqrt(jnp.float32(din))       # nn.Linear-like init
        w = jax.random.uniform(kw, (din, dout), jnp.float32, -bound, bound)
        b = jax.random.uniform(kb, (dout,), jnp.float32, -bound, bound)
        if i < 3:
            gamma = jnp.ones((dout,), jnp.float32)     # BatchNorm1d default affine
            beta = jnp.zeros((dout,), jnp.float32)
            params.append((w, b, gamma, beta))
        else:
            params.append((w, b))
    return params


def prepare_params(params):
    """One-time weight preprocessing; reuse the result across forward calls.

    Returns (w1_pad_bf16, w2_bf16, w3_bf16, w4_pad_bf16, vec_f32).
    """
    (w1, _b1, g1, be1), (w2, _b2, g2, be2), (w3, _b3, g3, be3), (w4, b4) = params

    # bf16 weights: halves the HBM traffic that dominates this kernel.
    # w1: pad contraction dim 100 -> 128 with zero rows (exact).
    w1p = jnp.zeros((K_PAD, D1), jnp.bfloat16).at[:LATENT_DIM, :].set(
        w1.astype(jnp.bfloat16))
    w2b = w2.astype(jnp.bfloat16)
    w3b = w3.astype(jnp.bfloat16)
    # w4: pad output dim 784 -> 896 so the final store is lane-dense (exact,
    # tanh(0)=0 in the sliced-off pad region).
    w4p = jnp.zeros((D3, OUT_PAD), jnp.bfloat16).at[:, :OUT_DIM].set(
        w4.astype(jnp.bfloat16))

    # Pack all small per-feature vectors into one (8, 1024) f32 array (one DMA).
    # b1..b3 are intentionally dropped: a bias before BatchNorm cancels exactly.
    vec = jnp.zeros((8, D3), jnp.float32)
    vec = vec.at[0, :D1].set(g1).at[1, :D1].set(be1)
    vec = vec.at[2, :D2].set(g2).at[3, :D2].set(be2)
    vec = vec.at[4, :D3].set(g3).at[5, :D3].set(be3)
    vec = vec.at[6, :OUT_DIM].set(b4)                  # pad region stays 0

    return (w1p, w2b, w3b, w4p, vec)


def _generator_forward_impl(z, w1p, w2b, w3b, w4p, vec):
    B = z.shape[0]
    # Zero-pad z's latent dim 100 -> 128 (tiny; matches w1's padded rows).
    zp = jnp.zeros((B, K_PAD), jnp.float32).at[:, :LATENT_DIM].set(z)

    vmem = pl.BlockSpec(memory_space=pltpu.VMEM)
    hbm = pl.BlockSpec(memory_space=pl.ANY)
    out_flat = pl.pallas_call(
        generator_kernel,
        out_shape=jax.ShapeDtypeStruct((B, OUT_PAD), jnp.float32),
        in_specs=[vmem, vmem, vmem,     # z, w1, vec -> auto-DMA'd to VMEM
                  hbm, hbm, hbm],       # w2, w3, w4 stay in HBM, manual DMA
        out_specs=vmem,
        scratch_shapes=[
            pltpu.VMEM((D1, D2), jnp.bfloat16),        # w2 landing buffer
            pltpu.VMEM((D2, D3), jnp.bfloat16),        # w3 landing buffer
            pltpu.VMEM((D3, OUT_PAD), jnp.bfloat16),   # w4 landing buffer
            pltpu.SemaphoreType.DMA((3,)),
        ],
        compiler_params=pltpu.CompilerParams(vmem_limit_bytes=32 << 20),
    )(zp, w1p, vec, w2b, w3b, w4p)

    # Drop lane padding, then match PyTorch .view(-1, 1, 28, 28) (NCHW).
    return out_flat[:, :OUT_DIM].reshape(-1, 1, 28, 28)


_generator_forward_jit = jax.jit(_generator_forward_impl)


def generator_forward(z, prepped):
    w1p, w2b, w3b, w4p, vec = prepped
    return _generator_forward_jit(z, w1p, w2b, w3b, w4p, vec)


def generator_reference(z, params):
    """Pure-JAX reference with the same bf16 weight quantization as the kernel.

    Keeps the full Linear biases, the unpadded K=100 contraction, and the
    two-pass variance so it also cross-checks the kernel's bias-drop, K-pad
    and N-pad rewrites.
    """
    x = z
    for (w, b, g, be) in params[:3]:
        h = jnp.dot(x.astype(jnp.bfloat16), w.astype(jnp.bfloat16),
                    preferred_element_type=jnp.float32) + b
        mu = jnp.mean(h, axis=0, keepdims=True)
        var = jnp.mean((h - mu) ** 2, axis=0, keepdims=True)
        x = jnp.maximum((h - mu) / jnp.sqrt(var + EPS) * g + be, 0.0)
    w4, b4 = params[3]
    y = jnp.dot(x.astype(jnp.bfloat16), w4.astype(jnp.bfloat16),
                preferred_element_type=jnp.float32) + b4
    return jnp.tanh(y).reshape(-1, 1, 28, 28)


if __name__ == "__main__":
    key = jax.random.PRNGKey(0)
    kz, kp = jax.random.split(key)

    batch = 16  # matches z = torch.randn(16, latent_dim)
    z = jax.random.normal(kz, (batch, LATENT_DIM), dtype=jnp.float32)
    params = init_generator_params(kp)

    prepped = jax.block_until_ready(prepare_params(params))  # one-time prep

    out = jax.block_until_ready(generator_forward(z, prepped))
    ref = jax.block_until_ready(generator_reference(z, params))

    assert out.shape == (batch, 1, 28, 28), out.shape
    max_err = float(jnp.max(jnp.abs(out - ref)))
    assert jnp.allclose(out, ref, atol=2e-3, rtol=2e-3), f"max err {max_err}"

    print("KERNEL_OK")
</pallas_src>

<mosaic_0001>
module attributes {stable_mosaic.version = 11 : i64} {
  func.func @generator_kernel(%arg0: memref<16x128xf32, #tpu.memory_space<vmem>>, %arg1: memref<128x256xbf16, #tpu.memory_space<vmem>>, %arg2: memref<8x1024xf32, #tpu.memory_space<vmem>>, %arg3: memref<256x512xbf16, #tpu.memory_space<any>>, %arg4: memref<512x1024xbf16, #tpu.memory_space<any>>, %arg5: memref<1024x896xbf16, #tpu.memory_space<any>>, %arg6: memref<16x896xf32, #tpu.memory_space<vmem>>, %arg7: memref<256x512xbf16, #tpu.memory_space<vmem>>, %arg8: memref<512x1024xbf16, #tpu.memory_space<vmem>>, %arg9: memref<1024x896xbf16, #tpu.memory_space<vmem>>, %arg10: memref<3x!tpu.dma_semaphore, #tpu.memory_space<semaphore_mem>>) attributes {dimension_semantics = [], scalar_prefetch = 0 : i64, scratch_operands = 4 : i64, tpu.core_type = #tpu.core_type<tc>} {
    %c0_i32 = arith.constant 0 : i32
    %0 = tpu.memref_slice %arg10[%c0_i32] : memref<3x!tpu.dma_semaphore, #tpu.memory_space<semaphore_mem>> -> memref<1x!tpu.dma_semaphore, #tpu.memory_space<semaphore_mem>>
    %1 = tpu.memref_squeeze %0 : memref<1x!tpu.dma_semaphore, #tpu.memory_space<semaphore_mem>> -> memref<!tpu.dma_semaphore, #tpu.memory_space<semaphore_mem>>
    tpu.enqueue_dma source(%arg3 : memref<256x512xbf16, #tpu.memory_space<any>>) target(%arg7 : memref<256x512xbf16, #tpu.memory_space<vmem>>) target_semaphore(%1 : memref<!tpu.dma_semaphore, #tpu.memory_space<semaphore_mem>>)
    %c1_i32 = arith.constant 1 : i32
    %2 = tpu.memref_slice %arg10[%c1_i32] : memref<3x!tpu.dma_semaphore, #tpu.memory_space<semaphore_mem>> -> memref<1x!tpu.dma_semaphore, #tpu.memory_space<semaphore_mem>>
    %3 = tpu.memref_squeeze %2 : memref<1x!tpu.dma_semaphore, #tpu.memory_space<semaphore_mem>> -> memref<!tpu.dma_semaphore, #tpu.memory_space<semaphore_mem>>
    tpu.enqueue_dma source(%arg4 : memref<512x1024xbf16, #tpu.memory_space<any>>) target(%arg8 : memref<512x1024xbf16, #tpu.memory_space<vmem>>) target_semaphore(%3 : memref<!tpu.dma_semaphore, #tpu.memory_space<semaphore_mem>>)
    %c2_i32 = arith.constant 2 : i32
    %4 = tpu.memref_slice %arg10[%c2_i32] : memref<3x!tpu.dma_semaphore, #tpu.memory_space<semaphore_mem>> -> memref<1x!tpu.dma_semaphore, #tpu.memory_space<semaphore_mem>>
    %5 = tpu.memref_squeeze %4 : memref<1x!tpu.dma_semaphore, #tpu.memory_space<semaphore_mem>> -> memref<!tpu.dma_semaphore, #tpu.memory_space<semaphore_mem>>
    tpu.enqueue_dma source(%arg5 : memref<1024x896xbf16, #tpu.memory_space<any>>) target(%arg9 : memref<1024x896xbf16, #tpu.memory_space<vmem>>) target_semaphore(%5 : memref<!tpu.dma_semaphore, #tpu.memory_space<semaphore_mem>>)
    %c0 = arith.constant 0 : index
    %c0_0 = arith.constant 0 : index
    %6 = vector.load %arg2[%c0, %c0_0] : memref<8x1024xf32, #tpu.memory_space<vmem>>, vector<8x1024xf32>
    %c0_1 = arith.constant 0 : index
    %c0_2 = arith.constant 0 : index
    %7 = vector.load %arg0[%c0_1, %c0_2] : memref<16x128xf32, #tpu.memory_space<vmem>>, vector<16x128xf32>
    %8 = arith.truncf %7 : vector<16x128xf32> to vector<16x128xbf16>
    %c0_3 = arith.constant 0 : index
    %c0_4 = arith.constant 0 : index
    %9 = vector.load %arg1[%c0_3, %c0_4] : memref<128x256xbf16, #tpu.memory_space<vmem>>, vector<128x256xbf16>
    %cst = arith.constant dense<0.000000e+00> : vector<16x256xf32>
    %10 = tpu.matmul %8, %9, %cst {dimension_numbers = #tpu.dot_dimension_numbers<[1], [0], [0], [1], [0, 0, 1, 1], [], []>} : vector<16x128xbf16>, vector<128x256xbf16>, vector<16x256xf32> -> vector<16x256xf32>
    %11 = vector.extract_strided_slice %6 {offsets = [0, 0], sizes = [1, 256], strides = [1, 1]} : vector<8x1024xf32> to vector<1x256xf32>
    %12 = vector.extract_strided_slice %6 {offsets = [1, 0], sizes = [1, 256], strides = [1, 1]} : vector<8x1024xf32> to vector<1x256xf32>
    %cst_5 = arith.constant dense<0.000000e+00> : vector<256xf32>
    %13 = vector.multi_reduction <add>, %10, %cst_5 [0] : vector<16x256xf32> to vector<256xf32>
    %14 = vector.shape_cast %13 : vector<256xf32> to vector<1x256xf32>
    %cst_6 = arith.constant 1.600000e+01 : f32
    %15 = vector.broadcast %cst_6 : f32 to vector<1x256xf32>
    %16 = arith.divf %14, %15 : vector<1x256xf32>
    %17 = vector.broadcast %16 : vector<1x256xf32> to vector<16x256xf32>
    %18 = arith.subf %10, %17 : vector<16x256xf32>
    %19 = arith.mulf %18, %18 : vector<16x256xf32>
    %cst_7 = arith.constant dense<0.000000e+00> : vector<256xf32>
    %20 = vector.multi_reduction <add>, %19, %cst_7 [0] : vector<16x256xf32> to vector<256xf32>
    %21 = vector.shape_cast %20 : vector<256xf32> to vector<1x256xf32>
    %cst_8 = arith.constant 1.600000e+01 : f32
    %22 = vector.broadcast %cst_8 : f32 to vector<1x256xf32>
    %23 = arith.divf %21, %22 : vector<1x256xf32>
    %cst_9 = arith.constant 9.99999974E-6 : f32
    %24 = vector.broadcast %cst_9 : f32 to vector<1x256xf32>
    %25 = arith.addf %23, %24 : vector<1x256xf32>
    %26 = math.rsqrt %25 : vector<1x256xf32>
    %27 = vector.broadcast %26 : vector<1x256xf32> to vector<16x256xf32>
    %28 = arith.mulf %18, %27 : vector<16x256xf32>
    %29 = vector.broadcast %11 : vector<1x256xf32> to vector<16x256xf32>
    %30 = arith.mulf %28, %29 : vector<16x256xf32>
    %31 = vector.broadcast %12 : vector<1x256xf32> to vector<16x256xf32>
    %32 = arith.addf %30, %31 : vector<16x256xf32>
    %cst_10 = arith.constant 0.000000e+00 : f32
    %33 = vector.broadcast %cst_10 : f32 to vector<16x256xf32>
    %34 = arith.maximumf %32, %33 : vector<16x256xf32>
    %c0_i32_11 = arith.constant 0 : i32
    %35 = tpu.memref_slice %arg10[%c0_i32_11] : memref<3x!tpu.dma_semaphore, #tpu.memory_space<semaphore_mem>> -> memref<1x!tpu.dma_semaphore, #tpu.memory_space<semaphore_mem>>
    %36 = tpu.memref_squeeze %35 : memref<1x!tpu.dma_semaphore, #tpu.memory_space<semaphore_mem>> -> memref<!tpu.dma_semaphore, #tpu.memory_space<semaphore_mem>>
    tpu.wait_dma2 semaphore(%36 : memref<!tpu.dma_semaphore, #tpu.memory_space<semaphore_mem>>) src(%arg3 : memref<256x512xbf16, #tpu.memory_space<any>>) dst(%arg7 : memref<256x512xbf16, #tpu.memory_space<vmem>>)
    %37 = arith.truncf %34 : vector<16x256xf32> to vector<16x256xbf16>
    %c0_12 = arith.constant 0 : index
    %c0_13 = arith.constant 0 : index
    %38 = vector.load %arg7[%c0_12, %c0_13] : memref<256x512xbf16, #tpu.memory_space<vmem>>, vector<256x512xbf16>
    %cst_14 = arith.constant dense<0.000000e+00> : vector<16x512xf32>
    %39 = tpu.matmul %37, %38, %cst_14 {dimension_numbers = #tpu.dot_dimension_numbers<[1], [0], [0], [1], [0, 0, 1, 1], [], []>} : vector<16x256xbf16>, vector<256x512xbf16>, vector<16x512xf32> -> vector<16x512xf32>
    %40 = vector.extract_strided_slice %6 {offsets = [2, 0], sizes = [1, 512], strides = [1, 1]} : vector<8x1024xf32> to vector<1x512xf32>
    %41 = vector.extract_strided_slice %6 {offsets = [3, 0], sizes = [1, 512], strides = [1, 1]} : vector<8x1024xf32> to vector<1x512xf32>
    %cst_15 = arith.constant dense<0.000000e+00> : vector<512xf32>
    %42 = vector.multi_reduction <add>, %39, %cst_15 [0] : vector<16x512xf32> to vector<512xf32>
    %43 = vector.shape_cast %42 : vector<512xf32> to vector<1x512xf32>
    %cst_16 = arith.constant 1.600000e+01 : f32
    %44 = vector.broadcast %cst_16 : f32 to vector<1x512xf32>
    %45 = arith.divf %43, %44 : vector<1x512xf32>
    %46 = vector.broadcast %45 : vector<1x512xf32> to vector<16x512xf32>
    %47 = arith.subf %39, %46 : vector<16x512xf32>
    %48 = arith.mulf %47, %47 : vector<16x512xf32>
    %cst_17 = arith.constant dense<0.000000e+00> : vector<512xf32>
    %49 = vector.multi_reduction <add>, %48, %cst_17 [0] : vector<16x512xf32> to vector<512xf32>
    %50 = vector.shape_cast %49 : vector<512xf32> to vector<1x512xf32>
    %cst_18 = arith.constant 1.600000e+01 : f32
    %51 = vector.broadcast %cst_18 : f32 to vector<1x512xf32>
    %52 = arith.divf %50, %51 : vector<1x512xf32>
    %cst_19 = arith.constant 9.99999974E-6 : f32
    %53 = vector.broadcast %cst_19 : f32 to vector<1x512xf32>
    %54 = arith.addf %52, %53 : vector<1x512xf32>
    %55 = math.rsqrt %54 : vector<1x512xf32>
    %56 = vector.broadcast %55 : vector<1x512xf32> to vector<16x512xf32>
    %57 = arith.mulf %47, %56 : vector<16x512xf32>
    %58 = vector.broadcast %40 : vector<1x512xf32> to vector<16x512xf32>
    %59 = arith.mulf %57, %58 : vector<16x512xf32>
    %60 = vector.broadcast %41 : vector<1x512xf32> to vector<16x512xf32>
    %61 = arith.addf %59, %60 : vector<16x512xf32>
    %cst_20 = arith.constant 0.000000e+00 : f32
    %62 = vector.broadcast %cst_20 : f32 to vector<16x512xf32>
    %63 = arith.maximumf %61, %62 : vector<16x512xf32>
    %c1_i32_21 = arith.constant 1 : i32
    %64 = tpu.memref_slice %arg10[%c1_i32_21] : memref<3x!tpu.dma_semaphore, #tpu.memory_space<semaphore_mem>> -> memref<1x!tpu.dma_semaphore, #tpu.memory_space<semaphore_mem>>
    %65 = tpu.memref_squeeze %64 : memref<1x!tpu.dma_semaphore, #tpu.memory_space<semaphore_mem>> -> memref<!tpu.dma_semaphore, #tpu.memory_space<semaphore_mem>>
    tpu.wait_dma2 semaphore(%65 : memref<!tpu.dma_semaphore, #tpu.memory_space<semaphore_mem>>) src(%arg4 : memref<512x1024xbf16, #tpu.memory_space<any>>) dst(%arg8 : memref<512x1024xbf16, #tpu.memory_space<vmem>>)
    %66 = arith.truncf %63 : vector<16x512xf32> to vector<16x512xbf16>
    %c0_22 = arith.constant 0 : index
    %c0_23 = arith.constant 0 : index
    %67 = vector.load %arg8[%c0_22, %c0_23] : memref<512x1024xbf16, #tpu.memory_space<vmem>>, vector<512x1024xbf16>
    %cst_24 = arith.constant dense<0.000000e+00> : vector<16x1024xf32>
    %68 = tpu.matmul %66, %67, %cst_24 {dimension_numbers = #tpu.dot_dimension_numbers<[1], [0], [0], [1], [0, 0, 1, 1], [], []>} : vector<16x512xbf16>, vector<512x1024xbf16>, vector<16x1024xf32> -> vector<16x1024xf32>
    %69 = vector.extract_strided_slice %6 {offsets = [4, 0], sizes = [1, 1024], strides = [1, 1]} : vector<8x1024xf32> to vector<1x1024xf32>
    %70 = vector.extract_strided_slice %6 {offsets = [5, 0], sizes = [1, 1024], strides = [1, 1]} : vector<8x1024xf32> to vector<1x1024xf32>
    %cst_25 = arith.constant dense<0.000000e+00> : vector<1024xf32>
    %71 = vector.multi_reduction <add>, %68, %cst_25 [0] : vector<16x1024xf32> to vector<1024xf32>
    %72 = vector.shape_cast %71 : vector<1024xf32> to vector<1x1024xf32>
    %cst_26 = arith.constant 1.600000e+01 : f32
    %73 = vector.broadcast %cst_26 : f32 to vector<1x1024xf32>
    %74 = arith.divf %72, %73 : vector<1x1024xf32>
    %75 = vector.broadcast %74 : vector<1x1024xf32> to vector<16x1024xf32>
    %76 = arith.subf %68, %75 : vector<16x1024xf32>
    %77 = arith.mulf %76, %76 : vector<16x1024xf32>
    %cst_27 = arith.constant dense<0.000000e+00> : vector<1024xf32>
    %78 = vector.multi_reduction <add>, %77, %cst_27 [0] : vector<16x1024xf32> to vector<1024xf32>
    %79 = vector.shape_cast %78 : vector<1024xf32> to vector<1x1024xf32>
    %cst_28 = arith.constant 1.600000e+01 : f32
    %80 = vector.broadcast %cst_28 : f32 to vector<1x1024xf32>
    %81 = arith.divf %79, %80 : vector<1x1024xf32>
    %cst_29 = arith.constant 9.99999974E-6 : f32
    %82 = vector.broadcast %cst_29 : f32 to vector<1x1024xf32>
    %83 = arith.addf %81, %82 : vector<1x1024xf32>
    %84 = math.rsqrt %83 : vector<1x1024xf32>
    %85 = vector.broadcast %84 : vector<1x1024xf32> to vector<16x1024xf32>
    %86 = arith.mulf %76, %85 : vector<16x1024xf32>
    %87 = vector.broadcast %69 : vector<1x1024xf32> to vector<16x1024xf32>
    %88 = arith.mulf %86, %87 : vector<16x1024xf32>
    %89 = vector.broadcast %70 : vector<1x1024xf32> to vector<16x1024xf32>
    %90 = arith.addf %88, %89 : vector<16x1024xf32>
    %cst_30 = arith.constant 0.000000e+00 : f32
    %91 = vector.broadcast %cst_30 : f32 to vector<16x1024xf32>
    %92 = arith.maximumf %90, %91 : vector<16x1024xf32>
    %c2_i32_31 = arith.constant 2 : i32
    %93 = tpu.memref_slice %arg10[%c2_i32_31] : memref<3x!tpu.dma_semaphore, #tpu.memory_space<semaphore_mem>> -> memref<1x!tpu.dma_semaphore, #tpu.memory_space<semaphore_mem>>
    %94 = tpu.memref_squeeze %93 : memref<1x!tpu.dma_semaphore, #tpu.memory_space<semaphore_mem>> -> memref<!tpu.dma_semaphore, #tpu.memory_space<semaphore_mem>>
    tpu.wait_dma2 semaphore(%94 : memref<!tpu.dma_semaphore, #tpu.memory_space<semaphore_mem>>) src(%arg5 : memref<1024x896xbf16, #tpu.memory_space<any>>) dst(%arg9 : memref<1024x896xbf16, #tpu.memory_space<vmem>>)
    %95 = arith.truncf %92 : vector<16x1024xf32> to vector<16x1024xbf16>
    %c0_32 = arith.constant 0 : index
    %c0_33 = arith.constant 0 : index
    %96 = vector.load %arg9[%c0_32, %c0_33] : memref<1024x896xbf16, #tpu.memory_space<vmem>>, vector<1024x896xbf16>
    %cst_34 = arith.constant dense<0.000000e+00> : vector<16x896xf32>
    %97 = tpu.matmul %95, %96, %cst_34 {dimension_numbers = #tpu.dot_dimension_numbers<[1], [0], [0], [1], [0, 0, 1, 1], [], []>} : vector<16x1024xbf16>, vector<1024x896xbf16>, vector<16x896xf32> -> vector<16x896xf32>
    %98 = vector.extract_strided_slice %6 {offsets = [6, 0], sizes = [1, 896], strides = [1, 1]} : vector<8x1024xf32> to vector<1x896xf32>
    %99 = vector.broadcast %98 : vector<1x896xf32> to vector<16x896xf32>
    %100 = arith.addf %97, %99 : vector<16x896xf32>
    %101 = math.tanh %100 : vector<16x896xf32>
    %c0_35 = arith.constant 0 : index
    %c0_36 = arith.constant 0 : index
    %102 = vector.load %arg6[%c0_35, %c0_36] : memref<16x896xf32, #tpu.memory_space<vmem>>, vector<16x896xf32>
    tpu.vector_store %arg6[%c0_35, %c0_36], %101 {strides = array<i32>} : memref<16x896xf32, #tpu.memory_space<vmem>>, vector<16x896xf32>,
    return
  }
}

</mosaic_0001>

<bundles_post_ra>
// kernel: _generator_forward_impl.1
= control target key start
LH: loop header
LB: loop body
LE: loop exit
PB: predicated region body
PF: predicated region fallthrough
CT: control target
= control target key end

     0   :  { %11 = vsyncpa [#allocation7], 0  ;;  %s8942_s0 = inlined_call_operand.vmem [shape: f32[16,128], index: 0, kind: input, shape index: {}]   ;;  %s8943_s1 = inlined_call_operand.hbm [shape: bf16[128,256], index: 1, kind: input, shape index: {}]   ;;  %s8944_s2 = inlined_call_operand.hbm [shape: f32[8,1024], index: 2, kind: input, shape index: {}]   ;;  %s8945_s3 = inlined_call_operand.hbm [shape: bf16[256,512], index: 3, kind: input, shape index: {}]   ;;  %s8946_s4 = inlined_call_operand.hbm [shape: bf16[512,1024], index: 4, kind: input, shape index: {}]   ;;  %s8947_s5 = inlined_call_operand.hbm [shape: bf16[1024,896], index: 5, kind: input, shape index: {}]   ;;  %s8948_s6 = inlined_call_operand.vmem [shape: f32[16,896], index: 6, kind: output, shape index: {}]  }
   0x1   :  { %12 = vsyncpa [#allocation9], 0  ;;  %s8525_s21 = smov [#allocation6]  }
   0x2   :  { %s20_s22 = sshll.u32 %s8525_s21, 4  ;;  %s21_s22 = int_to_ptr.vmem [resolvable:$true] %s20_s22 }
   0x3   :  { %s8423_s23 = scalar_lea.vmem %s21_s22, 2048  ;;  %p8428_p1 = scmp.lt.s32.totalorder %s21_s22, %s21_s22 }
   0x4   :  { %p8424_p0 = scmp.ne.s32.totalorder %s21_s22, %s8423_s23  ;;  %p8429_p2 = scmp.lt.s32.totalorder %s8423_s23, %s8423_s23 }
   0x6   :  { %p8430_p3 = por %p8429_p2, %p8428_p1 }
   0x8   :  { %p8431_p4 = pnand %p8430_p3, %p8424_p0 }
   0xa   :  { %8434 = shalt.err (!%p8431_p4)
}
   0xb   :  { %s8526_s24 = smov 128   ;;  %s8527_s25 = smov 8  }
   0xc   :  { %26 = dma.hbm_to_vmem [thread:$0]  %s8943_s1, 2048, %s21_s22, [#allocation7], %s8526_s24, %s8526_s24, %s8527_s25  }
   0xd   :  { %s8528_s28 = smov [#allocation8]  }
   0xe   :  { %s33_s29 = sshll.u32 %s8528_s28, 4  ;;  %s34_s29 = int_to_ptr.vmem [resolvable:$true] %s33_s29 }
   0xf   :  { %s8443_s30 = scalar_lea.vmem %s34_s29, 1024  ;;  %p8448_p6 = scmp.lt.s32.totalorder %s34_s29, %s34_s29 }
  0x10   :  { %p8444_p5 = scmp.ne.s32.totalorder %s34_s29, %s8443_s30  ;;  %p8449_p7 = scmp.lt.s32.totalorder %s8443_s30, %s8443_s30 }
  0x12   :  { %p8450_p8 = por %p8449_p7, %p8448_p6 }
  0x14   :  { %p8451_p9 = pnand %p8450_p8, %p8444_p5 }
  0x16   :  { %8454 = shalt.err (!%p8451_p9)
}
  0x17   :  { %36 = dma.hbm_to_vmem [thread:$0]  %s8944_s2, 1024, %s34_s29, [#allocation9]  }
  0x18   :  { %8515 = dma.done.wait [#allocation7], 2048  }
  0x19   :  { %8516 = vsyncadd [#allocation7], 4294965248 }
  0x1a   :  { %8517 = dma.done.wait [#allocation9], 1024  }
  0x1b   :  { %8518 = vsyncadd [#allocation9], 4294966272  ;;  %v8529_v0 = vmov 0   ;;  %v8574_v1 = vld [vmem:[#allocation8 + $0x10] sm:$0xff]  ;;  %v8576_v2 = vld [vmem:[#allocation8 + $0x18] sm:$0xff]  ;;  %s8530_s11 = smov [#allocation2]  }
  0x1c   :  { %218 = vmatprep.mubr.bf16.mxu0 %v8529_v0  ;;  %v8578_v3 = vld [vmem:[#allocation8 + $0x20] sm:$0xff]  ;;  %v8580_v4 = vld [vmem:[#allocation8 + $0x28] sm:$0xff]  ;;  %v8582_v5 = vld [vmem:[#allocation8 + $0x30] sm:$0xff]  ;;  %s51_s12 = sshll.u32 %s8530_s11, 4  ;;  %s8531_s13 = smov [#allocation3]   ;;  %s52_s12 = int_to_ptr.vmem [resolvable:$true] %s51_s12 }
  0x1d   :  { %v8584_v6 = vld [vmem:[#allocation8 + $0x38] sm:$0xff]  ;;  %v7602_v9 = vld [vmem:[#allocation6 + $0x64] ss:$8 sps:$4 sm:$0xff]   ;;  %v7604_v10 = vld [vmem:[#allocation6 + $0x60] ss:$8 sps:$4 sm:$0xff]   ;;  %s63_s14 = sshll.u32 %s8531_s13, 4  ;;  %p8468_p11 = scmp.lt.s32.totalorder %s52_s12, %s52_s12  ;;  %s64_s14 = int_to_ptr.vmem [resolvable:$true] %s63_s14 }
  0x1e   :  { %v7599_v7 = vld [vmem:[#allocation6 + $0x74] ss:$8 sps:$4 sm:$0xff]   ;;  %v7601_v8 = vld [vmem:[#allocation6 + $0x70] ss:$8 sps:$4 sm:$0xff]   ;;  %v7608_v13 = vld [vmem:[#allocation6 + $0x44] ss:$8 sps:$4 sm:$0xff]  }
  0x1f   :  { %186 = vmatprep.subr.bf16.mxu0 %v7599_v7  ;;  %v7605_v11 = vld [vmem:[#allocation6 + $0x54] ss:$8 sps:$4 sm:$0xff]   ;;  %v7607_v12 = vld [vmem:[#allocation6 + $0x50] ss:$8 sps:$4 sm:$0xff]   ;;  %v7610_v14 = vld [vmem:[#allocation6 + $0x40] ss:$8 sps:$4 sm:$0xff]  }
  0x20   :  { %187 = vmatpush1.bf16.msra.mxu0 %v7601_v8  ;;  %v7611_v15 = vld [vmem:[#allocation6 + $0x34] ss:$8 sps:$4 sm:$0xff]   ;;  %v7613_v16 = vld [vmem:[#allocation6 + $0x30] ss:$8 sps:$4 sm:$0xff]   ;;  %v7614_v17 = vld [vmem:[#allocation6 + $0x24] ss:$8 sps:$4 sm:$0xff]  }
  0x21   :  { %188 = vmatprep.subr.bf16.mxu0 %v7602_v9  ;;  %v7616_v18 = vld [vmem:[#allocation6 + $0x20] ss:$8 sps:$4 sm:$0xff]   ;;  %v7617_v19 = vld [vmem:[#allocation6 + $0x14] ss:$8 sps:$4 sm:$0xff]   ;;  %v7619_v20 = vld [vmem:[#allocation6 + $0x10] ss:$8 sps:$4 sm:$0xff]  }
  0x22   :  { %v7620_v21 = vld [vmem:[#allocation6 + $0x4] ss:$8 sps:$4 sm:$0xff]   ;;  %v7622_v22 = vld [vmem:[#allocation6] ss:$8 sps:$4 sm:$0xff]   ;;  %s8463_s15 = scalar_lea.vmem %s52_s12, 8192 }
  0x23   :  { %v87_v23 = vld [vmem:[%s8942_s0] sm:$0xff]  ;;  %v88_v24 = vld [vmem:[%s8942_s0 + $0x8] sm:$0xff]  ;;  %p8464_p10 = scmp.ne.s32.totalorder %s52_s12, %s8463_s15  ;;  %p8469_p12 = scmp.lt.s32.totalorder %s8463_s15, %s8463_s15 }
  0x24   :  { %189 = vmatpush1.bf16.msra.mxu0 %v7604_v10  ;;  %v89_v25 = vpack.c.bf16 %v88_v24, %v87_v23 }
  0x25   :  { %190 = vmatprep.subr.bf16.mxu0 %v7605_v11  ;;  %p8470_p13 = por %p8469_p12, %p8468_p11 }
  0x27   :  { %p8471_p0 = pnand %p8470_p13, %p8464_p10 }
  0x28   :  { %191 = vmatpush1.bf16.msra.mxu0 %v7607_v12 }
  0x29   :  { %192 = vmatprep.subr.bf16.mxu0 %v7608_v13 }
  0x2c   :  { %193 = vmatpush1.bf16.msra.mxu0 %v7610_v14 }
  0x2d   :  { %194 = vmatprep.subr.bf16.mxu0 %v7611_v15 }
  0x30   :  { %195 = vmatpush1.bf16.msra.mxu0 %v7613_v16 }
  0x31   :  { %196 = vmatprep.subr.bf16.mxu0 %v7614_v17 }
  0x34   :  { %197 = vmatpush1.bf16.msra.mxu0 %v7616_v18 }
  0x35   :  { %198 = vmatprep.subr.bf16.mxu0 %v7617_v19 }
  0x38   :  { %199 = vmatpush1.bf16.msra.mxu0 %v7619_v20 }
  0x39   :  { %200 = vmatprep.subr.bf16.mxu0 %v7620_v21 }
  0x3c   :  { %201 = vmatpush1.bf16.msra.mxu0 %v7622_v22 }
  0x3f   :  { %219 = vmatmul.mubr.bf16.vlgmr.msra.gmra.mxu0 %v89_v25 }
  0x40   :  { %8474 = shalt.err (!%p8471_p0)  }
  0x41   :  { %54 = dma.hbm_to_vmem [thread:$0]  %s8945_s3, 8192, %s52_s12, [#allocation5] }
  0x42   :  { %s8483_s0 = scalar_lea.vmem %s64_s14, 32768  ;;  %p8488_p2 = scmp.lt.s32.totalorder %s64_s14, %s64_s14 }
  0x43   :  { %p8484_p1 = scmp.ne.s32.totalorder %s64_s14, %s8483_s0  ;;  %p8489_p3 = scmp.lt.s32.totalorder %s8483_s0, %s8483_s0 }
  0x45   :  { %p8490_p4 = por %p8489_p3, %p8488_p2 }
  0x47   :  { %p8491_p5 = pnand %p8490_p4, %p8484_p1 }
  0x49   :  { %8494 = shalt.err (!%p8491_p5)  }
  0x4a   :  { %66 = dma.hbm_to_vmem [thread:$0]  %s8946_s4, 32768, %s64_s14, [#allocation5 + $0x1] }
  0x4b   :  { %s8532_s20 = smov [#allocation4]  }
  0x4c   :  { %s75_s21 = sshll.u32 %s8532_s20, 4  ;;  %s76_s21 = int_to_ptr.vmem [resolvable:$true] %s75_s21 }
  0x4d   :  { %s8503_s22 = scalar_lea.vmem %s76_s21, 57344  ;;  %p8508_p7 = scmp.lt.s32.totalorder %s76_s21, %s76_s21 }
  0x4e   :  { %p8504_p6 = scmp.ne.s32.totalorder %s76_s21, %s8503_s22  ;;  %p8509_p8 = scmp.lt.s32.totalorder %s8503_s22, %s8503_s22 }
  0x50   :  { %p8510_p9 = por %p8509_p8, %p8508_p7 }
  0x52   :  { %p8511_p10 = pnand %p8510_p9, %p8504_p6 }
  0x54   :  { %8514 = shalt.err (!%p8511_p10)  }
  0x55   :  { %78 = dma.hbm_to_vmem [thread:$0]  %s8947_s5, 57344, %s76_s21, [#allocation5 + $0x2]  ;;  %v278_v13 = vlaneseq  ;;  %v8604_v17 = vld [vmem:[#allocation8] sm:$0xff]  ;;  %v8607_v19 = vld [vmem:[#allocation8 + $0x8] sm:$0xff] }
  0x57   :  { %v8601_v15 = vshrl.u32 %v278_v13, 7 }
  0x59   :  { %v280_v16 = vsub.s32 0, %v8601_v15  ;;  %v292_v18 = vsub.s32 1, %v8601_v15 }
  0x5b   :  { %v281_v20 = vrot.slane %v8604_v17, %v280_v16  ;;  %v293_v24 = vrot.slane %v8604_v17, %v292_v18  ;;  %v285_v25 = vrot.slane %v8607_v19, %v280_v16 }
  0xff   :  { %v220_v26 = vpop.f32.mrf.mxu0 }
 0x101   :  { %v222_v27 = vpop.f32.mrf.mxu0 }
 0x103   :  { %v224_v28 = vpop.f32.mrf.mxu0 }
 0x104   :  { %v229_v29 = vadd.f32 %v224_v28, %v220_v26 }
 0x105   :  { %v226_v30 = vpop.f32.mrf.mxu0 }
 0x106   :  { %v230_v31 = vrot.slane %v229_v29, 4  ;;  %v236_v32 = vadd.f32 %v226_v30, %v222_v27 }
 0x108   :  { %v231_v33 = vadd.f32 %v230_v31, %v229_v29  ;;  %v237_v34 = vrot.slane %v236_v32, 4 }
 0x10a   :  { %v232_v35 = vrot.slane %v231_v33, 2  ;;  %v238_v36 = vadd.f32 %v237_v34, %v236_v32 }
 0x10c   :  { %v233_v37 = vadd.f32 %v232_v35, %v231_v33  ;;  %v239_v38 = vrot.slane %v238_v36, 2 }
 0x10e   :  { %v234_v39 = vrot.slane %v233_v37, 1  ;;  %v240_v40 = vadd.f32 %v239_v38, %v238_v36 }
 0x110   :  { %v235_v41 = vadd.f32 %v234_v39, %v233_v37  ;;  %v241_v42 = vrot.slane %v240_v40, 1 }
 0x112   :  { %v244_v43 = vmul.f32 0.0625, %v235_v41  ;;  %v242_v44 = vadd.f32 %v241_v42, %v240_v40 }
 0x114   :  { %v246_v45 = vsub.f32 %v220_v26, %v244_v43  ;;  %v248_v46 = vsub.f32 %v224_v28, %v244_v43  ;;  %v245_v47 = vmul.f32 0.0625, %v242_v44 }
 0x116   :  { %v250_v48 = vmul.f32 %v246_v45, %v246_v45  ;;  %v252_v49 = vmul.f32 %v248_v46, %v248_v46  ;;  %v247_v50 = vsub.f32 %v222_v27, %v245_v47  ;;  %v249_v51 = vsub.f32 %v226_v30, %v245_v47 }
 0x117   :  { %v297_v27 = vrot.slane %v8607_v19, %v292_v18 }
 0x118   :  { %v254_v52 = vadd.f32 %v252_v49, %v250_v48  ;;  %v251_v53 = vmul.f32 %v247_v50, %v247_v50  ;;  %v253_v54 = vmul.f32 %v249_v51, %v249_v51 }
 0x11a   :  { %v255_v55 = vrot.slane %v254_v52, 4  ;;  %v261_v56 = vadd.f32 %v253_v54, %v251_v53 }
 0x11c   :  { %v256_v57 = vadd.f32 %v255_v55, %v254_v52  ;;  %v262_v58 = vrot.slane %v261_v56, 4 }
 0x11e   :  { %v257_v59 = vrot.slane %v256_v57, 2  ;;  %v263_v60 = vadd.f32 %v262_v58, %v261_v56 }
 0x120   :  { %v258_v61 = vadd.f32 %v257_v59, %v256_v57  ;;  %v264_v62 = vrot.slane %v263_v60, 2 }
 0x122   :  { %v259_v63 = vrot.slane %v258_v61, 1  ;;  %v265_v0 = vadd.f32 %v264_v62, %v263_v60 }
 0x124   :  { %v260_v7 = vadd.f32 %v259_v63, %v258_v61  ;;  %v266_v8 = vrot.slane %v265_v0, 1 }
 0x126   :  { %v268_v9 = vmul.f32 0.0625, %v260_v7  ;;  %v267_v10 = vadd.f32 %v266_v8, %v265_v0 }
 0x128   :  { %v270_v11 = vadd.f32 1e-05, %v268_v9  ;;  %v269_v12 = vmul.f32 0.0625, %v267_v10 }
 0x12a   :  { %7623 = vrsqrt.f32 %v270_v11  ;;  %v271_v14 = vadd.f32 1e-05, %v269_v12 }
 0x12c   :  { %7625 = vrsqrt.f32 %v271_v14 }
 0x137   :  { %v7624_v21 = vpop.eup %7623 }
 0x138   :  { %v274_v22 = vmul.f32 %v7624_v21, %v246_v45  ;;  %v276_v23 = vmul.f32 %v7624_v21, %v248_v46 }
 0x139   :  { %v7626_v26 = vpop.eup %7625 }
 0x13a   :  { %v286_v28 = vmul.f32 %v281_v20, %v274_v22  ;;  %v288_v29 = vmul.f32 %v281_v20, %v276_v23  ;;  %v275_v30 = vmul.f32 %v7626_v26, %v247_v50  ;;  %v277_v31 = vmul.f32 %v7626_v26, %v249_v51 }
 0x13c   :  { %v8613_v32 = vadd.f32 %v293_v24, %v286_v28  ;;  %v8615_v33 = vadd.f32 %v293_v24, %v288_v29  ;;  %v287_v34 = vmul.f32 %v285_v25, %v275_v30  ;;  %v289_v35 = vmul.f32 %v285_v25, %v277_v31 }
 0x13e   :  { %v302_v36 = vmax.f32 %v8613_v32, 0.0  ;;  %v304_v37 = vmax.f32 %v8615_v33, 0.0  ;;  %v299_v38 = vadd.f32 %v297_v27, %v287_v34  ;;  %v301_v39 = vadd.f32 %v297_v27, %v289_v35 }
 0x140   :  { %v303_v40 = vmax.f32 %v299_v38, 0.0  ;;  %v305_v41 = vmax.f32 %v301_v39, 0.0 }
 0x141   :  { %8519 = dma.done.wait [#allocation5], 8192 }
 0x142   :  { %8520 = vsyncadd [#allocation5], 4294959104  ;;  %v311_v42 = vpack.c.bf16 %v305_v41, %v303_v40  ;;  %v7627_v43 = vld [vmem:[#allocation2 + $0xe4] ss:$16 sps:$4 sm:$0xff]   ;;  %v7629_v44 = vld [vmem:[#allocation2 + $0xec] ss:$16 sps:$4 sm:$0xff]  }
 0x143   :  { %696 = vmatprep.subr.bf16.mxu1 %v7627_v43  ;;  %v7631_v45 = vld [vmem:[#allocation2 + $0xe0] ss:$16 sps:$4 sm:$0xff]   ;;  %v7632_v46 = vld [vmem:[#allocation2 + $0xe8] ss:$16 sps:$4 sm:$0xff]   ;;  %739 = vmatprep.subr.bf16.mxu0 %v7629_v44  ;;  %v7633_v47 = vld [vmem:[#allocation2 + $0xc4] ss:$16 sps:$4 sm:$0xff]  }
 0x144   :  { %728 = vmatprep.mubr.bf16.mxu1 %v311_v42  ;;  %771 = vmatprep.mubr.bf16.mxu0 %v311_v42  ;;  %v7635_v48 = vld [vmem:[#allocation2 + $0xcc] ss:$16 sps:$4 sm:$0xff]   ;;  %v7637_v49 = vld [vmem:[#allocation2 + $0xc0] ss:$16 sps:$4 sm:$0xff]   ;;  %v7638_v50 = vld [vmem:[#allocation2 + $0xc8] ss:$16 sps:$4 sm:$0xff]  }
 0x145   :  { %697 = vmatpush1.bf16.msra.mxu1 %v7631_v45  ;;  %740 = vmatpush1.bf16.msra.mxu0 %v7632_v46  ;;  %v7639_v51 = vld [vmem:[#allocation2 + $0xa4] ss:$16 sps:$4 sm:$0xff]   ;;  %v7641_v52 = vld [vmem:[#allocation2 + $0xac] ss:$16 sps:$4 sm:$0xff]   ;;  %v7643_v53 = vld [vmem:[#allocation2 + $0xa0] ss:$16 sps:$4 sm:$0xff]  }
 0x146   :  { %698 = vmatprep.subr.bf16.mxu1 %v7633_v47  ;;  %741 = vmatprep.subr.bf16.mxu0 %v7635_v48  ;;  %v7644_v54 = vld [vmem:[#allocation2 + $0xa8] ss:$16 sps:$4 sm:$0xff]   ;;  %v7645_v55 = vld [vmem:[#allocation2 + $0x84] ss:$16 sps:$4 sm:$0xff]   ;;  %v7647_v56 = vld [vmem:[#allocation2 + $0x8c] ss:$16 sps:$4 sm:$0xff]  }
 0x147   :  { %v7649_v57 = vld [vmem:[#allocation2 + $0x80] ss:$16 sps:$4 sm:$0xff]   ;;  %v7650_v58 = vld [vmem:[#allocation2 + $0x88] ss:$16 sps:$4 sm:$0xff]   ;;  %v7651_v59 = vld [vmem:[#allocation2 + $0x64] ss:$16 sps:$4 sm:$0xff]  }
 0x148   :  { %v7653_v60 = vld [vmem:[#allocation2 + $0x6c] ss:$16 sps:$4 sm:$0xff]   ;;  %v7655_v61 = vld [vmem:[#allocation2 + $0x60] ss:$16 sps:$4 sm:$0xff]   ;;  %v7656_v62 = vld [vmem:[#allocation2 + $0x68] ss:$16 sps:$4 sm:$0xff]  }
 0x149   :  { %699 = vmatpush1.bf16.msra.mxu1 %v7637_v49  ;;  %742 = vmatpush1.bf16.msra.mxu0 %v7638_v50  ;;  %v7657_v63 = vld [vmem:[#allocation2 + $0x44] ss:$16 sps:$4 sm:$0xff]   ;;  %v7659_v0 = vld [vmem:[#allocation2 + $0x4c] ss:$16 sps:$4 sm:$0xff]   ;;  %v7661_v7 = vld [vmem:[#allocation2 + $0x40] ss:$16 sps:$4 sm:$0xff]  }
 0x14a   :  { %700 = vmatprep.subr.bf16.mxu1 %v7639_v51  ;;  %743 = vmatprep.subr.bf16.mxu0 %v7641_v52  ;;  %v7662_v8 = vld [vmem:[#allocation2 + $0x48] ss:$16 sps:$4 sm:$0xff]   ;;  %v7663_v9 = vld [vmem:[#allocation2 + $0x24] ss:$16 sps:$4 sm:$0xff]   ;;  %v7665_v10 = vld [vmem:[#allocation2 + $0x2c] ss:$16 sps:$4 sm:$0xff]  }
 0x14b   :  { %v7667_v11 = vld [vmem:[#allocation2 + $0x20] ss:$16 sps:$4 sm:$0xff]   ;;  %v7668_v12 = vld [vmem:[#allocation2 + $0x28] ss:$16 sps:$4 sm:$0xff]   ;;  %v7669_v13 = vld [vmem:[#allocation2 + $0x4] ss:$16 sps:$4 sm:$0xff]  }
 0x14c   :  { %v7671_v14 = vld [vmem:[#allocation2 + $0xc] ss:$16 sps:$4 sm:$0xff]   ;;  %v7673_v16 = vld [vmem:[#allocation2] ss:$16 sps:$4 sm:$0xff]   ;;  %v7674_v18 = vld [vmem:[#allocation2 + $0x8] ss:$16 sps:$4 sm:$0xff]  }
 0x14d   :  { %701 = vmatpush1.bf16.msra.mxu1 %v7643_v53  ;;  %744 = vmatpush1.bf16.msra.mxu0 %v7644_v54  ;;  %v7675_v20 = vld [vmem:[#allocation2 + $0x1e4] ss:$16 sps:$4 sm:$0xff]   ;;  %v7677_v21 = vld [vmem:[#allocation2 + $0x1ec] ss:$16 sps:$4 sm:$0xff]   ;;  %v7679_v22 = vld [vmem:[#allocation2 + $0x1e0] ss:$16 sps:$4 sm:$0xff]  }
 0x14e   :  { %702 = vmatprep.subr.bf16.mxu1 %v7645_v55  ;;  %745 = vmatprep.subr.bf16.mxu0 %v7647_v56  ;;  %v7680_v23 = vld [vmem:[#allocation2 + $0x1e8] ss:$16 sps:$4 sm:$0xff]   ;;  %v7681_v24 = vld [vmem:[#allocation2 + $0x1c4] ss:$16 sps:$4 sm:$0xff]   ;;  %v7683_v25 = vld [vmem:[#allocation2 + $0x1cc] ss:$16 sps:$4 sm:$0xff]   ;;  %v310_v56 = vpack.c.bf16 %v304_v37, %v302_v36 }
 0x14f   :  { %v7685_v26 = vld [vmem:[#allocation2 + $0x1c0] ss:$16 sps:$4 sm:$0xff]   ;;  %v7686_v27 = vld [vmem:[#allocation2 + $0x1c8] ss:$16 sps:$4 sm:$0xff]   ;;  %v7687_v28 = vld [vmem:[#allocation2 + $0x1a4] ss:$16 sps:$4 sm:$0xff]  }
 0x150   :  { %v7689_v29 = vld [vmem:[#allocation2 + $0x1ac] ss:$16 sps:$4 sm:$0xff]   ;;  %v7691_v30 = vld [vmem:[#allocation2 + $0x1a0] ss:$16 sps:$4 sm:$0xff]   ;;  %v7692_v31 = vld [vmem:[#allocation2 + $0x1a8] ss:$16 sps:$4 sm:$0xff]  }
 0x151   :  { %703 = vmatpush1.bf16.msra.mxu1 %v7649_v57  ;;  %746 = vmatpush1.bf16.msra.mxu0 %v7650_v58  ;;  %v7693_v34 = vld [vmem:[#allocation2 + $0x184] ss:$16 sps:$4 sm:$0xff]   ;;  %v7695_v35 = vld [vmem:[#allocation2 + $0x18c] ss:$16 sps:$4 sm:$0xff]   ;;  %v7697_v38 = vld [vmem:[#allocation2 + $0x180] ss:$16 sps:$4 sm:$0xff]  }
 0x152   :  { %704 = vmatprep.subr.bf16.mxu1 %v7651_v59  ;;  %747 = vmatprep.subr.bf16.mxu0 %v7653_v60  ;;  %v7698_v39 = vld [vmem:[#allocation2 + $0x188] ss:$16 sps:$4 sm:$0xff]   ;;  %v7699_v40 = vld [vmem:[#allocation2 + $0x164] ss:$16 sps:$4 sm:$0xff]   ;;  %v7701_v41 = vld [vmem:[#allocation2 + $0x16c] ss:$16 sps:$4 sm:$0xff]  }
 0x153   :  { %v7703_v42 = vld [vmem:[#allocation2 + $0x160] ss:$16 sps:$4 sm:$0xff]   ;;  %v7704_v43 = vld [vmem:[#allocation2 + $0x168] ss:$16 sps:$4 sm:$0xff]   ;;  %v7705_v44 = vld [vmem:[#allocation2 + $0x144] ss:$16 sps:$4 sm:$0xff]  }
 0x154   :  { %v7707_v45 = vld [vmem:[#allocation2 + $0x14c] ss:$16 sps:$4 sm:$0xff]   ;;  %v7709_v46 = vld [vmem:[#allocation2 + $0x140] ss:$16 sps:$4 sm:$0xff]   ;;  %v7710_v47 = vld [vmem:[#allocation2 + $0x148] ss:$16 sps:$4 sm:$0xff]  }
 0x155   :  { %705 = vmatpush1.bf16.msra.mxu1 %v7655_v61  ;;  %748 = vmatpush1.bf16.msra.mxu0 %v7656_v62  ;;  %v7711_v48 = vld [vmem:[#allocation2 + $0x124] ss:$16 sps:$4 sm:$0xff]   ;;  %v7713_v49 = vld [vmem:[#allocation2 + $0x12c] ss:$16 sps:$4 sm:$0xff]   ;;  %v7715_v50 = vld [vmem:[#allocation2 + $0x120] ss:$16 sps:$4 sm:$0xff]  }
 0x156   :  { %706 = vmatprep.subr.bf16.mxu1 %v7657_v63  ;;  %749 = vmatprep.subr.bf16.mxu0 %v7659_v0  ;;  %v7716_v51 = vld [vmem:[#allocation2 + $0x128] ss:$16 sps:$4 sm:$0xff]   ;;  %v7717_v52 = vld [vmem:[#allocation2 + $0x104] ss:$16 sps:$4 sm:$0xff]   ;;  %v7719_v53 = vld [vmem:[#allocation2 + $0x10c] ss:$16 sps:$4 sm:$0xff]  }
 0x157   :  { %v7721_v54 = vld [vmem:[#allocation2 + $0x100] ss:$16 sps:$4 sm:$0xff]   ;;  %v7722_v55 = vld [vmem:[#allocation2 + $0x108] ss:$16 sps:$4 sm:$0xff]  }
 0x159   :  { %707 = vmatpush1.bf16.msra.mxu1 %v7661_v7  ;;  %750 = vmatpush1.bf16.msra.mxu0 %v7662_v8 }
 0x15a   :  { %708 = vmatprep.subr.bf16.mxu1 %v7663_v9  ;;  %751 = vmatprep.subr.bf16.mxu0 %v7665_v10 }
 0x15d   :  { %709 = vmatpush1.bf16.msra.mxu1 %v7667_v11  ;;  %752 = vmatpush1.bf16.msra.mxu0 %v7668_v12 }
 0x15e   :  { %710 = vmatprep.subr.bf16.mxu1 %v7669_v13  ;;  %753 = vmatprep.subr.bf16.mxu0 %v7671_v14 }
 0x161   :  { %711 = vmatpush1.bf16.msra.mxu1 %v7673_v16  ;;  %754 = vmatpush1.bf16.msra.mxu0 %v7674_v18 }
 0x162   :  { %712 = vmatprep.subr.bf16.mxu1 %v7675_v20  ;;  %755 = vmatprep.subr.bf16.mxu0 %v7677_v21 }
 0x165   :  { %713 = vmatpush2.bf16.msra.mxu1 %v7679_v22  ;;  %756 = vmatpush2.bf16.msra.mxu0 %v7680_v23 }
 0x166   :  { %714 = vmatprep.subr.bf16.mxu1 %v7681_v24  ;;  %757 = vmatprep.subr.bf16.mxu0 %v7683_v25 }
 0x169   :  { %715 = vmatpush2.bf16.msra.mxu1 %v7685_v26  ;;  %758 = vmatpush2.bf16.msra.mxu0 %v7686_v27 }
 0x16a   :  { %716 = vmatprep.subr.bf16.mxu1 %v7687_v28  ;;  %759 = vmatprep.subr.bf16.mxu0 %v7689_v29 }
 0x16d   :  { %717 = vmatpush2.bf16.msra.mxu1 %v7691_v30  ;;  %760 = vmatpush2.bf16.msra.mxu0 %v7692_v31 }
 0x16e   :  { %718 = vmatprep.subr.bf16.mxu1 %v7693_v34  ;;  %761 = vmatprep.subr.bf16.mxu0 %v7695_v35 }
 0x171   :  { %719 = vmatpush2.bf16.msra.mxu1 %v7697_v38  ;;  %762 = vmatpush2.bf16.msra.mxu0 %v7698_v39 }
 0x172   :  { %720 = vmatprep.subr.bf16.mxu1 %v7699_v40  ;;  %763 = vmatprep.subr.bf16.mxu0 %v7701_v41 }
 0x175   :  { %721 = vmatpush2.bf16.msra.mxu1 %v7703_v42  ;;  %764 = vmatpush2.bf16.msra.mxu0 %v7704_v43 }
 0x176   :  { %722 = vmatprep.subr.bf16.mxu1 %v7705_v44  ;;  %765 = vmatprep.subr.bf16.mxu0 %v7707_v45 }
 0x179   :  { %723 = vmatpush2.bf16.msra.mxu1 %v7709_v46  ;;  %766 = vmatpush2.bf16.msra.mxu0 %v7710_v47 }
 0x17a   :  { %724 = vmatprep.subr.bf16.mxu1 %v7711_v48  ;;  %767 = vmatprep.subr.bf16.mxu0 %v7713_v49 }
 0x17d   :  { %725 = vmatpush2.bf16.msra.mxu1 %v7715_v50  ;;  %768 = vmatpush2.bf16.msra.mxu0 %v7716_v51 }
 0x17e   :  { %726 = vmatprep.subr.bf16.mxu1 %v7717_v52  ;;  %769 = vmatprep.subr.bf16.mxu0 %v7719_v53 }
 0x181   :  { %727 = vmatpush2.bf16.msra.mxu1 %v7721_v54  ;;  %770 = vmatpush2.bf16.msra.mxu0 %v7722_v55 }
 0x184   :  { %729 = vmatmul.mubr.bf16.vlgmr.msra.gmra.mxu1 %v310_v56  ;;  %772 = vmatmul.mubr.bf16.vlgmr.msra.gmra.mxu0 %v310_v56 }
 0x244   :  { %v730_v57 = vpop.f32.mrf.mxu1  ;;  %v773_v58 = vpop.f32.mrf.mxu0 }
 0x246   :  { %v732_v59 = vpop.f32.mrf.mxu1  ;;  %v775_v60 = vpop.f32.mrf.mxu0 }
 0x248   :  { %v734_v61 = vpop.f32.mrf.mxu1  ;;  %v777_v62 = vpop.f32.mrf.mxu0 }
 0x249   :  { %v782_v63 = vadd.f32 %v734_v61, %v730_v57  ;;  %v796_v0 = vadd.f32 %v777_v62, %v773_v58 }
 0x24a   :  { %v736_v7 = vpop.f32.mrf.mxu1  ;;  %v779_v8 = vpop.f32.mrf.mxu0 }
 0x24b   :  { %v783_v9 = vrot.slane %v782_v63, 4  ;;  %v797_v10 = vrot.slane %v796_v0, 4  ;;  %v789_v32 = vadd.f32 %v736_v7, %v732_v59  ;;  %v803_v11 = vadd.f32 %v779_v8, %v775_v60 }
 0x24d   :  { %v784_v33 = vadd.f32 %v783_v9, %v782_v63  ;;  %v798_v36 = vadd.f32 %v797_v10, %v796_v0  ;;  %v790_v37 = vrot.slane %v789_v32, 4  ;;  %v804_v12 = vrot.slane %v803_v11, 4 }
 0x24f   :  { %v785_v13 = vrot.slane %v784_v33, 2  ;;  %v799_v14 = vrot.slane %v798_v36, 2  ;;  %v791_v16 = vadd.f32 %v790_v37, %v789_v32  ;;  %v805_v18 = vadd.f32 %v804_v12, %v803_v11 }
 0x251   :  { %v786_v20 = vadd.f32 %v785_v13, %v784_v33  ;;  %v800_v21 = vadd.f32 %v799_v14, %v798_v36  ;;  %v792_v22 = vrot.slane %v791_v16, 2  ;;  %v806_v23 = vrot.slane %v805_v18, 2 }
 0x253   :  { %v787_v24 = vrot.slane %v786_v20, 1  ;;  %v801_v25 = vrot.slane %v800_v21, 1  ;;  %v793_v26 = vadd.f32 %v792_v22, %v791_v16  ;;  %v807_v27 = vadd.f32 %v806_v23, %v805_v18 }
 0x255   :  { %v788_v28 = vadd.f32 %v787_v24, %v786_v20  ;;  %v802_v29 = vadd.f32 %v801_v25, %v800_v21  ;;  %v794_v30 = vrot.slane %v793_v26, 1  ;;  %v808_v31 = vrot.slane %v807_v27, 1 }
 0x257   :  { %v810_v34 = vmul.f32 0.0625, %v788_v28  ;;  %v812_v35 = vmul.f32 0.0625, %v802_v29  ;;  %v795_v38 = vadd.f32 %v794_v30, %v793_v26  ;;  %v809_v39 = vadd.f32 %v808_v31, %v807_v27 }
 0x259   :  { %v8623_v40 = vsub.f32 %v730_v57, %v810_v34  ;;  %v8625_v41 = vsub.f32 %v734_v61, %v810_v34  ;;  %v8627_v42 = vsub.f32 %v773_v58, %v812_v35  ;;  %v8629_v43 = vsub.f32 %v777_v62, %v812_v35 }
 0x25a   :  { %v811_v44 = vmul.f32 0.0625, %v795_v38  ;;  %v813_v45 = vmul.f32 0.0625, %v809_v39  ;;  %v880_v39 = vsub.s32 2, %v8601_v15 }
 0x25b   :  { %v822_v46 = vmul.f32 %v8623_v40, %v8623_v40  ;;  %v826_v47 = vmul.f32 %v8625_v41, %v8625_v41  ;;  %v824_v48 = vmul.f32 %v8627_v42, %v8627_v42  ;;  %v828_v49 = vmul.f32 %v8629_v43, %v8629_v43 }
 0x25c   :  { %v8639_v50 = vsub.f32 %v732_v59, %v811_v44  ;;  %v8641_v51 = vsub.f32 %v736_v7, %v811_v44  ;;  %v8643_v52 = vsub.f32 %v775_v60, %v813_v45  ;;  %v8645_v53 = vsub.f32 %v779_v8, %v813_v45 }
 0x25d   :  { %v830_v54 = vadd.f32 %v826_v47, %v822_v46  ;;  %v844_v55 = vadd.f32 %v828_v49, %v824_v48  ;;  %v904_v44 = vsub.s32 3, %v8601_v15  ;;  %v881_v45 = vrot.slane %v8604_v17, %v880_v39 }
 0x25e   :  { %v823_v56 = vmul.f32 %v8639_v50, %v8639_v50  ;;  %v827_v57 = vmul.f32 %v8641_v51, %v8641_v51  ;;  %v825_v58 = vmul.f32 %v8643_v52, %v8643_v52  ;;  %v829_v59 = vmul.f32 %v8645_v53, %v8645_v53 }
 0x25f   :  { %v831_v61 = vrot.slane %v830_v54, 4  ;;  %v845_v62 = vrot.slane %v844_v55, 4  ;;  %v889_v47 = vrot.slane %v8574_v1, %v880_v39 }
 0x260   :  { %v837_v60 = vadd.f32 %v827_v57, %v823_v56  ;;  %v851_v63 = vadd.f32 %v829_v59, %v825_v58  ;;  %v913_v56 = vrot.slane %v8574_v1, %v904_v44  ;;  %v885_v59 = vrot.slane %v8607_v19, %v880_v39 }
 0x261   :  { %v832_v0 = vadd.f32 %v831_v61, %v830_v54  ;;  %v846_v7 = vadd.f32 %v845_v62, %v844_v55  ;;  %v905_v55 = vrot.slane %v8604_v17, %v904_v44  ;;  %v893_v61 = vrot.slane %v8576_v2, %v880_v39 }
 0x262   :  { %v838_v8 = vrot.slane %v837_v60, 4  ;;  %v852_v9 = vrot.slane %v851_v63, 4 }
 0x263   :  { %v833_v10 = vrot.slane %v832_v0, 2  ;;  %v847_v32 = vrot.slane %v846_v7, 2 }
 0x264   :  { %v839_v11 = vadd.f32 %v838_v8, %v837_v60  ;;  %v853_v33 = vadd.f32 %v852_v9, %v851_v63 }
 0x265   :  { %v834_v36 = vadd.f32 %v833_v10, %v832_v0  ;;  %v848_v37 = vadd.f32 %v847_v32, %v846_v7  ;;  %v909_v0 = vrot.slane %v8607_v19, %v904_v44 }
 0x266   :  { %v840_v12 = vrot.slane %v839_v11, 2  ;;  %v854_v13 = vrot.slane %v853_v33, 2 }
 0x267   :  { %v835_v14 = vrot.slane %v834_v36, 1  ;;  %v849_v16 = vrot.slane %v848_v37, 1 }
 0x268   :  { %v841_v18 = vadd.f32 %v840_v12, %v839_v11  ;;  %v855_v20 = vadd.f32 %v854_v13, %v853_v33 }
 0x269   :  { %v836_v21 = vadd.f32 %v835_v14, %v834_v36  ;;  %v850_v22 = vadd.f32 %v849_v16, %v848_v37 }
 0x26a   :  { %v842_v23 = vrot.slane %v841_v18, 1  ;;  %v856_v24 = vrot.slane %v855_v20, 1 }
 0x26b   :  { %v858_v25 = vmul.f32 0.0625, %v836_v21  ;;  %v860_v26 = vmul.f32 0.0625, %v850_v22 }
 0x26c   :  { %v843_v27 = vadd.f32 %v842_v23, %v841_v18  ;;  %v857_v28 = vadd.f32 %v856_v24, %v855_v20 }
 0x26d   :  { %v862_v29 = vadd.f32 1e-05, %v858_v25  ;;  %v864_v30 = vadd.f32 1e-05, %v860_v26 }
 0x26e   :  { %v859_v31 = vmul.f32 0.0625, %v843_v27  ;;  %v861_v34 = vmul.f32 0.0625, %v857_v28 }
 0x26f   :  { %7723 = vrsqrt.f32 %v862_v29 }
 0x270   :  { %7725 = vrsqrt.f32 %v864_v30  ;;  %v863_v35 = vadd.f32 1e-05, %v859_v31  ;;  %v865_v38 = vadd.f32 1e-05, %v861_v34 }
 0x272   :  { %7727 = vrsqrt.f32 %v863_v35 }
 0x273   :  { %7729 = vrsqrt.f32 %v865_v38 }
 0x27c   :  { %v7724_v46 = vpop.eup %7723 }
 0x27d   :  { %v7726_v48 = vpop.eup %7725  ;;  %v870_v49 = vmul.f32 %v7724_v46, %v8623_v40  ;;  %v874_v54 = vmul.f32 %v7724_v46, %v8625_v41  ;;  %v917_v40 = vrot.slane %v8576_v2, %v904_v44 }
 0x27e   :  { %v872_v57 = vmul.f32 %v7726_v48, %v8627_v42  ;;  %v876_v58 = vmul.f32 %v7726_v48, %v8629_v43 }
 0x27f   :  { %v7728_v62 = vpop.eup %7727  ;;  %v894_v60 = vmul.f32 %v881_v45, %v870_v49  ;;  %v898_v63 = vmul.f32 %v881_v45, %v874_v54 }
 0x280   :  { %v7730_v41 = vpop.eup %7729  ;;  %v896_v7 = vmul.f32 %v889_v47, %v872_v57  ;;  %v900_v8 = vmul.f32 %v889_v47, %v876_v58  ;;  %v871_v9 = vmul.f32 %v7728_v62, %v8639_v50  ;;  %v875_v42 = vmul.f32 %v7728_v62, %v8641_v51 }
 0x281   :  { %v8671_v10 = vadd.f32 %v905_v55, %v894_v60  ;;  %v8673_v43 = vadd.f32 %v905_v55, %v898_v63  ;;  %v873_v32 = vmul.f32 %v7730_v41, %v8643_v52  ;;  %v877_v11 = vmul.f32 %v7730_v41, %v8645_v53 }
 0x282   :  { %v8677_v33 = vadd.f32 %v913_v56, %v896_v7  ;;  %v8679_v36 = vadd.f32 %v913_v56, %v900_v8  ;;  %v895_v37 = vmul.f32 %v885_v59, %v871_v9  ;;  %v899_v12 = vmul.f32 %v885_v59, %v875_v42 }
 0x283   :  { %v926_v13 = vmax.f32 %v8671_v10, 0.0  ;;  %v930_v50 = vmax.f32 %v8673_v43, 0.0  ;;  %v897_v14 = vmul.f32 %v893_v61, %v873_v32  ;;  %v901_v51 = vmul.f32 %v893_v61, %v877_v11 }
 0x284   :  { %v928_v16 = vmax.f32 %v8677_v33, 0.0  ;;  %v932_v18 = vmax.f32 %v8679_v36, 0.0  ;;  %v919_v20 = vadd.f32 %v909_v0, %v895_v37  ;;  %v923_v52 = vadd.f32 %v909_v0, %v899_v12 }
 0x285   :  { %v921_v21 = vadd.f32 %v917_v40, %v897_v14  ;;  %v925_v53 = vadd.f32 %v917_v40, %v901_v51 }
 0x286   :  { %v927_v22 = vmax.f32 %v919_v20, 0.0  ;;  %v931_v23 = vmax.f32 %v923_v52, 0.0 }
 0x287   :  { %v929_v24 = vmax.f32 %v921_v21, 0.0  ;;  %v933_v25 = vmax.f32 %v925_v53, 0.0 }
 0x288   :  { %8521 = dma.done.wait [#allocation5 + $0x1], 32768 }
 0x289   :  { %8522 = vsyncadd [#allocation5 + $0x1], 4294934528  ;;  %v8685_v26 = vpack.c.bf16 %v931_v23, %v927_v22  ;;  %v8687_v27 = vpack.c.bf16 %v933_v25, %v929_v24  ;;  %v998_v28 = vld [vmem:[#allocation3 + $0x1c0] sm:$0xff]  ;;  %v987_v43 = vld [vmem:[#allocation3 + $0x168] sm:$0xff] }
 0x28a   :  { %v1002_v29 = vld [vmem:[#allocation3 + $0x1e0] sm:$0xff] }
 0x28b   :  { %2510 = vmatprep.mubr.bf16.mxu1 %v8685_v26  ;;  %2553 = vmatprep.mubr.bf16.mxu0 %v8687_v27  ;;  %v1126_v30 = vld [vmem:[#allocation3 + $0x5c0] sm:$0xff]  ;;  %v6853_v31 = vcombine.high %v998_v28, %v1002_v29  ;;  %v6852_v35 = vcombine.low %v998_v28, %v1002_v29 }
 0x28c   :  { %v1130_v34 = vld [vmem:[#allocation3 + $0x5e0] sm:$0xff] }
 0x28d   :  { %v990_v38 = vld [vmem:[#allocation3 + $0x180] sm:$0xff]  ;;  %v6981_v44 = vcombine.high %v1126_v30, %v1130_v34  ;;  %v6980_v45 = vcombine.low %v1126_v30, %v1130_v34  ;;  %2478 = vmatprep.subr.bf16.mxu1 %v6853_v31 }
 0x28e   :  { %v994_v39 = vld [vmem:[#allocation3 + $0x1a0] sm:$0xff]  ;;  %2479 = vmatpush1.bf16.msra.mxu1 %v6852_v35 }
 0x28f   :  { %v6845_v46 = vcombine.high %v990_v38, %v994_v39  ;;  %v1118_v47 = vld [vmem:[#allocation3 + $0x580] sm:$0xff]  ;;  %2521 = vmatprep.subr.bf16.mxu0 %v6981_v44  ;;  %v6844_v58 = vcombine.low %v990_v38, %v994_v39 }
 0x290   :  { %v1122_v48 = vld [vmem:[#allocation3 + $0x5a0] sm:$0xff]  ;;  %2522 = vmatpush1.bf16.msra.mxu0 %v6980_v45 }
 0x291   :  { %v982_v49 = vld [vmem:[#allocation3 + $0x140] sm:$0xff]  ;;  %v6973_v54 = vcombine.high %v1118_v47, %v1122_v48  ;;  %2480 = vmatprep.subr.bf16.mxu1 %v6845_v46  ;;  %v6972_v59 = vcombine.low %v1118_v47, %v1122_v48 }
 0x292   :  { %v986_v55 = vld [vmem:[#allocation3 + $0x160] sm:$0xff]  ;;  %2481 = vmatpush1.bf16.msra.mxu1 %v6844_v58 }
 0x293   :  { %v1110_v56 = vld [vmem:[#allocation3 + $0x540] sm:$0xff]  ;;  %v6837_v61 = vcombine.high %v982_v49, %v986_v55  ;;  %2523 = vmatprep.subr.bf16.mxu0 %v6973_v54  ;;  %v6836_v41 = vcombine.low %v982_v49, %v986_v55 }
 0x294   :  { %v1114_v57 = vld [vmem:[#allocation3 + $0x560] sm:$0xff]  ;;  %2524 = vmatpush1.bf16.msra.mxu0 %v6972_v59 }
 0x295   :  { %v6965_v62 = vcombine.high %v1110_v56, %v1114_v57  ;;  %v974_v60 = vld [vmem:[#allocation3 + $0x100] sm:$0xff]  ;;  %2482 = vmatprep.subr.bf16.mxu1 %v6837_v61  ;;  %v6964_v7 = vcombine.low %v1110_v56, %v1114_v57 }
 0x296   :  { %v978_v63 = vld [vmem:[#allocation3 + $0x120] sm:$0xff]  ;;  %2483 = vmatpush1.bf16.msra.mxu1 %v6836_v41 }
 0x297   :  { %v1102_v0 = vld [vmem:[#allocation3 + $0x500] sm:$0xff]  ;;  %v6829_v8 = vcombine.high %v974_v60, %v978_v63  ;;  %2525 = vmatprep.subr.bf16.mxu0 %v6965_v62  ;;  %v6828_v12 = vcombine.low %v974_v60, %v978_v63 }
 0x298   :  { %v1106_v40 = vld [vmem:[#allocation3 + $0x520] sm:$0xff]  ;;  %2526 = vmatpush1.bf16.msra.mxu0 %v6964_v7 }
 0x299   :  { %v6957_v9 = vcombine.high %v1102_v0, %v1106_v40  ;;  %v966_v42 = vld [vmem:[#allocation3 + $0xc0] sm:$0xff]  ;;  %2484 = vmatprep.subr.bf16.mxu1 %v6829_v8  ;;  %v6956_v14 = vcombine.low %v1102_v0, %v1106_v40 }
 0x29a   :  { %v970_v32 = vld [vmem:[#allocation3 + $0xe0] sm:$0xff]  ;;  %2485 = vmatpush1.bf16.msra.mxu1 %v6828_v12 }
 0x29b   :  { %v1094_v11 = vld [vmem:[#allocation3 + $0x4c0] sm:$0xff]  ;;  %v6821_v51 = vcombine.high %v966_v42, %v970_v32  ;;  %2527 = vmatprep.subr.bf16.mxu0 %v6957_v9  ;;  %v6820_v23 = vcombine.low %v966_v42, %v970_v32 }
 0x29c   :  { %v1098_v37 = vld [vmem:[#allocation3 + $0x4e0] sm:$0xff]  ;;  %2528 = vmatpush1.bf16.msra.mxu0 %v6956_v14 }
 0x29d   :  { %v6949_v20 = vcombine.high %v1094_v11, %v1098_v37  ;;  %v958_v52 = vld [vmem:[#allocation3 + $0x80] sm:$0xff]  ;;  %2486 = vmatprep.subr.bf16.mxu1 %v6821_v51  ;;  %v6948_v24 = vcombine.low %v1094_v11, %v1098_v37 }
 0x29e   :  { %v962_v21 = vld [vmem:[#allocation3 + $0xa0] sm:$0xff]  ;;  %2487 = vmatpush1.bf16.msra.mxu1 %v6820_v23 }
 0x29f   :  { %v1086_v53 = vld [vmem:[#allocation3 + $0x480] sm:$0xff]  ;;  %v6813_v25 = vcombine.high %v958_v52, %v962_v21  ;;  %2529 = vmatprep.subr.bf16.mxu0 %v6949_v20  ;;  %v6812_v35 = vcombine.low %v958_v52, %v962_v21 }
 0x2a0   :  { %v1090_v22 = vld [vmem:[#allocation3 + $0x4a0] sm:$0xff]  ;;  %2530 = vmatpush1.bf16.msra.mxu0 %v6948_v24 }
 0x2a1   :  { %v6941_v28 = vcombine.high %v1086_v53, %v1090_v22  ;;  %v950_v29 = vld [vmem:[#allocation3 + $0x40] sm:$0xff]  ;;  %2488 = vmatprep.subr.bf16.mxu1 %v6813_v25  ;;  %v6940_v38 = vcombine.low %v1086_v53, %v1090_v22 }
 0x2a2   :  { %v954_v30 = vld [vmem:[#allocation3 + $0x60] sm:$0xff]  ;;  %2489 = vmatpush1.bf16.msra.mxu1 %v6812_v35 }
 0x2a3   :  { %v1078_v31 = vld [vmem:[#allocation3 + $0x440] sm:$0xff]  ;;  %v6805_v39 = vcombine.high %v950_v29, %v954_v30  ;;  %2531 = vmatprep.subr.bf16.mxu0 %v6941_v28  ;;  %v6804_v49 = vcombine.low %v950_v29, %v954_v30 }
 0x2a4   :  { %v1082_v34 = vld [vmem:[#allocation3 + $0x460] sm:$0xff]  ;;  %2532 = vmatpush1.bf16.msra.mxu0 %v6940_v38 }
 0x2a5   :  { %v6933_v44 = vcombine.high %v1078_v31, %v1082_v34  ;;  %v942_v45 = vld [vmem:[#allocation3] sm:$0xff]  ;;  %2490 = vmatprep.subr.bf16.mxu1 %v6805_v39  ;;  %v6932_v54 = vcombine.low %v1078_v31, %v1082_v34 }
 0x2a6   :  { %v946_v46 = vld [vmem:[#allocation3 + $0x20] sm:$0xff]  ;;  %2491 = vmatpush1.bf16.msra.mxu1 %v6804_v49 }
 0x2a7   :  { %v1070_v47 = vld [vmem:[#allocation3 + $0x400] sm:$0xff]  ;;  %v6797_v55 = vcombine.high %v942_v45, %v946_v46  ;;  %2533 = vmatprep.subr.bf16.mxu0 %v6933_v44  ;;  %v6796_v62 = vcombine.low %v942_v45, %v946_v46 }
 0x2a8   :  { %v1074_v48 = vld [vmem:[#allocation3 + $0x420] sm:$0xff]  ;;  %2534 = vmatpush1.bf16.msra.mxu0 %v6932_v54 }
 0x2a9   :  { %v6925_v56 = vcombine.high %v1070_v47, %v1074_v48  ;;  %v1062_v57 = vld [vmem:[#allocation3 + $0x3c0] sm:$0xff]  ;;  %2492 = vmatprep.subr.bf16.mxu1 %v6797_v55  ;;  %v6924_v60 = vcombine.low %v1070_v47, %v1074_v48 }
 0x2aa   :  { %v1066_v58 = vld [vmem:[#allocation3 + $0x3e0] sm:$0xff]  ;;  %2493 = vmatpush1.bf16.msra.mxu1 %v6796_v62 }
 0x2ab   :  { %v1190_v59 = vld [vmem:[#allocation3 + $0x7c0] sm:$0xff]  ;;  %v6917_v63 = vcombine.high %v1062_v57, %v1066_v58  ;;  %2535 = vmatprep.subr.bf16.mxu0 %v6925_v56  ;;  %v6916_v9 = vcombine.low %v1062_v57, %v1066_v58 }
 0x2ac   :  { %v1194_v61 = vld [vmem:[#allocation3 + $0x7e0] sm:$0xff]  ;;  %2536 = vmatpush1.bf16.msra.mxu0 %v6924_v60 }
 0x2ad   :  { %v7045_v0 = vcombine.high %v1190_v59, %v1194_v61  ;;  %v1054_v40 = vld [vmem:[#allocation3 + $0x380] sm:$0xff]  ;;  %2494 = vmatprep.subr.bf16.mxu1 %v6917_v63  ;;  %v7044_v42 = vcombine.low %v1190_v59, %v1194_v61 }
 0x2ae   :  { %v1058_v41 = vld [vmem:[#allocation3 + $0x3a0] sm:$0xff]  ;;  %2495 = vmatpush2.bf16.msra.mxu1 %v6916_v9 }
 0x2af   :  { %v1182_v7 = vld [vmem:[#allocation3 + $0x780] sm:$0xff]  ;;  %v6909_v32 = vcombine.high %v1054_v40, %v1058_v41  ;;  %2537 = vmatprep.subr.bf16.mxu0 %v7045_v0  ;;  %v6908_v20 = vcombine.low %v1054_v40, %v1058_v41 }
 0x2b0   :  { %v1186_v8 = vld [vmem:[#allocation3 + $0x7a0] sm:$0xff]  ;;  %2538 = vmatpush2.bf16.msra.mxu0 %v7044_v42 }
 0x2b1   :  { %v7037_v11 = vcombine.high %v1182_v7, %v1186_v8  ;;  %v1046_v37 = vld [vmem:[#allocation3 + $0x340] sm:$0xff]  ;;  %2496 = vmatprep.subr.bf16.mxu1 %v6909_v32  ;;  %v7036_v52 = vcombine.low %v1182_v7, %v1186_v8 }
 0x2b2   :  { %v1050_v12 = vld [vmem:[#allocation3 + $0x360] sm:$0xff]  ;;  %2497 = vmatpush2.bf16.msra.mxu1 %v6908_v20  ;;  %v1003_v20 = vld [vmem:[#allocation3 + $0x1e8] sm:$0xff] }
 0x2b3   :  { %v1174_v14 = vld [vmem:[#allocation3 + $0x740] sm:$0xff]  ;;  %v6901_v21 = vcombine.high %v1046_v37, %v1050_v12  ;;  %2539 = vmatprep.subr.bf16.mxu0 %v7037_v11  ;;  %v6900_v28 = vcombine.low %v1046_v37, %v1050_v12 }
 0x2b4   :  { %v1178_v51 = vld [vmem:[#allocation3 + $0x760] sm:$0xff]  ;;  %2540 = vmatpush2.bf16.msra.mxu0 %v7036_v52  ;;  %v1127_v52 = vld [vmem:[#allocation3 + $0x5c8] sm:$0xff] }
 0x2b5   :  { %v7029_v53 = vcombine.high %v1174_v14, %v1178_v51  ;;  %v1038_v22 = vld [vmem:[#allocation3 + $0x300] sm:$0xff]  ;;  %2498 = vmatprep.subr.bf16.mxu1 %v6901_v21  ;;  %v7028_v29 = vcombine.low %v1174_v14, %v1178_v51  ;;  %v999_v51 = vld [vmem:[#allocation3 + $0x1c8] sm:$0xff] }
 0x2b6   :  { %v1042_v23 = vld [vmem:[#allocation3 + $0x320] sm:$0xff]  ;;  %2499 = vmatpush2.bf16.msra.mxu1 %v6900_v28  ;;  %v1131_v21 = vld [vmem:[#allocation3 + $0x5e8] sm:$0xff] }
 0x2b7   :  { %v1166_v24 = vld [vmem:[#allocation3 + $0x700] sm:$0xff]  ;;  %v6893_v30 = vcombine.high %v1038_v22, %v1042_v23  ;;  %2541 = vmatprep.subr.bf16.mxu0 %v7029_v53  ;;  %v6892_v44 = vcombine.low %v1038_v22, %v1042_v23  ;;  %v6855_v23 = vcombine.high %v999_v51, %v1003_v20  ;;  %v995_v28 = vld [vmem:[#allocation3 + $0x1a8] sm:$0xff] }
 0x2b8   :  { %v1170_v25 = vld [vmem:[#allocation3 + $0x720] sm:$0xff]  ;;  %2542 = vmatpush2.bf16.msra.mxu0 %v7028_v29  ;;  %v8695_v29 = vpack.c.bf16 %v930_v50, %v926_v13  ;;  %v1111_v13 = vld [vmem:[#allocation3 + $0x548] sm:$0xff] }
 0x2b9   :  { %v7021_v31 = vcombine.high %v1166_v24, %v1170_v25  ;;  %v1030_v34 = vld [vmem:[#allocation3 + $0x2c0] sm:$0xff]  ;;  %2500 = vmatprep.subr.bf16.mxu1 %v6893_v30  ;;  %v7020_v45 = vcombine.low %v1166_v24, %v1170_v25  ;;  %v6983_v24 = vcombine.high %v1127_v52, %v1131_v21  ;;  %v991_v25 = vld [vmem:[#allocation3 + $0x188] sm:$0xff] }
 0x2ba   :  { %v1034_v35 = vld [vmem:[#allocation3 + $0x2e0] sm:$0xff]  ;;  %2501 = vmatpush2.bf16.msra.mxu1 %v6892_v44  ;;  %v1119_v30 = vld [vmem:[#allocation3 + $0x588] sm:$0xff]  ;;  %v6846_v33 = vcombine.low %v991_v25, %v995_v28 }
 0x2bb   :  { %v1158_v38 = vld [vmem:[#allocation3 + $0x6c0] sm:$0xff]  ;;  %v6885_v46 = vcombine.high %v1030_v34, %v1034_v35  ;;  %2543 = vmatprep.subr.bf16.mxu0 %v7021_v31  ;;  %v6884_v56 = vcombine.low %v1030_v34, %v1034_v35  ;;  %v1123_v31 = vld [vmem:[#allocation3 + $0x5a8] sm:$0xff]  ;;  %v8701_v34 = vpack.c.bf16 %v932_v18, %v928_v16  ;;  %v6854_v35 = vcombine.low %v999_v51, %v1003_v20 }
 0x2bc   :  { %v1162_v39 = vld [vmem:[#allocation3 + $0x6e0] sm:$0xff]  ;;  %2544 = vmatpush2.bf16.msra.mxu0 %v7020_v45  ;;  %v6975_v10 = vcombine.high %v1119_v30, %v1123_v31  ;;  %v983_v44 = vld [vmem:[#allocation3 + $0x148] sm:$0xff]  ;;  %v6974_v36 = vcombine.low %v1119_v30, %v1123_v31 }
 0x2bd   :  { %v7013_v47 = vcombine.high %v1158_v38, %v1162_v39  ;;  %v1022_v48 = vld [vmem:[#allocation3 + $0x280] sm:$0xff]  ;;  %2502 = vmatprep.subr.bf16.mxu1 %v6885_v46  ;;  %v7012_v57 = vcombine.low %v1158_v38, %v1162_v39  ;;  %v6982_v38 = vcombine.low %v1127_v52, %v1131_v21  ;;  %v6847_v39 = vcombine.high %v991_v25, %v995_v28  ;;  %v1115_v50 = vld [vmem:[#allocation3 + $0x568] sm:$0xff] }
 0x2be   :  { %v1026_v49 = vld [vmem:[#allocation3 + $0x2a0] sm:$0xff]  ;;  %2503 = vmatpush2.bf16.msra.mxu1 %v6884_v56  ;;  %v6839_v16 = vcombine.high %v983_v44, %v987_v43  ;;  %v6967_v18 = vcombine.high %v1111_v13, %v1115_v50  ;;  %v975_v45 = vld [vmem:[#allocation3 + $0x108] sm:$0xff] }
 0x2bf   :  { %v1150_v54 = vld [vmem:[#allocation3 + $0x680] sm:$0xff]  ;;  %v6877_v58 = vcombine.high %v1022_v48, %v1026_v49  ;;  %2545 = vmatprep.subr.bf16.mxu0 %v7013_v47  ;;  %v6876_v0 = vcombine.low %v1022_v48, %v1026_v49  ;;  %v979_v46 = vld [vmem:[#allocation3 + $0x128] sm:$0xff]  ;;  %v6838_v49 = vcombine.low %v983_v44, %v987_v43 }
 0x2c0   :  { %v1154_v55 = vld [vmem:[#allocation3 + $0x6a0] sm:$0xff]  ;;  %2546 = vmatpush2.bf16.msra.mxu0 %v7012_v57  ;;  %v1103_v47 = vld [vmem:[#allocation3 + $0x508] sm:$0xff] }
 0x2c1   :  { %v7005_v59 = vcombine.high %v1150_v54, %v1154_v55  ;;  %v1014_v61 = vld [vmem:[#allocation3 + $0x240] sm:$0xff]  ;;  %2504 = vmatprep.subr.bf16.mxu1 %v6877_v58  ;;  %v7004_v40 = vcombine.low %v1150_v54, %v1154_v55  ;;  %v1107_v48 = vld [vmem:[#allocation3 + $0x528] sm:$0xff]  ;;  %v6966_v54 = vcombine.low %v1111_v13, %v1115_v50  ;;  %v6831_v55 = vcombine.high %v975_v45, %v979_v46 }
 0x2c2   :  { %v1018_v62 = vld [vmem:[#allocation3 + $0x260] sm:$0xff]  ;;  %2505 = vmatpush2.bf16.msra.mxu1 %v6876_v0  ;;  %v6959_v56 = vcombine.high %v1103_v47, %v1107_v48  ;;  %v967_v57 = vld [vmem:[#allocation3 + $0xc8] sm:$0xff] }
 0x2c3   :  { %v1142_v60 = vld [vmem:[#allocation3 + $0x640] sm:$0xff]  ;;  %v6869_v41 = vcombine.high %v1014_v61, %v1018_v62  ;;  %2547 = vmatprep.subr.bf16.mxu0 %v7005_v59  ;;  %v6868_v11 = vcombine.low %v1014_v61, %v1018_v62  ;;  %v971_v58 = vld [vmem:[#allocation3 + $0xe8] sm:$0xff]  ;;  %v6830_v62 = vcombine.low %v975_v45, %v979_v46 }
 0x2c4   :  { %v1146_v63 = vld [vmem:[#allocation3 + $0x660] sm:$0xff]  ;;  %2548 = vmatpush2.bf16.msra.mxu0 %v7004_v40  ;;  %v1095_v59 = vld [vmem:[#allocation3 + $0x4c8] sm:$0xff] }
 0x2c5   :  { %v6997_v7 = vcombine.high %v1142_v60, %v1146_v63  ;;  %v1006_v8 = vld [vmem:[#allocation3 + $0x200] sm:$0xff]  ;;  %2506 = vmatprep.subr.bf16.mxu1 %v6869_v41  ;;  %v6996_v37 = vcombine.low %v1142_v60, %v1146_v63  ;;  %v1099_v61 = vld [vmem:[#allocation3 + $0x4e8] sm:$0xff]  ;;  %v6958_v60 = vcombine.low %v1103_v47, %v1107_v48  ;;  %v6823_v63 = vcombine.high %v967_v57, %v971_v58 }
 0x2c6   :  { %v1010_v9 = vld [vmem:[#allocation3 + $0x220] sm:$0xff]  ;;  %2507 = vmatpush2.bf16.msra.mxu1 %v6868_v11  ;;  %v6951_v0 = vcombine.high %v1095_v59, %v1099_v61  ;;  %v959_v40 = vld [vmem:[#allocation3 + $0x88] sm:$0xff] }
 0x2c7   :  { %v1134_v42 = vld [vmem:[#allocation3 + $0x600] sm:$0xff]  ;;  %v6861_v12 = vcombine.high %v1006_v8, %v1010_v9  ;;  %2549 = vmatprep.subr.bf16.mxu0 %v6997_v7  ;;  %v6860_v53 = vcombine.low %v1006_v8, %v1010_v9  ;;  %v963_v41 = vld [vmem:[#allocation3 + $0xa8] sm:$0xff]  ;;  %v6822_v9 = vcombine.low %v967_v57, %v971_v58 }
 0x2c8   :  { %v1138_v32 = vld [vmem:[#allocation3 + $0x620] sm:$0xff]  ;;  %2550 = vmatpush2.bf16.msra.mxu0 %v6996_v37  ;;  %v1087_v7 = vld [vmem:[#allocation3 + $0x488] sm:$0xff]  ;;  %v6814_v20 = vcombine.low %v959_v40, %v963_v41 }
 0x2c9   :  { %v6989_v14 = vcombine.high %v1134_v42, %v1138_v32  ;;  %2508 = vmatprep.subr.bf16.mxu1 %v6861_v12  ;;  %v6988_v22 = vcombine.low %v1134_v42, %v1138_v32  ;;  %v1091_v8 = vld [vmem:[#allocation3 + $0x4a8] sm:$0xff]  ;;  %v6950_v42 = vcombine.low %v1095_v59, %v1099_v61  ;;  %v6815_v32 = vcombine.high %v959_v40, %v963_v41 }
 0x2ca   :  { %2509 = vmatpush2.bf16.msra.mxu1 %v6860_v53  ;;  %v6943_v11 = vcombine.high %v1087_v7, %v1091_v8  ;;  %v951_v37 = vld [vmem:[#allocation3 + $0x48] sm:$0xff]  ;;  %v6942_v52 = vcombine.low %v1087_v7, %v1091_v8 }
 0x2cb   :  { %2551 = vmatprep.subr.bf16.mxu0 %v6989_v14  ;;  %2564 = vmatprep.subr.bf16.mxu1 %v6855_v23  ;;  %v955_v12 = vld [vmem:[#allocation3 + $0x68] sm:$0xff] }
 0x2cc   :  { %2552 = vmatpush2.bf16.msra.mxu0 %v6988_v22  ;;  %v1079_v14 = vld [vmem:[#allocation3 + $0x448] sm:$0xff]  ;;  %v6807_v21 = vcombine.high %v951_v37, %v955_v12  ;;  %v6806_v28 = vcombine.low %v951_v37, %v955_v12 }
 0x2cd   :  { %2607 = vmatprep.subr.bf16.mxu0 %v6983_v24  ;;  %2511 = vmatmul.mubr.bf16.vlgmr.msra.gmra.mxu1 %v8695_v29  ;;  %v1083_v51 = vld [vmem:[#allocation3 + $0x468] sm:$0xff] }
 0x2ce   :  { %2565 = vmatpush1.bf16.msra.mxu1 %v6854_v35  ;;  %2596 = vmatprep.mubr.bf16.mxu1 %v8685_v26  ;;  %v6935_v53 = vcombine.high %v1079_v14, %v1083_v51  ;;  %v943_v22 = vld [vmem:[#allocation3 + $0x8] sm:$0xff]  ;;  %v6934_v30 = vcombine.low %v1079_v14, %v1083_v51 }
 0x2cf   :  { %2554 = vmatmul.mubr.bf16.vlgmr.msra.gmra.mxu0 %v8701_v34  ;;  %2566 = vmatprep.subr.bf16.mxu1 %v6847_v39  ;;  %v947_v23 = vld [vmem:[#allocation3 + $0x28] sm:$0xff] }
 0x2d0   :  { %2608 = vmatpush1.bf16.msra.mxu0 %v6982_v38  ;;  %2639 = vmatprep.mubr.bf16.mxu0 %v8687_v27  ;;  %v1071_v24 = vld [vmem:[#allocation3 + $0x408] sm:$0xff]  ;;  %v6799_v31 = vcombine.high %v943_v22, %v947_v23  ;;  %v6798_v43 = vcombine.low %v943_v22, %v947_v23 }
 0x2d1   :  { %2609 = vmatprep.subr.bf16.mxu0 %v6975_v10  ;;  %v1075_v25 = vld [vmem:[#allocation3 + $0x428] sm:$0xff] }
 0x2d2   :  { %2567 = vmatpush1.bf16.msra.mxu1 %v6846_v33  ;;  %v6927_v35 = vcombine.high %v1071_v24, %v1075_v25  ;;  %v1063_v38 = vld [vmem:[#allocation3 + $0x3c8] sm:$0xff]  ;;  %v6926_v13 = vcombine.low %v1071_v24, %v1075_v25 }
 0x2d3   :  { %2568 = vmatprep.subr.bf16.mxu1 %v6839_v16  ;;  %v1067_v39 = vld [vmem:[#allocation3 + $0x3e8] sm:$0xff] }
 0x2d4   :  { %2610 = vmatpush1.bf16.msra.mxu0 %v6974_v36  ;;  %v1191_v10 = vld [vmem:[#allocation3 + $0x7c8] sm:$0xff]  ;;  %v6919_v50 = vcombine.high %v1063_v38, %v1067_v39  ;;  %v6918_v46 = vcombine.low %v1063_v38, %v1067_v39 }
 0x2d5   :  { %2611 = vmatprep.subr.bf16.mxu0 %v6967_v18  ;;  %v1195_v44 = vld [vmem:[#allocation3 + $0x7e8] sm:$0xff] }
 0x2d6   :  { %2569 = vmatpush1.bf16.msra.mxu1 %v6838_v49  ;;  %v7047_v33 = vcombine.high %v1191_v10, %v1195_v44  ;;  %v1055_v36 = vld [vmem:[#allocation3 + $0x388] sm:$0xff]  ;;  %v7046_v47 = vcombine.low %v1191_v10, %v1195_v44 }
 0x2d7   :  { %2570 = vmatprep.subr.bf16.mxu1 %v6831_v55  ;;  %v1059_v16 = vld [vmem:[#allocation3 + $0x3a8] sm:$0xff] }
 0x2d8   :  { %2612 = vmatpush1.bf16.msra.mxu0 %v6966_v54  ;;  %v1183_v18 = vld [vmem:[#allocation3 + $0x788] sm:$0xff]  ;;  %v6911_v48 = vcombine.high %v1055_v36, %v1059_v16  ;;  %v6910_v58 = vcombine.low %v1055_v36, %v1059_v16 }
 0x2d9   :  { %2613 = vmatprep.subr.bf16.mxu0 %v6959_v56  ;;  %v1187_v45 = vld [vmem:[#allocation3 + $0x7a8] sm:$0xff] }
 0x2da   :  { %2571 = vmatpush1.bf16.msra.mxu1 %v6830_v62  ;;  %v7039_v49 = vcombine.high %v1183_v18, %v1187_v45  ;;  %v1047_v54 = vld [vmem:[#allocation3 + $0x348] sm:$0xff]  ;;  %v7038_v59 = vcombine.low %v1183_v18, %v1187_v45 }
 0x2db   :  { %2572 = vmatprep.subr.bf16.mxu1 %v6823_v63  ;;  %v1051_v55 = vld [vmem:[#allocation3 + $0x368] sm:$0xff] }
 0x2dc   :  { %2614 = vmatpush1.bf16.msra.mxu0 %v6958_v60  ;;  %v1175_v56 = vld [vmem:[#allocation3 + $0x748] sm:$0xff]  ;;  %v6903_v61 = vcombine.high %v1047_v54, %v1051_v55  ;;  %v6902_v41 = vcombine.low %v1047_v54, %v1051_v55  ;;  %v1132_v54 = vld [vmem:[#allocation3 + $0x5f0] sm:$0xff] }
 0x2dd   :  { %2615 = vmatprep.subr.bf16.mxu0 %v6951_v0  ;;  %v1179_v57 = vld [vmem:[#allocation3 + $0x768] sm:$0xff] }
 0x2de   :  { %2573 = vmatpush1.bf16.msra.mxu1 %v6822_v9  ;;  %v7031_v62 = vcombine.high %v1175_v56, %v1179_v57  ;;  %v1039_v60 = vld [vmem:[#allocation3 + $0x308] sm:$0xff]  ;;  %v7030_v7 = vcombine.low %v1175_v56, %v1179_v57 }
 0x2df   :  { %2574 = vmatprep.subr.bf16.mxu1 %v6815_v32  ;;  %v1043_v63 = vld [vmem:[#allocation3 + $0x328] sm:$0xff] }
 0x2e0   :  { %2616 = vmatpush1.bf16.msra.mxu0 %v6950_v42  ;;  %v1167_v0 = vld [vmem:[#allocation3 + $0x708] sm:$0xff]  ;;  %v6895_v8 = vcombine.high %v1039_v60, %v1043_v63  ;;  %v6894_v12 = vcombine.low %v1039_v60, %v1043_v63  ;;  %v1124_v60 = vld [vmem:[#allocation3 + $0x5b0] sm:$0xff] }
 0x2e1   :  { %2617 = vmatprep.subr.bf16.mxu0 %v6943_v11  ;;  %v1171_v40 = vld [vmem:[#allocation3 + $0x728] sm:$0xff] }
 0x2e2   :  { %2575 = vmatpush1.bf16.msra.mxu1 %v6814_v20  ;;  %v7023_v9 = vcombine.high %v1167_v0, %v1171_v40  ;;  %v1031_v42 = vld [vmem:[#allocation3 + $0x2c8] sm:$0xff]  ;;  %v7022_v14 = vcombine.low %v1167_v0, %v1171_v40 }
 0x2e3   :  { %2576 = vmatprep.subr.bf16.mxu1 %v6807_v21  ;;  %v1035_v32 = vld [vmem:[#allocation3 + $0x2e8] sm:$0xff] }
 0x2e4   :  { %2618 = vmatpush1.bf16.msra.mxu0 %v6942_v52  ;;  %v1159_v11 = vld [vmem:[#allocation3 + $0x6c8] sm:$0xff]  ;;  %v6887_v51 = vcombine.high %v1031_v42, %v1035_v32  ;;  %v6886_v23 = vcombine.low %v1031_v42, %v1035_v32  ;;  %v1116_v42 = vld [vmem:[#allocation3 + $0x570] sm:$0xff] }
 0x2e5   :  { %2619 = vmatprep.subr.bf16.mxu0 %v6935_v53  ;;  %v1163_v37 = vld [vmem:[#allocation3 + $0x6e8] sm:$0xff] }
 0x2e6   :  { %2577 = vmatpush1.bf16.msra.mxu1 %v6806_v28  ;;  %v7015_v20 = vcombine.high %v1159_v11, %v1163_v37  ;;  %v1023_v52 = vld [vmem:[#allocation3 + $0x288] sm:$0xff]  ;;  %v7014_v24 = vcombine.low %v1159_v11, %v1163_v37 }
 0x2e7   :  { %2578 = vmatprep.subr.bf16.mxu1 %v6799_v31  ;;  %v1027_v21 = vld [vmem:[#allocation3 + $0x2a8] sm:$0xff] }
 0x2e8   :  { %2620 = vmatpush1.bf16.msra.mxu0 %v6934_v30  ;;  %v1151_v53 = vld [vmem:[#allocation3 + $0x688] sm:$0xff]  ;;  %v6879_v25 = vcombine.high %v1023_v52, %v1027_v21  ;;  %v6878_v39 = vcombine.low %v1023_v52, %v1027_v21  ;;  %v1108_v52 = vld [vmem:[#allocation3 + $0x530] sm:$0xff] }
 0x2e9   :  { %2621 = vmatprep.subr.bf16.mxu0 %v6927_v35  ;;  %v1155_v22 = vld [vmem:[#allocation3 + $0x6a8] sm:$0xff] }
 0x2ea   :  { %2579 = vmatpush1.bf16.msra.mxu1 %v6798_v43  ;;  %v7007_v28 = vcombine.high %v1151_v53, %v1155_v22  ;;  %v1015_v30 = vld [vmem:[#allocation3 + $0x248] sm:$0xff]  ;;  %v7006_v10 = vcombine.low %v1151_v53, %v1155_v22 }
 0x2eb   :  { %2580 = vmatprep.subr.bf16.mxu1 %v6919_v50  ;;  %v1019_v31 = vld [vmem:[#allocation3 + $0x268] sm:$0xff] }
 0x2ec   :  { %2622 = vmatpush1.bf16.msra.mxu0 %v6926_v13  ;;  %v1143_v35 = vld [vmem:[#allocation3 + $0x648] sm:$0xff]  ;;  %v6871_v44 = vcombine.high %v1015_v30, %v1019_v31  ;;  %v6870_v16 = vcombine.low %v1015_v30, %v1019_v31  ;;  %v1100_v30 = vld [vmem:[#allocation3 + $0x4f0] sm:$0xff] }
 0x2ed   :  { %2623 = vmatprep.subr.bf16.mxu0 %v7047_v33  ;;  %v1147_v38 = vld [vmem:[#allocation3 + $0x668] sm:$0xff] }
 0x2ee   :  { %2581 = vmatpush2.bf16.msra.mxu1 %v6918_v46  ;;  %v6999_v43 = vcombine.high %v1143_v35, %v1147_v38  ;;  %v1007_v13 = vld [vmem:[#allocation3 + $0x208] sm:$0xff]  ;;  %v6998_v18 = vcombine.low %v1143_v35, %v1147_v38 }
 0x2ef   :  { %2582 = vmatprep.subr.bf16.mxu1 %v6911_v48  ;;  %v1011_v50 = vld [vmem:[#allocation3 + $0x228] sm:$0xff]  ;;  %v1004_v48 = vld [vmem:[#allocation3 + $0x1f0] sm:$0xff] }
 0x2f0   :  { %2624 = vmatpush2.bf16.msra.mxu0 %v7046_v47  ;;  %v1135_v33 = vld [vmem:[#allocation3 + $0x608] sm:$0xff]  ;;  %v6863_v45 = vcombine.high %v1007_v13, %v1011_v50  ;;  %v1000_v47 = vld [vmem:[#allocation3 + $0x1d0] sm:$0xff]  ;;  %v6862_v55 = vcombine.low %v1007_v13, %v1011_v50 }
 0x2f1   :  { %2625 = vmatprep.subr.bf16.mxu0 %v7039_v49  ;;  %v1139_v36 = vld [vmem:[#allocation3 + $0x628] sm:$0xff]  ;;  %v1128_v49 = vld [vmem:[#allocation3 + $0x5d0] sm:$0xff]  ;;  %v6857_v57 = vcombine.high %v1000_v47, %v1004_v48  ;;  %v6856_v63 = vcombine.low %v1000_v47, %v1004_v48 }
 0x2f2   :  { %2583 = vmatpush2.bf16.msra.mxu1 %v6910_v58  ;;  %v6991_v46 = vcombine.high %v1135_v33, %v1139_v36  ;;  %v6990_v56 = vcombine.low %v1135_v33, %v1139_v36  ;;  %v6985_v58 = vcombine.high %v1128_v49, %v1132_v54  ;;  %v6984_v0 = vcombine.low %v1128_v49, %v1132_v54  ;;  %v1092_v13 = vld [vmem:[#allocation3 + $0x4b0] sm:$0xff] }
 0x2f3   :  { %2584 = vmatprep.subr.bf16.mxu1 %v6903_v61  ;;  %v996_v61 = vld [vmem:[#allocation3 + $0x1b0] sm:$0xff] }
 0x2f4   :  { %2626 = vmatpush2.bf16.msra.mxu0 %v7038_v59  ;;  %v992_v59 = vld [vmem:[#allocation3 + $0x190] sm:$0xff] }
 0x2f5   :  { %2627 = vmatprep.subr.bf16.mxu0 %v7031_v62  ;;  %v1120_v62 = vld [vmem:[#allocation3 + $0x590] sm:$0xff]  ;;  %v6849_v40 = vcombine.high %v992_v59, %v996_v61  ;;  %v6848_v32 = vcombine.low %v992_v59, %v996_v61 }
 0x2f6   :  { %2585 = vmatpush2.bf16.msra.mxu1 %v6902_v41  ;;  %v6977_v41 = vcombine.high %v1120_v62, %v1124_v60  ;;  %v6976_v11 = vcombine.low %v1120_v62, %v1124_v60  ;;  %v1084_v47 = vld [vmem:[#allocation3 + $0x470] sm:$0xff] }
 0x2f7   :  { %2586 = vmatprep.subr.bf16.mxu1 %v6895_v8  ;;  %v988_v8 = vld [vmem:[#allocation3 + $0x170] sm:$0xff] }
 0x2f8   :  { %2628 = vmatpush2.bf16.msra.mxu0 %v7030_v7  ;;  %v984_v7 = vld [vmem:[#allocation3 + $0x150] sm:$0xff] }
 0x2f9   :  { %2629 = vmatprep.subr.bf16.mxu0 %v7023_v9  ;;  %v1112_v9 = vld [vmem:[#allocation3 + $0x550] sm:$0xff]  ;;  %v6841_v37 = vcombine.high %v984_v7, %v988_v8  ;;  %v6840_v21 = vcombine.low %v984_v7, %v988_v8 }
 0x2fa   :  { %2587 = vmatpush2.bf16.msra.mxu1 %v6894_v12  ;;  %v6969_v12 = vcombine.high %v1112_v9, %v1116_v42  ;;  %v6968_v53 = vcombine.low %v1112_v9, %v1116_v42  ;;  %v1076_v59 = vld [vmem:[#allocation3 + $0x430] sm:$0xff] }
 0x2fb   :  { %2588 = vmatprep.subr.bf16.mxu1 %v6887_v51  ;;  %v980_v51 = vld [vmem:[#allocation3 + $0x130] sm:$0xff] }
 0x2fc   :  { %2630 = vmatpush2.bf16.msra.mxu0 %v7022_v14  ;;  %v976_v14 = vld [vmem:[#allocation3 + $0x110] sm:$0xff] }
 0x2fd   :  { %2631 = vmatprep.subr.bf16.mxu0 %v7015_v20  ;;  %v1104_v20 = vld [vmem:[#allocation3 + $0x510] sm:$0xff]  ;;  %v6833_v22 = vcombine.high %v976_v14, %v980_v51  ;;  %v6832_v31 = vcombine.low %v976_v14, %v980_v51 }
 0x2fe   :  { %2589 = vmatpush2.bf16.msra.mxu1 %v6886_v23  ;;  %v6961_v23 = vcombine.high %v1104_v20, %v1108_v52  ;;  %v6960_v35 = vcombine.low %v1104_v20, %v1108_v52  ;;  %v1196_v7 = vld [vmem:[#allocation3 + $0x7f0] sm:$0xff] }
 0x2ff   :  { %2590 = vmatprep.subr.bf16.mxu1 %v6879_v25  ;;  %v972_v25 = vld [vmem:[#allocation3 + $0xf0] sm:$0xff] }
 0x300   :  { %2632 = vmatpush2.bf16.msra.mxu0 %v7014_v24  ;;  %v968_v24 = vld [vmem:[#allocation3 + $0xd0] sm:$0xff] }
 0x301   :  { %2633 = vmatprep.subr.bf16.mxu0 %v7007_v28  ;;  %v1096_v28 = vld [vmem:[#allocation3 + $0x4d0] sm:$0xff]  ;;  %v6825_v38 = vcombine.high %v968_v24, %v972_v25  ;;  %v6824_v50 = vcombine.low %v968_v24, %v972_v25 }
 0x302   :  { %2591 = vmatpush2.bf16.msra.mxu1 %v6878_v39  ;;  %v6953_v39 = vcombine.high %v1096_v28, %v1100_v30  ;;  %v6952_v33 = vcombine.low %v1096_v28, %v1100_v30  ;;  %v1188_v14 = vld [vmem:[#allocation3 + $0x7b0] sm:$0xff] }
 0x303   :  { %2592 = vmatprep.subr.bf16.mxu1 %v6871_v44  ;;  %v964_v44 = vld [vmem:[#allocation3 + $0xb0] sm:$0xff] }
 0x304   :  { %2634 = vmatpush2.bf16.msra.mxu0 %v7006_v10  ;;  %v960_v10 = vld [vmem:[#allocation3 + $0x90] sm:$0xff] }
 0x305   :  { %2635 = vmatprep.subr.bf16.mxu0 %v6999_v43  ;;  %v1088_v43 = vld [vmem:[#allocation3 + $0x490] sm:$0xff]  ;;  %v6817_v36 = vcombine.high %v960_v10, %v964_v44  ;;  %v6816_v48 = vcombine.low %v960_v10, %v964_v44 }
 0x306   :  { %2593 = vmatpush2.bf16.msra.mxu1 %v6870_v16  ;;  %v6945_v16 = vcombine.high %v1088_v43, %v1092_v13  ;;  %v6944_v49 = vcombine.low %v1088_v43, %v1092_v13  ;;  %v1180_v24 = vld [vmem:[#allocation3 + $0x770] sm:$0xff] }
 0x307   :  { %2594 = vmatprep.subr.bf16.mxu1 %v6863_v45  ;;  %v956_v45 = vld [vmem:[#allocation3 + $0x70] sm:$0xff] }
 0x308   :  { %2636 = vmatpush2.bf16.msra.mxu0 %v6998_v18  ;;  %v952_v18 = vld [vmem:[#allocation3 + $0x50] sm:$0xff] }
 0x309   :  { %2637 = vmatprep.subr.bf16.mxu0 %v6991_v46  ;;  %v1080_v46 = vld [vmem:[#allocation3 + $0x450] sm:$0xff]  ;;  %v6809_v54 = vcombine.high %v952_v18, %v956_v45  ;;  %v6808_v61 = vcombine.low %v952_v18, %v956_v45 }
 0x30a   :  { %2595 = vmatpush2.bf16.msra.mxu1 %v6862_v55  ;;  %v6937_v55 = vcombine.high %v1080_v46, %v1084_v47  ;;  %v6936_v62 = vcombine.low %v1080_v46, %v1084_v47  ;;  %v1172_v10 = vld [vmem:[#allocation3 + $0x730] sm:$0xff] }
 0x30b   :  { %2650 = vmatprep.subr.bf16.mxu1 %v6857_v57  ;;  %v948_v57 = vld [vmem:[#allocation3 + $0x30] sm:$0xff] }
 0x30c   :  { %2638 = vmatpush2.bf16.msra.mxu0 %v6990_v56  ;;  %v944_v56 = vld [vmem:[#allocation3 + $0x10] sm:$0xff] }
 0x30d   :  { %2693 = vmatprep.subr.bf16.mxu0 %v6985_v58  ;;  %2597 = vmatmul.mubr.bf16.vlgmr.msra.gmra.mxu1 %v8695_v29  ;;  %v1072_v58 = vld [vmem:[#allocation3 + $0x410] sm:$0xff]  ;;  %v6801_v60 = vcombine.high %v944_v56, %v948_v57  ;;  %v6800_v8 = vcombine.low %v944_v56, %v948_v57 }
 0x30e   :  { %2651 = vmatpush1.bf16.msra.mxu1 %v6856_v63  ;;  %2682 = vmatprep.mubr.bf16.mxu1 %v8685_v26  ;;  %v6929_v63 = vcombine.high %v1072_v58, %v1076_v59  ;;  %v6928_v9 = vcombine.low %v1072_v58, %v1076_v59  ;;  %v1164_v18 = vld [vmem:[#allocation3 + $0x6f0] sm:$0xff] }
 0x30f   :  { %2640 = vmatmul.mubr.bf16.vlgmr.msra.gmra.mxu0 %v8701_v34  ;;  %2652 = vmatprep.subr.bf16.mxu1 %v6849_v40  ;;  %v1068_v40 = vld [vmem:[#allocation3 + $0x3f0] sm:$0xff] }
 0x310   :  { %2694 = vmatpush1.bf16.msra.mxu0 %v6984_v0  ;;  %2725 = vmatprep.mubr.bf16.mxu0 %v8687_v27  ;;  %v1064_v0 = vld [vmem:[#allocation3 + $0x3d0] sm:$0xff] }
 0x311   :  { %2695 = vmatprep.subr.bf16.mxu0 %v6977_v41  ;;  %v1192_v41 = vld [vmem:[#allocation3 + $0x7d0] sm:$0xff]  ;;  %v6921_v42 = vcombine.high %v1064_v0, %v1068_v40  ;;  %v6920_v51 = vcombine.low %v1064_v0, %v1068_v40 }
 0x312   :  { %2653 = vmatpush1.bf16.msra.mxu1 %v6848_v32  ;;  %v7049_v32 = vcombine.high %v1192_v41, %v1196_v7  ;;  %v7048_v20 = vcombine.low %v1192_v41, %v1196_v7  ;;  %v1156_v56 = vld [vmem:[#allocation3 + $0x6b0] sm:$0xff] }
 0x313   :  { %2654 = vmatprep.subr.bf16.mxu1 %v6841_v37  ;;  %v1060_v37 = vld [vmem:[#allocation3 + $0x3b0] sm:$0xff] }
 0x314   :  { %2696 = vmatpush1.bf16.msra.mxu0 %v6976_v11  ;;  %v1056_v11 = vld [vmem:[#allocation3 + $0x390] sm:$0xff] }
 0x315   :  { %2697 = vmatprep.subr.bf16.mxu0 %v6969_v12  ;;  %v1184_v12 = vld [vmem:[#allocation3 + $0x790] sm:$0xff]  ;;  %v6913_v52 = vcombine.high %v1056_v11, %v1060_v37  ;;  %v6912_v25 = vcombine.low %v1056_v11, %v1060_v37 }
 0x316   :  { %2655 = vmatpush1.bf16.msra.mxu1 %v6840_v21  ;;  %v7041_v21 = vcombine.high %v1184_v12, %v1188_v14  ;;  %v7040_v28 = vcombine.low %v1184_v12, %v1188_v14  ;;  %v1148_v0 = vld [vmem:[#allocation3 + $0x670] sm:$0xff] }
 0x317   :  { %2656 = vmatprep.subr.bf16.mxu1 %v6833_v22  ;;  %v1052_v22 = vld [vmem:[#allocation3 + $0x370] sm:$0xff] }
 0x318   :  { %2698 = vmatpush1.bf16.msra.mxu0 %v6968_v53  ;;  %v1048_v53 = vld [vmem:[#allocation3 + $0x350] sm:$0xff] }
 0x319   :  { %2699 = vmatprep.subr.bf16.mxu0 %v6961_v23  ;;  %v1176_v23 = vld [vmem:[#allocation3 + $0x750] sm:$0xff]  ;;  %v6905_v30 = vcombine.high %v1048_v53, %v1052_v22  ;;  %v6904_v44 = vcombine.low %v1048_v53, %v1052_v22  ;;  %v1133_v53 = vld [vmem:[#allocation3 + $0x5f8] sm:$0xff] }
 0x31a   :  { %2657 = vmatpush1.bf16.msra.mxu1 %v6832_v31  ;;  %v7033_v31 = vcombine.high %v1176_v23, %v1180_v24  ;;  %v7032_v43 = vcombine.low %v1176_v23, %v1180_v24  ;;  %v1140_v11 = vld [vmem:[#allocation3 + $0x630] sm:$0xff] }
 0x31b   :  { %2658 = vmatprep.subr.bf16.mxu1 %v6825_v38  ;;  %v1044_v38 = vld [vmem:[#allocation3 + $0x330] sm:$0xff] }
 0x31c   :  { %2700 = vmatpush1.bf16.msra.mxu0 %v6960_v35  ;;  %v1040_v35 = vld [vmem:[#allocation3 + $0x310] sm:$0xff] }
 0x31d   :  { %2701 = vmatprep.subr.bf16.mxu0 %v6953_v39  ;;  %v1168_v39 = vld [vmem:[#allocation3 + $0x710] sm:$0xff]  ;;  %v6897_v13 = vcombine.high %v1040_v35, %v1044_v38  ;;  %v6896_v45 = vcombine.low %v1040_v35, %v1044_v38  ;;  %v1125_v35 = vld [vmem:[#allocation3 + $0x5b8] sm:$0xff] }
 0x31e   :  { %2659 = vmatpush1.bf16.msra.mxu1 %v6824_v50  ;;  %v7025_v50 = vcombine.high %v1168_v39, %v1172_v10  ;;  %v7024_v46 = vcombine.low %v1168_v39, %v1172_v10 }
 0x31f   :  { %2660 = vmatprep.subr.bf16.mxu1 %v6817_v36  ;;  %v1036_v36 = vld [vmem:[#allocation3 + $0x2f0] sm:$0xff] }
 0x320   :  { %2702 = vmatpush1.bf16.msra.mxu0 %v6952_v33  ;;  %v1032_v33 = vld [vmem:[#allocation3 + $0x2d0] sm:$0xff] }
 0x321   :  { %2703 = vmatprep.subr.bf16.mxu0 %v6945_v16  ;;  %v1160_v16 = vld [vmem:[#allocation3 + $0x6d0] sm:$0xff]  ;;  %v6889_v47 = vcombine.high %v1032_v33, %v1036_v36  ;;  %v6888_v57 = vcombine.low %v1032_v33, %v1036_v36  ;;  %v1117_v33 = vld [vmem:[#allocation3 + $0x578] sm:$0xff] }
 0x322   :  { %2661 = vmatpush1.bf16.msra.mxu1 %v6816_v48  ;;  %v7017_v48 = vcombine.high %v1160_v16, %v1164_v18  ;;  %v7016_v58 = vcombine.low %v1160_v16, %v1164_v18 }
 0x323   :  { %2662 = vmatprep.subr.bf16.mxu1 %v6809_v54  ;;  %v1028_v54 = vld [vmem:[#allocation3 + $0x2b0] sm:$0xff] }
 0x324   :  { %2704 = vmatpush1.bf16.msra.mxu0 %v6944_v49  ;;  %v1024_v49 = vld [vmem:[#allocation3 + $0x290] sm:$0xff] }
 0x325   :  { %2705 = vmatprep.subr.bf16.mxu0 %v6937_v55  ;;  %v1152_v55 = vld [vmem:[#allocation3 + $0x690] sm:$0xff]  ;;  %v6881_v59 = vcombine.high %v1024_v49, %v1028_v54  ;;  %v6880_v40 = vcombine.low %v1024_v49, %v1028_v54  ;;  %v1109_v49 = vld [vmem:[#allocation3 + $0x538] sm:$0xff] }
 0x326   :  { %2663 = vmatpush1.bf16.msra.mxu1 %v6808_v61  ;;  %v7009_v61 = vcombine.high %v1152_v55, %v1156_v56  ;;  %v7008_v41 = vcombine.low %v1152_v55, %v1156_v56 }
 0x327   :  { %2664 = vmatprep.subr.bf16.mxu1 %v6801_v60  ;;  %v1020_v60 = vld [vmem:[#allocation3 + $0x270] sm:$0xff] }
 0x328   :  { %2706 = vmatpush1.bf16.msra.mxu0 %v6936_v62  ;;  %v1016_v62 = vld [vmem:[#allocation3 + $0x250] sm:$0xff] }
 0x329   :  { %2707 = vmatprep.subr.bf16.mxu0 %v6929_v63  ;;  %v1144_v63 = vld [vmem:[#allocation3 + $0x650] sm:$0xff]  ;;  %v6873_v7 = vcombine.high %v1016_v62, %v1020_v60  ;;  %v6872_v37 = vcombine.low %v1016_v62, %v1020_v60  ;;  %v1101_v62 = vld [vmem:[#allocation3 + $0x4f8] sm:$0xff] }
 0x32a   :  { %2665 = vmatpush1.bf16.msra.mxu1 %v6800_v8  ;;  %v7001_v8 = vcombine.high %v1144_v63, %v1148_v0  ;;  %v7000_v12 = vcombine.low %v1144_v63, %v1148_v0  ;;  %v961_v0 = vld [vmem:[#allocation3 + $0x98] sm:$0xff] }
 0x32b   :  { %2666 = vmatprep.subr.bf16.mxu1 %v6921_v42  ;;  %v1012_v42 = vld [vmem:[#allocation3 + $0x230] sm:$0xff] }
 0x32c   :  { %2708 = vmatpush1.bf16.msra.mxu0 %v6928_v9  ;;  %v1008_v9 = vld [vmem:[#allocation3 + $0x210] sm:$0xff] }
 0x32d   :  { %2709 = vmatprep.subr.bf16.mxu0 %v7049_v32  ;;  %v1136_v32 = vld [vmem:[#allocation3 + $0x610] sm:$0xff]  ;;  %v6865_v14 = vcombine.high %v1008_v9, %v1012_v42  ;;  %v6864_v22 = vcombine.low %v1008_v9, %v1012_v42 }
 0x32e   :  { %2667 = vmatpush2.bf16.msra.mxu1 %v6920_v51  ;;  %v6993_v51 = vcombine.high %v1136_v32, %v1140_v11  ;;  %v6992_v23 = vcombine.low %v1136_v32, %v1140_v11  ;;  %v953_v11 = vld [vmem:[#allocation3 + $0x58] sm:$0xff] }
 0x32f   :  { %2668 = vmatprep.subr.bf16.mxu1 %v6913_v52  ;;  %v1005_v52 = vld [vmem:[#allocation3 + $0x1f8] sm:$0xff] }
 0x330   :  { %2710 = vmatpush2.bf16.msra.mxu0 %v7048_v20  ;;  %v1001_v20 = vld [vmem:[#allocation3 + $0x1d8] sm:$0xff] }
 0x331   :  { %2711 = vmatprep.subr.bf16.mxu0 %v7041_v21  ;;  %v1129_v21 = vld [vmem:[#allocation3 + $0x5d8] sm:$0xff]  ;;  %v6859_v24 = vcombine.high %v1001_v20, %v1005_v52  ;;  %v6858_v38 = vcombine.low %v1001_v20, %v1005_v52 }
 0x332   :  { %2669 = vmatpush2.bf16.msra.mxu1 %v6912_v25  ;;  %v6987_v25 = vcombine.high %v1129_v21, %v1133_v53  ;;  %v6986_v39 = vcombine.low %v1129_v21, %v1133_v53  ;;  %v945_v53 = vld [vmem:[#allocation3 + $0x18] sm:$0xff] }
 0x333   :  { %2670 = vmatprep.subr.bf16.mxu1 %v6905_v30  ;;  %v997_v30 = vld [vmem:[#allocation3 + $0x1b8] sm:$0xff] }
 0x334   :  { %2712 = vmatpush2.bf16.msra.mxu0 %v7040_v28  ;;  %v993_v28 = vld [vmem:[#allocation3 + $0x198] sm:$0xff] }
 0x335   :  { %2713 = vmatprep.subr.bf16.mxu0 %v7033_v31  ;;  %v1121_v31 = vld [vmem:[#allocation3 + $0x598] sm:$0xff]  ;;  %v6851_v10 = vcombine.high %v993_v28, %v997_v30  ;;  %v6850_v36 = vcombine.low %v993_v28, %v997_v30 }
 0x336   :  { %2671 = vmatpush2.bf16.msra.mxu1 %v6904_v44  ;;  %v6979_v44 = vcombine.high %v1121_v31, %v1125_v35  ;;  %v6978_v16 = vcombine.low %v1121_v31, %v1125_v35  ;;  %v1065_v35 = vld [vmem:[#allocation3 + $0x3d8] sm:$0xff] }
 0x337   :  { %2672 = vmatprep.subr.bf16.mxu1 %v6897_v13  ;;  %v989_v13 = vld [vmem:[#allocation3 + $0x178] sm:$0xff] }
 0x338   :  { %2714 = vmatpush2.bf16.msra.mxu0 %v7032_v43  ;;  %v985_v43 = vld [vmem:[#allocation3 + $0x158] sm:$0xff] }
 0x339   :  { %2715 = vmatprep.subr.bf16.mxu0 %v7025_v50  ;;  %v1113_v50 = vld [vmem:[#allocation3 + $0x558] sm:$0xff]  ;;  %v6843_v18 = vcombine.high %v985_v43, %v989_v13  ;;  %v6842_v54 = vcombine.low %v985_v43, %v989_v13 }
 0x33a   :  { %2673 = vmatpush2.bf16.msra.mxu1 %v6896_v45  ;;  %v6971_v45 = vcombine.high %v1113_v50, %v1117_v33  ;;  %v6970_v55 = vcombine.low %v1113_v50, %v1117_v33  ;;  %v1057_v33 = vld [vmem:[#allocation3 + $0x398] sm:$0xff] }
 0x33b   :  { %2674 = vmatprep.subr.bf16.mxu1 %v6889_v47  ;;  %v981_v47 = vld [vmem:[#allocation3 + $0x138] sm:$0xff] }
 0x33c   :  { %2716 = vmatpush2.bf16.msra.mxu0 %v7024_v46  ;;  %v977_v46 = vld [vmem:[#allocation3 + $0x118] sm:$0xff] }
 0x33d   :  { %2717 = vmatprep.subr.bf16.mxu0 %v7017_v48  ;;  %v1105_v48 = vld [vmem:[#allocation3 + $0x518] sm:$0xff]  ;;  %v6835_v56 = vcombine.high %v977_v46, %v981_v47  ;;  %v6834_v60 = vcombine.low %v977_v46, %v981_v47 }
 0x33e   :  { %2675 = vmatpush2.bf16.msra.mxu1 %v6888_v57  ;;  %v6963_v57 = vcombine.high %v1105_v48, %v1109_v49 }
 0x33f   :  { %2676 = vmatprep.subr.bf16.mxu1 %v6881_v59  ;;  %v973_v59 = vld [vmem:[#allocation3 + $0xf8] sm:$0xff] }
 0x340   :  { %2718 = vmatpush2.bf16.msra.mxu0 %v7016_v58  ;;  %v969_v58 = vld [vmem:[#allocation3 + $0xd8] sm:$0xff] }
 0x341   :  { %2719 = vmatprep.subr.bf16.mxu0 %v7009_v61  ;;  %v1097_v61 = vld [vmem:[#allocation3 + $0x4d8] sm:$0xff]  ;;  %v6827_v63 = vcombine.high %v969_v58, %v973_v59 }
 0x342   :  { %2677 = vmatpush2.bf16.msra.mxu1 %v6880_v40  ;;  %v965_v40 = vld [vmem:[#allocation3 + $0xb8] sm:$0xff]  ;;  %v6954_v9 = vcombine.low %v1097_v61, %v1101_v62 }
 0x343   :  { %2678 = vmatprep.subr.bf16.mxu1 %v6873_v7  ;;  %v1093_v7 = vld [vmem:[#allocation3 + $0x4b8] sm:$0xff]  ;;  %v6819_v42 = vcombine.high %v961_v0, %v965_v40 }
 0x344   :  { %2720 = vmatpush2.bf16.msra.mxu0 %v7008_v41  ;;  %v1089_v41 = vld [vmem:[#allocation3 + $0x498] sm:$0xff] }
 0x345   :  { %2721 = vmatprep.subr.bf16.mxu0 %v7001_v8  ;;  %v6826_v8 = vcombine.low %v969_v58, %v973_v59  ;;  %v6947_v32 = vcombine.high %v1089_v41, %v1093_v7  ;;  %v6946_v20 = vcombine.low %v1089_v41, %v1093_v7  ;;  %v1033_v7 = vld [vmem:[#allocation3 + $0x2d8] sm:$0xff] }
 0x346   :  { %2679 = vmatpush2.bf16.msra.mxu1 %v6872_v37  ;;  %v957_v37 = vld [vmem:[#allocation3 + $0x78] sm:$0xff] }
 0x347   :  { %2680 = vmatprep.subr.bf16.mxu1 %v6865_v14  ;;  %v1085_v14 = vld [vmem:[#allocation3 + $0x478] sm:$0xff]  ;;  %v6811_v52 = vcombine.high %v953_v11, %v957_v37 }
 0x348   :  { %2722 = vmatpush2.bf16.msra.mxu0 %v7000_v12  ;;  %v1081_v12 = vld [vmem:[#allocation3 + $0x458] sm:$0xff] }
 0x349   :  { %2723 = vmatprep.subr.bf16.mxu0 %v6993_v51  ;;  %v6818_v51 = vcombine.low %v961_v0, %v965_v40  ;;  %v6939_v21 = vcombine.high %v1081_v12, %v1085_v14  ;;  %v6938_v28 = vcombine.low %v1081_v12, %v1085_v14  ;;  %v1025_v14 = vld [vmem:[#allocation3 + $0x298] sm:$0xff] }
 0x34a   :  { %2681 = vmatpush2.bf16.msra.mxu1 %v6864_v22  ;;  %v949_v22 = vld [vmem:[#allocation3 + $0x38] sm:$0xff] }
 0x34b   :  { %2736 = vmatprep.subr.bf16.mxu1 %v6859_v24  ;;  %v1077_v24 = vld [vmem:[#allocation3 + $0x438] sm:$0xff]  ;;  %v6803_v30 = vcombine.high %v945_v53, %v949_v22 }
 0x34c   :  { %2724 = vmatpush2.bf16.msra.mxu0 %v6992_v23  ;;  %v1073_v23 = vld [vmem:[#allocation3 + $0x418] sm:$0xff] }
 0x34d   :  { %2779 = vmatprep.subr.bf16.mxu0 %v6987_v25  ;;  %2683 = vmatmul.mubr.bf16.vlgmr.msra.gmra.mxu1 %v8695_v29  ;;  %v6810_v25 = vcombine.low %v953_v11, %v957_v37  ;;  %v6931_v31 = vcombine.high %v1073_v23, %v1077_v24  ;;  %v6930_v43 = vcombine.low %v1073_v23, %v1077_v24  ;;  %v1017_v24 = vld [vmem:[#allocation3 + $0x258] sm:$0xff] }
 0x34e   :  { %2737 = vmatpush1.bf16.msra.mxu1 %v6858_v38  ;;  %2768 = vmatprep.mubr.bf16.mxu1 %v8685_v26  ;;  %v6962_v26 = vcombine.low %v1105_v48, %v1109_v49  ;;  %v1069_v38 = vld [vmem:[#allocation3 + $0x3f8] sm:$0xff] }
 0x34f   :  { %2726 = vmatmul.mubr.bf16.vlgmr.msra.gmra.mxu0 %v8701_v34  ;;  %2738 = vmatprep.subr.bf16.mxu1 %v6851_v10  ;;  %v1197_v10 = vld [vmem:[#allocation3 + $0x7f8] sm:$0xff]  ;;  %v6923_v13 = vcombine.high %v1065_v35, %v1069_v38 }
 0x350   :  { %2780 = vmatpush1.bf16.msra.mxu0 %v6986_v39  ;;  %2811 = vmatprep.mubr.bf16.mxu0 %v8687_v27  ;;  %v6955_v27 = vcombine.high %v1097_v61, %v1101_v62  ;;  %v1193_v39 = vld [vmem:[#allocation3 + $0x7d8] sm:$0xff] }
 0x351   :  { %2781 = vmatprep.subr.bf16.mxu0 %v6979_v44  ;;  %v6802_v44 = vcombine.low %v945_v53, %v949_v22  ;;  %v7051_v50 = vcombine.high %v1193_v39, %v1197_v10  ;;  %v7050_v46 = vcombine.low %v1193_v39, %v1197_v10  ;;  %v1049_v49 = vld [vmem:[#allocation3 + $0x358] sm:$0xff] }
 0x352   :  { %2739 = vmatpush1.bf16.msra.mxu1 %v6850_v36  ;;  %v1061_v36 = vld [vmem:[#allocation3 + $0x3b8] sm:$0xff] }
 0x353   :  { %2740 = vmatprep.subr.bf16.mxu1 %v6843_v18  ;;  %v1189_v18 = vld [vmem:[#allocation3 + $0x7b8] sm:$0xff]  ;;  %v6915_v47 = vcombine.high %v1057_v33, %v1061_v36 }
 0x354   :  { %2782 = vmatpush1.bf16.msra.mxu0 %v6978_v16  ;;  %v1185_v16 = vld [vmem:[#allocation3 + $0x798] sm:$0xff] }
 0x355   :  { %2783 = vmatprep.subr.bf16.mxu0 %v6971_v45  ;;  %v6922_v45 = vcombine.low %v1065_v35, %v1069_v38  ;;  %v7043_v48 = vcombine.high %v1185_v16, %v1189_v18  ;;  %v7042_v58 = vcombine.low %v1185_v16, %v1189_v18  ;;  %v1041_v62 = vld [vmem:[#allocation3 + $0x318] sm:$0xff] }
 0x356   :  { %2741 = vmatpush1.bf16.msra.mxu1 %v6842_v54  ;;  %v1053_v54 = vld [vmem:[#allocation3 + $0x378] sm:$0xff] }
 0x357   :  { %2742 = vmatprep.subr.bf16.mxu1 %v6835_v56  ;;  %v1181_v56 = vld [vmem:[#allocation3 + $0x778] sm:$0xff]  ;;  %v6907_v59 = vcombine.high %v1049_v49, %v1053_v54 }
 0x358   :  { %2784 = vmatpush1.bf16.msra.mxu0 %v6970_v55  ;;  %v1177_v55 = vld [vmem:[#allocation3 + $0x758] sm:$0xff] }
 0x359   :  { %2785 = vmatprep.subr.bf16.mxu0 %v6963_v57  ;;  %v6914_v57 = vcombine.low %v1057_v33, %v1061_v36  ;;  %v7035_v61 = vcombine.high %v1177_v55, %v1181_v56  ;;  %v7034_v0 = vcombine.low %v1177_v55, %v1181_v56  ;;  %v1009_v10 = vld [vmem:[#allocation3 + $0x218] sm:$0xff] }
 0x35a   :  { %2743 = vmatpush1.bf16.msra.mxu1 %v6834_v60  ;;  %v1045_v60 = vld [vmem:[#allocation3 + $0x338] sm:$0xff] }
 0x35b   :  { %2744 = vmatprep.subr.bf16.mxu1 %v6827_v63  ;;  %v1173_v63 = vld [vmem:[#allocation3 + $0x738] sm:$0xff]  ;;  %v6899_v40 = vcombine.high %v1041_v62, %v1045_v60 }
 0x35c   :  { %2786 = vmatpush1.bf16.msra.mxu0 %v6962_v26  ;;  %v1169_v26 = vld [vmem:[#allocation3 + $0x718] sm:$0xff] }
 0x35d   :  { %2787 = vmatprep.subr.bf16.mxu0 %v6955_v27  ;;  %v6906_v27 = vcombine.low %v1049_v49, %v1053_v54  ;;  %v7027_v41 = vcombine.high %v1169_v26, %v1173_v63  ;;  %v7026_v11 = vcombine.low %v1169_v26, %v1173_v63 }
 0x35e   :  { %2745 = vmatpush1.bf16.msra.mxu1 %v6826_v8  ;;  %v1037_v8 = vld [vmem:[#allocation3 + $0x2f8] sm:$0xff] }
 0x35f   :  { %2746 = vmatprep.subr.bf16.mxu1 %v6819_v42  ;;  %v1165_v42 = vld [vmem:[#allocation3 + $0x6f8] sm:$0xff]  ;;  %v6891_v37 = vcombine.high %v1033_v7, %v1037_v8 }
 0x360   :  { %2788 = vmatpush1.bf16.msra.mxu0 %v6954_v9  ;;  %v1161_v9 = vld [vmem:[#allocation3 + $0x6d8] sm:$0xff] }
 0x361   :  { %2789 = vmatprep.subr.bf16.mxu0 %v6947_v32  ;;  %v6898_v32 = vcombine.low %v1041_v62, %v1045_v60  ;;  %v7019_v12 = vcombine.high %v1161_v9, %v1165_v42  ;;  %v7018_v53 = vcombine.low %v1161_v9, %v1165_v42 }
 0x362   :  { %2747 = vmatpush1.bf16.msra.mxu1 %v6818_v51  ;;  %v1029_v51 = vld [vmem:[#allocation3 + $0x2b8] sm:$0xff] }
 0x363   :  { %2748 = vmatprep.subr.bf16.mxu1 %v6811_v52  ;;  %v1157_v52 = vld [vmem:[#allocation3 + $0x6b8] sm:$0xff]  ;;  %v6883_v22 = vcombine.high %v1025_v14, %v1029_v51 }
 0x364   :  { %2790 = vmatpush1.bf16.msra.mxu0 %v6946_v20  ;;  %v1153_v20 = vld [vmem:[#allocation3 + $0x698] sm:$0xff] }
 0x365   :  { %2791 = vmatprep.subr.bf16.mxu0 %v6939_v21  ;;  %v6890_v21 = vcombine.low %v1033_v7, %v1037_v8  ;;  %v7011_v23 = vcombine.high %v1153_v20, %v1157_v52  ;;  %v7010_v35 = vcombine.low %v1153_v20, %v1157_v52 }
 0x366   :  { %2749 = vmatpush1.bf16.msra.mxu1 %v6810_v25  ;;  %v1021_v25 = vld [vmem:[#allocation3 + $0x278] sm:$0xff] }
 0x367   :  { %2750 = vmatprep.subr.bf16.mxu1 %v6803_v30  ;;  %v1149_v30 = vld [vmem:[#allocation3 + $0x678] sm:$0xff]  ;;  %v6875_v38 = vcombine.high %v1017_v24, %v1021_v25 }
 0x368   :  { %2792 = vmatpush1.bf16.msra.mxu0 %v6938_v28  ;;  %v1145_v28 = vld [vmem:[#allocation3 + $0x658] sm:$0xff] }
 0x369   :  { %2793 = vmatprep.subr.bf16.mxu0 %v6931_v31  ;;  %v6882_v31 = vcombine.low %v1025_v14, %v1029_v51  ;;  %v7003_v39 = vcombine.high %v1145_v28, %v1149_v30  ;;  %v7002_v33 = vcombine.low %v1145_v28, %v1149_v30 }
 0x36a   :  { %2751 = vmatpush1.bf16.msra.mxu1 %v6802_v44  ;;  %v1013_v44 = vld [vmem:[#allocation3 + $0x238] sm:$0xff] }
 0x36b   :  { %2752 = vmatprep.subr.bf16.mxu1 %v6923_v13  ;;  %v1141_v13 = vld [vmem:[#allocation3 + $0x638] sm:$0xff]  ;;  %v6867_v36 = vcombine.high %v1009_v10, %v1013_v44  ;;  %v6866_v18 = vcombine.low %v1009_v10, %v1013_v44 }
 0x36c   :  { %2794 = vmatpush1.bf16.msra.mxu0 %v6930_v43  ;;  %v1137_v43 = vld [vmem:[#allocation3 + $0x618] sm:$0xff] }
 0x36d   :  { %2795 = vmatprep.subr.bf16.mxu0 %v7051_v50  ;;  %v6874_v50 = vcombine.low %v1017_v24, %v1021_v25  ;;  %v6995_v16 = vcombine.high %v1137_v43, %v1141_v13 }
 0x36e   :  { %2753 = vmatpush2.bf16.msra.mxu1 %v6922_v45  ;;  %v6994_v45 = vcombine.low %v1137_v43, %v1141_v13 }
 0x36f   :  { %2754 = vmatprep.subr.bf16.mxu1 %v6915_v47 }
 0x370   :  { %2796 = vmatpush2.bf16.msra.mxu0 %v7050_v46 }
 0x371   :  { %2797 = vmatprep.subr.bf16.mxu0 %v7043_v48 }
 0x372   :  { %2755 = vmatpush2.bf16.msra.mxu1 %v6914_v57 }
 0x373   :  { %2756 = vmatprep.subr.bf16.mxu1 %v6907_v59 }
 0x374   :  { %2798 = vmatpush2.bf16.msra.mxu0 %v7042_v58 }
 0x375   :  { %2799 = vmatprep.subr.bf16.mxu0 %v7035_v61 }
 0x376   :  { %2757 = vmatpush2.bf16.msra.mxu1 %v6906_v27 }
 0x377   :  { %2758 = vmatprep.subr.bf16.mxu1 %v6899_v40 }
 0x378   :  { %2800 = vmatpush2.bf16.msra.mxu0 %v7034_v0 }
 0x379   :  { %2801 = vmatprep.subr.bf16.mxu0 %v7027_v41 }
 0x37a   :  { %2759 = vmatpush2.bf16.msra.mxu1 %v6898_v32 }
 0x37b   :  { %2760 = vmatprep.subr.bf16.mxu1 %v6891_v37 }
 0x37c   :  { %2802 = vmatpush2.bf16.msra.mxu0 %v7026_v11 }
 0x37d   :  { %2803 = vmatprep.subr.bf16.mxu0 %v7019_v12 }
 0x37e   :  { %2761 = vmatpush2.bf16.msra.mxu1 %v6890_v21 }
 0x37f   :  { %2762 = vmatprep.subr.bf16.mxu1 %v6883_v22 }
 0x380   :  { %2804 = vmatpush2.bf16.msra.mxu0 %v7018_v53 }
 0x381   :  { %2805 = vmatprep.subr.bf16.mxu0 %v7011_v23 }
 0x382   :  { %2763 = vmatpush2.bf16.msra.mxu1 %v6882_v31 }
 0x383   :  { %2764 = vmatprep.subr.bf16.mxu1 %v6875_v38 }
 0x384   :  { %2806 = vmatpush2.bf16.msra.mxu0 %v7010_v35 }
 0x385   :  { %2807 = vmatprep.subr.bf16.mxu0 %v7003_v39 }
 0x386   :  { %2765 = vmatpush2.bf16.msra.mxu1 %v6874_v50 }
 0x387   :  { %2766 = vmatprep.subr.bf16.mxu1 %v6867_v36 }
 0x388   :  { %2808 = vmatpush2.bf16.msra.mxu0 %v7002_v33 }
 0x389   :  { %2809 = vmatprep.subr.bf16.mxu0 %v6995_v16 }
 0x38a   :  { %2767 = vmatpush2.bf16.msra.mxu1 %v6866_v18 }
 0x38c   :  { %2810 = vmatpush2.bf16.msra.mxu0 %v6994_v45  ;;  %v8718_v45 = vsub.s32 4, %v8601_v15 }
 0x38d   :  { %v2512_v46 = vpop.f32.mrf.mxu1  ;;  %2769 = vmatmul.mubr.bf16.vlgmr.msra.gmra.mxu1 %v8695_v29 }
 0x38f   :  { %v2555_v47 = vpop.f32.mrf.mxu0  ;;  %2812 = vmatmul.mubr.bf16.vlgmr.msra.gmra.mxu0 %v8701_v34  ;;  %v2514_v48 = vpop.f32.mrf.mxu1 }
 0x390   :  { %v2556_v56 = vadd.f32 %v2555_v47, %v2512_v46  ;;  %v8721_v46 = vsub.s32 5, %v8601_v15  ;;  %v3017_v47 = vrot.slane %v8604_v17, %v8718_v45 }
 0x391   :  { %v2557_v49 = vpop.f32.mrf.mxu0  ;;  %v2516_v54 = vpop.f32.mrf.mxu1 }
 0x392   :  { %v2558_v61 = vadd.f32 %v2557_v49, %v2514_v48 }
 0x393   :  { %v2559_v55 = vpop.f32.mrf.mxu0  ;;  %v2518_v58 = vpop.f32.mrf.mxu1 }
 0x394   :  { %v2560_v57 = vadd.f32 %v2559_v55, %v2516_v54  ;;  %v3065_v55 = vrot.slane %v8604_v17, %v8721_v46 }
 0x395   :  { %v2561_v59 = vpop.f32.mrf.mxu0 }
 0x396   :  { %v2822_v62 = vadd.f32 %v2560_v57, %v2556_v56  ;;  %v2562_v60 = vadd.f32 %v2561_v59, %v2518_v58  ;;  %v3069_v58 = vrot.slane %v8607_v19, %v8721_v46 }
 0x398   :  { %v2823_v26 = vrot.slane %v2822_v62, 4  ;;  %v2829_v63 = vadd.f32 %v2562_v60, %v2558_v61 }
 0x39a   :  { %v2824_v27 = vadd.f32 %v2823_v26, %v2822_v62  ;;  %v2830_v0 = vrot.slane %v2829_v63, 4 }
 0x39c   :  { %v2825_v40 = vrot.slane %v2824_v27, 2  ;;  %v2831_v29 = vadd.f32 %v2830_v0, %v2829_v63 }
 0x39e   :  { %v2826_v41 = vadd.f32 %v2825_v40, %v2824_v27  ;;  %v2832_v7 = vrot.slane %v2831_v29, 2 }
 0x3a0   :  { %v2827_v34 = vrot.slane %v2826_v41, 1  ;;  %v2833_v8 = vadd.f32 %v2832_v7, %v2831_v29 }
 0x3a2   :  { %v2828_v9 = vadd.f32 %v2827_v34, %v2826_v41  ;;  %v2834_v42 = vrot.slane %v2833_v8, 1 }
 0x3a4   :  { %v2878_v32 = vmul.f32 0.0625, %v2828_v9  ;;  %v2835_v11 = vadd.f32 %v2834_v42, %v2833_v8 }
 0x3a6   :  { %v2886_v37 = vsub.f32 %v2556_v56, %v2878_v32  ;;  %v2894_v12 = vsub.f32 %v2560_v57, %v2878_v32  ;;  %v2879_v14 = vmul.f32 0.0625, %v2835_v11  ;;  %v3021_v56 = vrot.slane %v8607_v19, %v8718_v45 }
 0x3a8   :  { %v2902_v51 = vmul.f32 %v2886_v37, %v2886_v37  ;;  %v2910_v20 = vmul.f32 %v2894_v12, %v2894_v12  ;;  %v2887_v52 = vsub.f32 %v2558_v61, %v2879_v14  ;;  %v2895_v21 = vsub.f32 %v2562_v60, %v2879_v14 }
 0x3aa   :  { %v2918_v53 = vadd.f32 %v2910_v20, %v2902_v51  ;;  %v2903_v22 = vmul.f32 %v2887_v52, %v2887_v52  ;;  %v2911_v23 = vmul.f32 %v2895_v21, %v2895_v21 }
 0x3ac   :  { %v2919_v24 = vrot.slane %v2918_v53, 4  ;;  %v2925_v25 = vadd.f32 %v2911_v23, %v2903_v22 }
 0x3ae   :  { %v2920_v28 = vadd.f32 %v2919_v24, %v2918_v53  ;;  %v2926_v30 = vrot.slane %v2925_v25, 4 }
 0x3b0   :  { %v2921_v31 = vrot.slane %v2920_v28, 2  ;;  %v2927_v35 = vadd.f32 %v2926_v30, %v2925_v25 }
 0x3b2   :  { %v2922_v38 = vadd.f32 %v2921_v31, %v2920_v28  ;;  %v2928_v39 = vrot.slane %v2927_v35, 2 }
 0x3b4   :  { %v2923_v10 = vrot.slane %v2922_v38, 1  ;;  %v2929_v44 = vadd.f32 %v2928_v39, %v2927_v35 }
 0x3b6   :  { %v2924_v43 = vadd.f32 %v2923_v10, %v2922_v38  ;;  %v2930_v13 = vrot.slane %v2929_v44, 1 }
 0x3b8   :  { %v2974_v50 = vmul.f32 0.0625, %v2924_v43  ;;  %v2931_v33 = vadd.f32 %v2930_v13, %v2929_v44 }
 0x3ba   :  { %v2982_v36 = vadd.f32 1e-05, %v2974_v50  ;;  %v2975_v16 = vmul.f32 0.0625, %v2931_v33 }
 0x3bc   :  { %7731 = vrsqrt.f32 %v2982_v36  ;;  %v2983_v18 = vadd.f32 1e-05, %v2975_v16 }
 0x3be   :  { %7733 = vrsqrt.f32 %v2983_v18 }
 0x3c9   :  { %v7732_v48 = vpop.eup %7731 }
 0x3ca   :  { %v2998_v49 = vmul.f32 %v7732_v48, %v2886_v37  ;;  %v3006_v54 = vmul.f32 %v7732_v48, %v2894_v12 }
 0x3cb   :  { %v7734_v57 = vpop.eup %7733 }
 0x3cc   :  { %v3046_v59 = vmul.f32 %v3017_v47, %v2998_v49  ;;  %v3054_v61 = vmul.f32 %v3017_v47, %v3006_v54  ;;  %v2999_v62 = vmul.f32 %v7734_v57, %v2887_v52  ;;  %v3007_v60 = vmul.f32 %v7734_v57, %v2895_v21 }
 0x3cd   :  { %v2598_v40 = vpop.f32.mrf.mxu1 }
 0x3ce   :  { %v8731_v26 = vadd.f32 %v3065_v55, %v3046_v59  ;;  %v8733_v63 = vadd.f32 %v3065_v55, %v3054_v61  ;;  %v3047_v27 = vmul.f32 %v3021_v56, %v2999_v62  ;;  %v3055_v0 = vmul.f32 %v3021_v56, %v3007_v60 }
 0x3cf   :  { %v2641_v29 = vpop.f32.mrf.mxu0  ;;  %v2600_v9 = vpop.f32.mrf.mxu1 }
 0x3d0   :  { %v3110_v41 = vmax.f32 %v8731_v26, 0.0  ;;  %v3118_v7 = vmax.f32 %v8733_v63, 0.0  ;;  %v8737_v34 = vadd.f32 %v3069_v58, %v3047_v27  ;;  %v8739_v8 = vadd.f32 %v3069_v58, %v3055_v0 }
 0x3d1   :  { %v2643_v42 = vpop.f32.mrf.mxu0  ;;  %v2602_v37 = vpop.f32.mrf.mxu1  ;;  %v2642_v14 = vadd.f32 %v2641_v29, %v2598_v40 }
 0x3d2   :  { %v3111_v32 = vmax.f32 %v8737_v34, 0.0  ;;  %v3119_v11 = vmax.f32 %v8739_v8, 0.0  ;;  %v2644_v21 = vadd.f32 %v2643_v42, %v2600_v9 }
 0x3d3   :  { %v2645_v12 = vpop.f32.mrf.mxu0  ;;  %v2604_v20 = vpop.f32.mrf.mxu1 }
 0x3d4   :  { %v2646_v51 = vadd.f32 %v2645_v12, %v2602_v37 }
 0x3d5   :  { %v2647_v52 = vpop.f32.mrf.mxu0 }
 0x3d6   :  { %v2836_v53 = vadd.f32 %v2646_v51, %v2642_v14  ;;  %v2648_v22 = vadd.f32 %v2647_v52, %v2604_v20  ;;  %v3025_v52 = vrot.slane %v8574_v1, %v8718_v45 }
 0x3d8   :  { %v2837_v23 = vrot.slane %v2836_v53, 4  ;;  %v2843_v24 = vadd.f32 %v2648_v22, %v2644_v21 }
 0x3da   :  { %v2838_v25 = vadd.f32 %v2837_v23, %v2836_v53  ;;  %v2844_v28 = vrot.slane %v2843_v24, 4  ;;  %v3073_v23 = vrot.slane %v8574_v1, %v8721_v46 }
 0x3dc   :  { %v2839_v30 = vrot.slane %v2838_v25, 2  ;;  %v2845_v31 = vadd.f32 %v2844_v28, %v2843_v24  ;;  %v3029_v24 = vrot.slane %v8576_v2, %v8718_v45  ;;  %v3077_v28 = vrot.slane %v8576_v2, %v8721_v46 }
 0x3de   :  { %v2840_v35 = vadd.f32 %v2839_v30, %v2838_v25  ;;  %v2846_v38 = vrot.slane %v2845_v31, 2 }
 0x3e0   :  { %v2841_v39 = vrot.slane %v2840_v35, 1  ;;  %v2847_v10 = vadd.f32 %v2846_v38, %v2845_v31 }
 0x3e2   :  { %v2842_v44 = vadd.f32 %v2841_v39, %v2840_v35  ;;  %v2848_v43 = vrot.slane %v2847_v10, 1 }
 0x3e4   :  { %v2880_v13 = vmul.f32 0.0625, %v2842_v44  ;;  %v2849_v50 = vadd.f32 %v2848_v43, %v2847_v10 }
 0x3e6   :  { %v2888_v33 = vsub.f32 %v2642_v14, %v2880_v13  ;;  %v2896_v36 = vsub.f32 %v2646_v51, %v2880_v13  ;;  %v2881_v16 = vmul.f32 0.0625, %v2849_v50 }
 0x3e8   :  { %v2904_v18 = vmul.f32 %v2888_v33, %v2888_v33  ;;  %v2912_v47 = vmul.f32 %v2896_v36, %v2896_v36  ;;  %v2889_v48 = vsub.f32 %v2644_v21, %v2881_v16  ;;  %v2897_v49 = vsub.f32 %v2648_v22, %v2881_v16 }
 0x3ea   :  { %v2932_v54 = vadd.f32 %v2912_v47, %v2904_v18  ;;  %v2905_v55 = vmul.f32 %v2889_v48, %v2889_v48  ;;  %v2913_v56 = vmul.f32 %v2897_v49, %v2897_v49 }
 0x3ec   :  { %v2933_v57 = vrot.slane %v2932_v54, 4  ;;  %v2939_v58 = vadd.f32 %v2913_v56, %v2905_v55 }
 0x3ee   :  { %v2934_v59 = vadd.f32 %v2933_v57, %v2932_v54  ;;  %v2940_v61 = vrot.slane %v2939_v58, 4 }
 0x3f0   :  { %v2935_v62 = vrot.slane %v2934_v59, 2  ;;  %v2941_v60 = vadd.f32 %v2940_v61, %v2939_v58 }
 0x3f2   :  { %v2936_v27 = vadd.f32 %v2935_v62, %v2934_v59  ;;  %v2942_v0 = vrot.slane %v2941_v60, 2 }
 0x3f4   :  { %v2937_v40 = vrot.slane %v2936_v27, 1  ;;  %v2943_v29 = vadd.f32 %v2942_v0, %v2941_v60 }
 0x3f6   :  { %v2938_v9 = vadd.f32 %v2937_v40, %v2936_v27  ;;  %v2944_v42 = vrot.slane %v2943_v29, 1 }
 0x3f8   :  { %v2976_v37 = vmul.f32 0.0625, %v2938_v9  ;;  %v2945_v12 = vadd.f32 %v2944_v42, %v2943_v29 }
 0x3fa   :  { %v2984_v14 = vadd.f32 1e-05, %v2976_v37  ;;  %v2977_v51 = vmul.f32 0.0625, %v2945_v12 }
 0x3fc   :  { %7735 = vrsqrt.f32 %v2984_v14  ;;  %v2985_v20 = vadd.f32 1e-05, %v2977_v51 }
 0x3fe   :  { %7737 = vrsqrt.f32 %v2985_v20 }
 0x409   :  { %v7736_v21 = vpop.eup %7735 }
 0x40a   :  { %v3000_v53 = vmul.f32 %v7736_v21, %v2888_v33  ;;  %v3008_v22 = vmul.f32 %v7736_v21, %v2896_v36 }
 0x40b   :  { %v7738_v25 = vpop.eup %7737 }
 0x40c   :  { %v3048_v30 = vmul.f32 %v3025_v52, %v3000_v53  ;;  %v3056_v31 = vmul.f32 %v3025_v52, %v3008_v22  ;;  %v3001_v35 = vmul.f32 %v7738_v25, %v2889_v48  ;;  %v3009_v38 = vmul.f32 %v7738_v25, %v2897_v49 }
 0x40d   :  { %v2684_v13 = vpop.f32.mrf.mxu1 }
 0x40e   :  { %v8751_v39 = vadd.f32 %v3073_v23, %v3048_v30  ;;  %v8753_v10 = vadd.f32 %v3073_v23, %v3056_v31  ;;  %v3049_v44 = vmul.f32 %v3029_v24, %v3001_v35  ;;  %v3057_v43 = vmul.f32 %v3029_v24, %v3009_v38 }
 0x40f   :  { %v2727_v50 = vpop.f32.mrf.mxu0  ;;  %v2686_v47 = vpop.f32.mrf.mxu1 }
 0x410   :  { %v3112_v33 = vmax.f32 %v8751_v39, 0.0  ;;  %v3120_v36 = vmax.f32 %v8753_v10, 0.0  ;;  %v8757_v16 = vadd.f32 %v3077_v28, %v3049_v44  ;;  %v8759_v18 = vadd.f32 %v3077_v28, %v3057_v43 }
 0x411   :  { %v2729_v54 = vpop.f32.mrf.mxu0  ;;  %v2688_v55 = vpop.f32.mrf.mxu1  ;;  %v2728_v57 = vadd.f32 %v2727_v50, %v2684_v13 }
 0x412   :  { %v3113_v48 = vmax.f32 %v8757_v16, 0.0  ;;  %v3121_v49 = vmax.f32 %v8759_v18, 0.0  ;;  %v2730_v62 = vadd.f32 %v2729_v54, %v2686_v47 }
 0x413   :  { %v2731_v56 = vpop.f32.mrf.mxu0  ;;  %v2690_v59 = vpop.f32.mrf.mxu1 }
 0x414   :  { %v2732_v58 = vadd.f32 %v2731_v56, %v2688_v55 }
 0x415   :  { %v2733_v61 = vpop.f32.mrf.mxu0 }
 0x416   :  { %v2850_v60 = vadd.f32 %v2732_v58, %v2728_v57  ;;  %v2734_v27 = vadd.f32 %v2733_v61, %v2690_v59 }
 0x418   :  { %v2851_v0 = vrot.slane %v2850_v60, 4  ;;  %v2857_v40 = vadd.f32 %v2734_v27, %v2730_v62 }
 0x41a   :  { %v2852_v29 = vadd.f32 %v2851_v0, %v2850_v60  ;;  %v2858_v9 = vrot.slane %v2857_v40, 4 }
 0x41c   :  { %v2853_v42 = vrot.slane %v2852_v29, 2  ;;  %v2859_v37 = vadd.f32 %v2858_v9, %v2857_v40 }
 0x41e   :  { %v2854_v12 = vadd.f32 %v2853_v42, %v2852_v29  ;;  %v2860_v14 = vrot.slane %v2859_v37, 2  ;;  %v3033_v42 = vrot.slane %v8578_v3, %v8718_v45 }
 0x420   :  { %v2855_v51 = vrot.slane %v2854_v12, 1  ;;  %v2861_v20 = vadd.f32 %v2860_v14, %v2859_v37 }
 0x422   :  { %v2856_v52 = vadd.f32 %v2855_v51, %v2854_v12  ;;  %v2862_v21 = vrot.slane %v2861_v20, 1  ;;  %v3081_v51 = vrot.slane %v8578_v3, %v8721_v46 }
 0x424   :  { %v2882_v53 = vmul.f32 0.0625, %v2856_v52  ;;  %v2863_v22 = vadd.f32 %v2862_v21, %v2861_v20  ;;  %v3037_v20 = vrot.slane %v8580_v4, %v8718_v45  ;;  %v3085_v21 = vrot.slane %v8580_v4, %v8721_v46 }
 0x426   :  { %v2890_v23 = vsub.f32 %v2728_v57, %v2882_v53  ;;  %v2898_v24 = vsub.f32 %v2732_v58, %v2882_v53  ;;  %v2883_v25 = vmul.f32 0.0625, %v2863_v22 }
 0x428   :  { %v2906_v28 = vmul.f32 %v2890_v23, %v2890_v23  ;;  %v2914_v30 = vmul.f32 %v2898_v24, %v2898_v24  ;;  %v2891_v31 = vsub.f32 %v2730_v62, %v2883_v25  ;;  %v2899_v35 = vsub.f32 %v2734_v27, %v2883_v25 }
 0x42a   :  { %v2946_v38 = vadd.f32 %v2914_v30, %v2906_v28  ;;  %v2907_v44 = vmul.f32 %v2891_v31, %v2891_v31  ;;  %v2915_v43 = vmul.f32 %v2899_v35, %v2899_v35 }
 0x42c   :  { %v2947_v13 = vrot.slane %v2946_v38, 4  ;;  %v2953_v50 = vadd.f32 %v2915_v43, %v2907_v44 }
 0x42e   :  { %v2948_v47 = vadd.f32 %v2947_v13, %v2946_v38  ;;  %v2954_v54 = vrot.slane %v2953_v50, 4 }
 0x430   :  { %v2949_v55 = vrot.slane %v2948_v47, 2  ;;  %v2955_v56 = vadd.f32 %v2954_v54, %v2953_v50 }
 0x432   :  { %v2950_v59 = vadd.f32 %v2949_v55, %v2948_v47  ;;  %v2956_v61 = vrot.slane %v2955_v56, 2 }
 0x434   :  { %v2951_v60 = vrot.slane %v2950_v59, 1  ;;  %v2957_v0 = vadd.f32 %v2956_v61, %v2955_v56 }
 0x436   :  { %v2952_v57 = vadd.f32 %v2951_v60, %v2950_v59  ;;  %v2958_v58 = vrot.slane %v2957_v0, 1 }
 0x438   :  { %v2978_v40 = vmul.f32 0.0625, %v2952_v57  ;;  %v2959_v29 = vadd.f32 %v2958_v58, %v2957_v0 }
 0x43a   :  { %v2986_v9 = vadd.f32 1e-05, %v2978_v40  ;;  %v2979_v62 = vmul.f32 0.0625, %v2959_v29 }
 0x43c   :  { %7739 = vrsqrt.f32 %v2986_v9  ;;  %v2987_v27 = vadd.f32 1e-05, %v2979_v62 }
 0x43e   :  { %7741 = vrsqrt.f32 %v2987_v27 }
 0x449   :  { %v7740_v37 = vpop.eup %7739 }
 0x44a   :  { %v3002_v12 = vmul.f32 %v7740_v37, %v2890_v23  ;;  %v3010_v14 = vmul.f32 %v7740_v37, %v2898_v24 }
 0x44b   :  { %v7742_v52 = vpop.eup %7741 }
 0x44c   :  { %v3050_v53 = vmul.f32 %v3033_v42, %v3002_v12  ;;  %v3058_v22 = vmul.f32 %v3033_v42, %v3010_v14  ;;  %v3003_v25 = vmul.f32 %v7742_v52, %v2891_v31  ;;  %v3011_v28 = vmul.f32 %v7742_v52, %v2899_v35 }
 0x44d   :  { %v2770_v44 = vpop.f32.mrf.mxu1 }
 0x44e   :  { %v8771_v30 = vadd.f32 %v3081_v51, %v3050_v53  ;;  %v8773_v38 = vadd.f32 %v3081_v51, %v3058_v22  ;;  %v3051_v23 = vmul.f32 %v3037_v20, %v3003_v25  ;;  %v3059_v24 = vmul.f32 %v3037_v20, %v3011_v28 }
 0x44f   :  { %v2813_v43 = vpop.f32.mrf.mxu0  ;;  %v2772_v55 = vpop.f32.mrf.mxu1 }
 0x450   :  { %v3114_v13 = vmax.f32 %v8771_v30, 0.0  ;;  %v3122_v50 = vmax.f32 %v8773_v38, 0.0  ;;  %v8777_v47 = vadd.f32 %v3085_v21, %v3051_v23  ;;  %v8779_v54 = vadd.f32 %v3085_v21, %v3059_v24 }
 0x451   :  { %v2815_v56 = vpop.f32.mrf.mxu0  ;;  %v2774_v59 = vpop.f32.mrf.mxu1  ;;  %v2814_v60 = vadd.f32 %v2813_v43, %v2770_v44 }
 0x452   :  { %v3115_v31 = vmax.f32 %v8777_v47, 0.0  ;;  %v3123_v35 = vmax.f32 %v8779_v54, 0.0  ;;  %v2816_v40 = vadd.f32 %v2815_v56, %v2772_v55 }
 0x453   :  { %v2817_v61 = vpop.f32.mrf.mxu0  ;;  %v2776_v57 = vpop.f32.mrf.mxu1 }
 0x454   :  { %v2818_v0 = vadd.f32 %v2817_v61, %v2774_v59 }
 0x455   :  { %v2819_v58 = vpop.f32.mrf.mxu0 }
 0x456   :  { %v2864_v29 = vadd.f32 %v2818_v0, %v2814_v60  ;;  %v2820_v9 = vadd.f32 %v2819_v58, %v2776_v57 }
 0x458   :  { %v2865_v62 = vrot.slane %v2864_v29, 4  ;;  %v2871_v27 = vadd.f32 %v2820_v9, %v2816_v40 }
 0x45a   :  { %v2866_v42 = vadd.f32 %v2865_v62, %v2864_v29  ;;  %v2872_v37 = vrot.slane %v2871_v27, 4 }
 0x45c   :  { %v2867_v12 = vrot.slane %v2866_v42, 2  ;;  %v2873_v14 = vadd.f32 %v2872_v37, %v2871_v27 }
 0x45e   :  { %v2868_v51 = vadd.f32 %v2867_v12, %v2866_v42  ;;  %v2874_v20 = vrot.slane %v2873_v14, 2 }
 0x460   :  { %v2869_v52 = vrot.slane %v2868_v51, 1  ;;  %v2875_v21 = vadd.f32 %v2874_v20, %v2873_v14 }
 0x462   :  { %v2870_v53 = vadd.f32 %v2869_v52, %v2868_v51  ;;  %v2876_v22 = vrot.slane %v2875_v21, 1 }
 0x464   :  { %v2884_v25 = vmul.f32 0.0625, %v2870_v53  ;;  %v2877_v28 = vadd.f32 %v2876_v22, %v2875_v21 }
 0x466   :  { %v2892_v23 = vsub.f32 %v2814_v60, %v2884_v25  ;;  %v2900_v24 = vsub.f32 %v2818_v0, %v2884_v25  ;;  %v2885_v44 = vmul.f32 0.0625, %v2877_v28  ;;  %v3041_v25 = vrot.slane %v8582_v5, %v8718_v45 }
 0x468   :  { %v2908_v43 = vmul.f32 %v2892_v23, %v2892_v23  ;;  %v2916_v55 = vmul.f32 %v2900_v24, %v2900_v24  ;;  %v2893_v56 = vsub.f32 %v2816_v40, %v2885_v44  ;;  %v2901_v59 = vsub.f32 %v2820_v9, %v2885_v44 }
 0x46a   :  { %v2960_v61 = vadd.f32 %v2916_v55, %v2908_v43  ;;  %v2909_v57 = vmul.f32 %v2893_v56, %v2893_v56  ;;  %v2917_v58 = vmul.f32 %v2901_v59, %v2901_v59  ;;  %v3089_v55 = vrot.slane %v8582_v5, %v8721_v46 }
 0x46c   :  { %v2961_v29 = vrot.slane %v2960_v61, 4  ;;  %v2967_v62 = vadd.f32 %v2917_v58, %v2909_v57  ;;  %v3093_v58 = vrot.slane %v8584_v6, %v8721_v46 }
 0x46e   :  { %v2962_v27 = vadd.f32 %v2961_v29, %v2960_v61  ;;  %v2968_v42 = vrot.slane %v2967_v62, 4  ;;  %v3045_v61 = vrot.slane %v8584_v6, %v8718_v45 }
 0x470   :  { %v2963_v37 = vrot.slane %v2962_v27, 2  ;;  %v2969_v12 = vadd.f32 %v2968_v42, %v2967_v62 }
 0x472   :  { %v2964_v14 = vadd.f32 %v2963_v37, %v2962_v27  ;;  %v2970_v51 = vrot.slane %v2969_v12, 2 }
 0x474   :  { %v2965_v20 = vrot.slane %v2964_v14, 1  ;;  %v2971_v52 = vadd.f32 %v2970_v51, %v2969_v12 }
 0x476   :  { %v2966_v60 = vadd.f32 %v2965_v20, %v2964_v14  ;;  %v2972_v0 = vrot.slane %v2971_v52, 1 }
 0x478   :  { %v2980_v21 = vmul.f32 0.0625, %v2966_v60  ;;  %v2973_v53 = vadd.f32 %v2972_v0, %v2971_v52 }
 0x47a   :  { %v2988_v22 = vadd.f32 1e-05, %v2980_v21  ;;  %v2981_v40 = vmul.f32 0.0625, %v2973_v53 }
 0x47c   :  { %7743 = vrsqrt.f32 %v2988_v22  ;;  %v2989_v9 = vadd.f32 1e-05, %v2981_v40 }
 0x47e   :  { %7745 = vrsqrt.f32 %v2989_v9 }
 0x489   :  { %v7744_v28 = vpop.eup %7743 }
 0x48a   :  { %v3004_v44 = vmul.f32 %v7744_v28, %v2892_v23  ;;  %v3012_v43 = vmul.f32 %v7744_v28, %v2900_v24 }
 0x48b   :  { %v7746_v57 = vpop.eup %7745 }
 0x48c   :  { %v3052_v29 = vmul.f32 %v3041_v25, %v3004_v44  ;;  %v3060_v62 = vmul.f32 %v3041_v25, %v3012_v43  ;;  %v3005_v27 = vmul.f32 %v7746_v57, %v2893_v56  ;;  %v3013_v42 = vmul.f32 %v7746_v57, %v2901_v59 }
 0x48e   :  { %v8791_v37 = vadd.f32 %v3089_v55, %v3052_v29  ;;  %v8793_v12 = vadd.f32 %v3089_v55, %v3060_v62  ;;  %v3053_v23 = vmul.f32 %v3045_v61, %v3005_v27  ;;  %v3061_v24 = vmul.f32 %v3045_v61, %v3013_v42 }
 0x490   :  { %v3116_v14 = vmax.f32 %v8791_v37, 0.0  ;;  %v3124_v51 = vmax.f32 %v8793_v12, 0.0  ;;  %v8797_v20 = vadd.f32 %v3093_v58, %v3053_v23  ;;  %v8799_v45 = vadd.f32 %v3093_v58, %v3061_v24 }
 0x492   :  { %v3117_v6 = vmax.f32 %v8797_v20, 0.0  ;;  %v3125_v46 = vmax.f32 %v8799_v45, 0.0 }
 0x493   :  { %8523 = dma.done.wait [#allocation5 + $0x2], 57344 }
 0x494   :  { %8524 = vsyncadd [#allocation5 + $0x2], 4294909952  ;;  %v8807_v56 = vpack.c.bf16 %v3119_v11, %v3111_v32  ;;  %v8813_v59 = vpack.c.bf16 %v3121_v49, %v3113_v48  ;;  %v7747_v52 = vld [vmem:[#allocation4 + $0x18c] ss:$28 sps:$4 sm:$0xff]   ;;  %v7753_v34 = vld [vmem:[#allocation4 + $0x154] ss:$28 sps:$4 sm:$0xff]   ;;  %v8833_v26 = vpack.c.bf16 %v3123_v35, %v3115_v31  ;;  %v8839_v63 = vpack.c.bf16 %v3125_v46, %v3117_v6 }
 0x495   :  { %v7749_v60 = vld [vmem:[#allocation4 + $0x50c] ss:$28 sps:$4 sm:$0xff]   ;;  %5982 = vmatprep.subr.bf16.mxu1 %v7747_v52  ;;  %v7755_v8 = vld [vmem:[#allocation4 + $0x4d4] ss:$28 sps:$4 sm:$0xff]   ;;  %v7759_v16 = vld [vmem:[#allocation4 + $0x11c] ss:$28 sps:$4 sm:$0xff]  }
 0x496   :  { %6014 = vmatprep.mubr.bf16.mxu1 %v8807_v56  ;;  %6057 = vmatprep.mubr.bf16.mxu0 %v8813_v59  ;;  %v7751_v0 = vld [vmem:[#allocation4 + $0x188] ss:$28 sps:$4 sm:$0xff]   ;;  %v7757_v32 = vld [vmem:[#allocation4 + $0x150] ss:$28 sps:$4 sm:$0xff]   ;;  %v7761_v18 = vld [vmem:[#allocation4 + $0x49c] ss:$28 sps:$4 sm:$0xff]  }
 0x497   :  { %v7752_v21 = vld [vmem:[#allocation4 + $0x508] ss:$28 sps:$4 sm:$0xff]   ;;  %6025 = vmatprep.subr.bf16.mxu0 %v7749_v60  ;;  %5983 = vmatpush1.bf16.msra.mxu1 %v7751_v0  ;;  %v7758_v11 = vld [vmem:[#allocation4 + $0x4d0] ss:$28 sps:$4 sm:$0xff]   ;;  %v7763_v48 = vld [vmem:[#allocation4 + $0x118] ss:$28 sps:$4 sm:$0xff]  }
 0x498   :  { %6026 = vmatpush1.bf16.msra.mxu0 %v7752_v21  ;;  %5984 = vmatprep.subr.bf16.mxu1 %v7753_v34  ;;  %v7764_v49 = vld [vmem:[#allocation4 + $0x498] ss:$28 sps:$4 sm:$0xff]   ;;  %v7765_v53 = vld [vmem:[#allocation4 + $0xe4] ss:$28 sps:$4 sm:$0xff]   ;;  %v7771_v25 = vld [vmem:[#allocation4 + $0xac] ss:$28 sps:$4 sm:$0xff]  }
 0x499   :  { %6027 = vmatprep.subr.bf16.mxu0 %v7755_v8  ;;  %v7767_v22 = vld [vmem:[#allocation4 + $0x464] ss:$28 sps:$4 sm:$0xff]   ;;  %v7773_v28 = vld [vmem:[#allocation4 + $0x42c] ss:$28 sps:$4 sm:$0xff]   ;;  %v7777_v55 = vld [vmem:[#allocation4 + $0x74] ss:$28 sps:$4 sm:$0xff]  }
 0x49a   :  { %v7769_v40 = vld [vmem:[#allocation4 + $0xe0] ss:$28 sps:$4 sm:$0xff]   ;;  %v7775_v44 = vld [vmem:[#allocation4 + $0xa8] ss:$28 sps:$4 sm:$0xff]   ;;  %v7779_v61 = vld [vmem:[#allocation4 + $0x3f4] ss:$28 sps:$4 sm:$0xff]  }
 0x49b   :  { %5985 = vmatpush1.bf16.msra.mxu1 %v7757_v32  ;;  %v7770_v9 = vld [vmem:[#allocation4 + $0x460] ss:$28 sps:$4 sm:$0xff]   ;;  %v7776_v43 = vld [vmem:[#allocation4 + $0x428] ss:$28 sps:$4 sm:$0xff]   ;;  %v7781_v57 = vld [vmem:[#allocation4 + $0x70] ss:$28 sps:$4 sm:$0xff]  }
 0x49c   :  { %6028 = vmatpush1.bf16.msra.mxu0 %v7758_v11  ;;  %5986 = vmatprep.subr.bf16.mxu1 %v7759_v16  ;;  %v7782_v58 = vld [vmem:[#allocation4 + $0x3f0] ss:$28 sps:$4 sm:$0xff]   ;;  %v7783_v29 = vld [vmem:[#allocation4 + $0x3c] ss:$28 sps:$4 sm:$0xff]   ;;  %v7789_v23 = vld [vmem:[#allocation4 + $0x4] ss:$28 sps:$4 sm:$0xff]  }
 0x49d   :  { %6029 = vmatprep.subr.bf16.mxu0 %v7761_v18  ;;  %v7785_v62 = vld [vmem:[#allocation4 + $0x3bc] ss:$28 sps:$4 sm:$0xff]   ;;  %v7791_v24 = vld [vmem:[#allocation4 + $0x384] ss:$28 sps:$4 sm:$0xff]   ;;  %v7795_v0 = vld [vmem:[#allocation4 + $0x34c] ss:$28 sps:$4 sm:$0xff]  }
 0x49e   :  { %v7787_v27 = vld [vmem:[#allocation4 + $0x38] ss:$28 sps:$4 sm:$0xff]   ;;  %v7793_v52 = vld [vmem:[#allocation4] ss:$28 sps:$4 sm:$0xff]   ;;  %v7797_v21 = vld [vmem:[#allocation4 + $0x6cc] ss:$28 sps:$4 sm:$0xff]  }
 0x49f   :  { %5987 = vmatpush1.bf16.msra.mxu1 %v7763_v48  ;;  %v7788_v42 = vld [vmem:[#allocation4 + $0x3b8] ss:$28 sps:$4 sm:$0xff]   ;;  %v7794_v60 = vld [vmem:[#allocation4 + $0x380] ss:$28 sps:$4 sm:$0xff]   ;;  %v7799_v34 = vld [vmem:[#allocation4 + $0x348] ss:$28 sps:$4 sm:$0xff]  }
 0x4a0   :  { %6030 = vmatpush1.bf16.msra.mxu0 %v7764_v49  ;;  %5988 = vmatprep.subr.bf16.mxu1 %v7765_v53  ;;  %v7800_v8 = vld [vmem:[#allocation4 + $0x6c8] ss:$28 sps:$4 sm:$0xff]   ;;  %v7801_v32 = vld [vmem:[#allocation4 + $0x314] ss:$28 sps:$4 sm:$0xff]   ;;  %v7807_v48 = vld [vmem:[#allocation4 + $0x2dc] ss:$28 sps:$4 sm:$0xff]  }
 0x4a1   :  { %6031 = vmatprep.subr.bf16.mxu0 %v7767_v22  ;;  %v7803_v11 = vld [vmem:[#allocation4 + $0x694] ss:$28 sps:$4 sm:$0xff]   ;;  %v7809_v49 = vld [vmem:[#allocation4 + $0x65c] ss:$28 sps:$4 sm:$0xff]   ;;  %v7863_v47 = vld [vmem:[#allocation4 + $0x7e4] ss:$28 sps:$4 sm:$0xff]  }
 0x4a2   :  { %v7805_v16 = vld [vmem:[#allocation4 + $0x310] ss:$28 sps:$4 sm:$0xff]   ;;  %v7811_v53 = vld [vmem:[#allocation4 + $0x2d8] ss:$28 sps:$4 sm:$0xff]   ;;  %v7866_v54 = vld [vmem:[#allocation4 + $0xb64] ss:$28 sps:$4 sm:$0xff]  }
 0x4a3   :  { %5989 = vmatpush1.bf16.msra.mxu1 %v7769_v40  ;;  %v7806_v18 = vld [vmem:[#allocation4 + $0x690] ss:$28 sps:$4 sm:$0xff]   ;;  %v7812_v22 = vld [vmem:[#allocation4 + $0x658] ss:$28 sps:$4 sm:$0xff]   ;;  %v7813_v40 = vld [vmem:[#allocation4 + $0x2a4] ss:$28 sps:$4 sm:$0xff]  }
 0x4a4   :  { %6032 = vmatpush1.bf16.msra.mxu0 %v7770_v9  ;;  %5990 = vmatprep.subr.bf16.mxu1 %v7771_v25  ;;  %v7815_v9 = vld [vmem:[#allocation4 + $0x624] ss:$28 sps:$4 sm:$0xff]   ;;  %v7857_v39 = vld [vmem:[#allocation4 + $0x81c] ss:$28 sps:$4 sm:$0xff]   ;;  %v7869_v20 = vld [vmem:[#allocation4 + $0x7ac] ss:$28 sps:$4 sm:$0xff]  }
 0x4a5   :  { %6033 = vmatprep.subr.bf16.mxu0 %v7773_v28  ;;  %v7817_v25 = vld [vmem:[#allocation4 + $0x2a0] ss:$28 sps:$4 sm:$0xff]   ;;  %v7872_v45 = vld [vmem:[#allocation4 + $0xb2c] ss:$28 sps:$4 sm:$0xff]   ;;  %v7945_v30 = vld [vmem:[#allocation4 + $0x158] ss:$28 sps:$4 sm:$0xff]  }
 0x4a6   :  { %v7818_v28 = vld [vmem:[#allocation4 + $0x620] ss:$28 sps:$4 sm:$0xff]   ;;  %v7867_v6 = vld [vmem:[#allocation4 + $0x7a8] ss:$28 sps:$4 sm:$0xff]   ;;  %v7948_v38 = vld [vmem:[#allocation4 + $0x4d8] ss:$28 sps:$4 sm:$0xff]  }
 0x4a7   :  { %5991 = vmatpush1.bf16.msra.mxu1 %v7775_v44  ;;  %v7819_v44 = vld [vmem:[#allocation4 + $0x26c] ss:$28 sps:$4 sm:$0xff]   ;;  %v7860_v10 = vld [vmem:[#allocation4 + $0xb9c] ss:$28 sps:$4 sm:$0xff]  }
 0x4a8   :  { %6034 = vmatpush1.bf16.msra.mxu0 %v7776_v43  ;;  %5992 = vmatprep.subr.bf16.mxu1 %v7777_v55  ;;  %v7821_v43 = vld [vmem:[#allocation4 + $0x5ec] ss:$28 sps:$4 sm:$0xff]   ;;  %v7861_v31 = vld [vmem:[#allocation4 + $0x7e0] ss:$28 sps:$4 sm:$0xff]  }
 0x4a9   :  { %6035 = vmatprep.subr.bf16.mxu0 %v7779_v61  ;;  %v7823_v55 = vld [vmem:[#allocation4 + $0x268] ss:$28 sps:$4 sm:$0xff]   ;;  %v7864_v35 = vld [vmem:[#allocation4 + $0xb60] ss:$28 sps:$4 sm:$0xff]  }
 0x4aa   :  { %v7824_v61 = vld [vmem:[#allocation4 + $0x5e8] ss:$28 sps:$4 sm:$0xff]   ;;  %v7951_v37 = vld [vmem:[#allocation4 + $0x120] ss:$28 sps:$4 sm:$0xff]  }
 0x4ab   :  { %5993 = vmatpush1.bf16.msra.mxu1 %v7781_v57  ;;  %v7825_v57 = vld [vmem:[#allocation4 + $0x234] ss:$28 sps:$4 sm:$0xff]   ;;  %v7870_v46 = vld [vmem:[#allocation4 + $0xb28] ss:$28 sps:$4 sm:$0xff]   ;;  %v7954_v12 = vld [vmem:[#allocation4 + $0x4a0] ss:$28 sps:$4 sm:$0xff]  }
 0x4ac   :  { %6036 = vmatpush1.bf16.msra.mxu0 %v7782_v58  ;;  %5994 = vmatprep.subr.bf16.mxu1 %v7783_v29  ;;  %v7827_v58 = vld [vmem:[#allocation4 + $0x5b4] ss:$28 sps:$4 sm:$0xff]  }
 0x4ad   :  { %6037 = vmatprep.subr.bf16.mxu0 %v7785_v62  ;;  %v7829_v29 = vld [vmem:[#allocation4 + $0x230] ss:$28 sps:$4 sm:$0xff]  }
 0x4ae   :  { %v7830_v62 = vld [vmem:[#allocation4 + $0x5b0] ss:$28 sps:$4 sm:$0xff]  }
 0x4af   :  { %5995 = vmatpush1.bf16.msra.mxu1 %v7787_v27  ;;  %v7831_v27 = vld [vmem:[#allocation4 + $0x1fc] ss:$28 sps:$4 sm:$0xff]  }
 0x4b0   :  { %6038 = vmatpush1.bf16.msra.mxu0 %v7788_v42  ;;  %5996 = vmatprep.subr.bf16.mxu1 %v7789_v23  ;;  %v7833_v42 = vld [vmem:[#allocation4 + $0x57c] ss:$28 sps:$4 sm:$0xff]  }
 0x4b1   :  { %6039 = vmatprep.subr.bf16.mxu0 %v7791_v24  ;;  %v7835_v23 = vld [vmem:[#allocation4 + $0x1f8] ss:$28 sps:$4 sm:$0xff]  }
 0x4b2   :  { %v7836_v24 = vld [vmem:[#allocation4 + $0x578] ss:$28 sps:$4 sm:$0xff]  }
 0x4b3   :  { %5997 = vmatpush1.bf16.msra.mxu1 %v7793_v52  ;;  %v7837_v52 = vld [vmem:[#allocation4 + $0x1c4] ss:$28 sps:$4 sm:$0xff]  }
 0x4b4   :  { %6040 = vmatpush1.bf16.msra.mxu0 %v7794_v60  ;;  %5998 = vmatprep.subr.bf16.mxu1 %v7795_v0  ;;  %v7839_v60 = vld [vmem:[#allocation4 + $0x544] ss:$28 sps:$4 sm:$0xff]  }
 0x4b5   :  { %6041 = vmatprep.subr.bf16.mxu0 %v7797_v21  ;;  %v7841_v0 = vld [vmem:[#allocation4 + $0x1c0] ss:$28 sps:$4 sm:$0xff]  }
 0x4b6   :  { %v7842_v21 = vld [vmem:[#allocation4 + $0x540] ss:$28 sps:$4 sm:$0xff]  }
 0x4b7   :  { %5999 = vmatpush2.bf16.msra.mxu1 %v7799_v34  ;;  %v7845_v34 = vld [vmem:[#allocation4 + $0x88c] ss:$28 sps:$4 sm:$0xff]  }
 0x4b8   :  { %6042 = vmatpush2.bf16.msra.mxu0 %v7800_v8  ;;  %6000 = vmatprep.subr.bf16.mxu1 %v7801_v32  ;;  %v7848_v8 = vld [vmem:[#allocation4 + $0xc0c] ss:$28 sps:$4 sm:$0xff]   ;;  %v8821_v32 = vpack.c.bf16 %v3118_v7, %v3110_v41 }
 0x4b9   :  { %6043 = vmatprep.subr.bf16.mxu0 %v7803_v11  ;;  %v8827_v11 = vpack.c.bf16 %v3120_v36, %v3112_v33  ;;  %v7849_v41 = vld [vmem:[#allocation4 + $0x850] ss:$28 sps:$4 sm:$0xff]   ;;  %v7855_v33 = vld [vmem:[#allocation4 + $0x818] ss:$28 sps:$4 sm:$0xff]  }
 0x4ba   :  { %v7852_v7 = vld [vmem:[#allocation4 + $0xbd0] ss:$28 sps:$4 sm:$0xff]   ;;  %v7858_v36 = vld [vmem:[#allocation4 + $0xb98] ss:$28 sps:$4 sm:$0xff]  }
 0x4bb   :  { %6001 = vmatpush2.bf16.msra.mxu1 %v7805_v16  ;;  %v7843_v16 = vld [vmem:[#allocation4 + $0x888] ss:$28 sps:$4 sm:$0xff]  }
 0x4bc   :  { %6044 = vmatpush2.bf16.msra.mxu0 %v7806_v18  ;;  %6002 = vmatprep.subr.bf16.mxu1 %v7807_v48  ;;  %v7846_v18 = vld [vmem:[#allocation4 + $0xc08] ss:$28 sps:$4 sm:$0xff]   ;;  %v7851_v48 = vld [vmem:[#allocation4 + $0x854] ss:$28 sps:$4 sm:$0xff]  }
 0x4bd   :  { %6045 = vmatprep.subr.bf16.mxu0 %v7809_v49  ;;  %v7854_v49 = vld [vmem:[#allocation4 + $0xbd4] ss:$28 sps:$4 sm:$0xff]  }
 0x4bf   :  { %6003 = vmatpush2.bf16.msra.mxu1 %v7811_v53  ;;  %v7875_v53 = vld [vmem:[#allocation4 + $0x774] ss:$28 sps:$4 sm:$0xff]  }
 0x4c0   :  { %6046 = vmatpush2.bf16.msra.mxu0 %v7812_v22  ;;  %6004 = vmatprep.subr.bf16.mxu1 %v7813_v40  ;;  %v7878_v22 = vld [vmem:[#allocation4 + $0xaf4] ss:$28 sps:$4 sm:$0xff]  }
 0x4c1   :  { %6047 = vmatprep.subr.bf16.mxu0 %v7815_v9  ;;  %v7873_v40 = vld [vmem:[#allocation4 + $0x770] ss:$28 sps:$4 sm:$0xff]  }
 0x4c2   :  { %v7876_v9 = vld [vmem:[#allocation4 + $0xaf0] ss:$28 sps:$4 sm:$0xff]  }
 0x4c3   :  { %6005 = vmatpush2.bf16.msra.mxu1 %v7817_v25  ;;  %v7881_v25 = vld [vmem:[#allocation4 + $0x73c] ss:$28 sps:$4 sm:$0xff]  }
 0x4c4   :  { %6048 = vmatpush2.bf16.msra.mxu0 %v7818_v28  ;;  %6006 = vmatprep.subr.bf16.mxu1 %v7819_v44  ;;  %v7884_v28 = vld [vmem:[#allocation4 + $0xabc] ss:$28 sps:$4 sm:$0xff]  }
 0x4c5   :  { %6049 = vmatprep.subr.bf16.mxu0 %v7821_v43  ;;  %v7879_v44 = vld [vmem:[#allocation4 + $0x738] ss:$28 sps:$4 sm:$0xff]  }
 0x4c6   :  { %v7882_v43 = vld [vmem:[#allocation4 + $0xab8] ss:$28 sps:$4 sm:$0xff]  }
 0x4c7   :  { %6007 = vmatpush2.bf16.msra.mxu1 %v7823_v55  ;;  %v7887_v55 = vld [vmem:[#allocation4 + $0x704] ss:$28 sps:$4 sm:$0xff]  }
 0x4c8   :  { %6050 = vmatpush2.bf16.msra.mxu0 %v7824_v61  ;;  %6008 = vmatprep.subr.bf16.mxu1 %v7825_v57  ;;  %v7890_v61 = vld [vmem:[#allocation4 + $0xa84] ss:$28 sps:$4 sm:$0xff]  }
 0x4c9   :  { %6051 = vmatprep.subr.bf16.mxu0 %v7827_v58  ;;  %v7885_v57 = vld [vmem:[#allocation4 + $0x700] ss:$28 sps:$4 sm:$0xff]  }
 0x4ca   :  { %v7888_v58 = vld [vmem:[#allocation4 + $0xa80] ss:$28 sps:$4 sm:$0xff]  }
 0x4cb   :  { %6009 = vmatpush2.bf16.msra.mxu1 %v7829_v29  ;;  %v7893_v29 = vld [vmem:[#allocation4 + $0xa4c] ss:$28 sps:$4 sm:$0xff]  }
 0x4cc   :  { %6052 = vmatpush2.bf16.msra.mxu0 %v7830_v62  ;;  %6010 = vmatprep.subr.bf16.mxu1 %v7831_v27  ;;  %v7896_v62 = vld [vmem:[#allocation4 + $0xdcc] ss:$28 sps:$4 sm:$0xff]  }
 0x4cd   :  { %6053 = vmatprep.subr.bf16.mxu0 %v7833_v42  ;;  %v7891_v27 = vld [vmem:[#allocation4 + $0xa48] ss:$28 sps:$4 sm:$0xff]  }
 0x4ce   :  { %v7894_v42 = vld [vmem:[#allocation4 + $0xdc8] ss:$28 sps:$4 sm:$0xff]  }
 0x4cf   :  { %6011 = vmatpush2.bf16.msra.mxu1 %v7835_v23  ;;  %v7899_v23 = vld [vmem:[#allocation4 + $0xa14] ss:$28 sps:$4 sm:$0xff]  }
 0x4d0   :  { %6054 = vmatpush2.bf16.msra.mxu0 %v7836_v24  ;;  %6012 = vmatprep.subr.bf16.mxu1 %v7837_v52  ;;  %v7902_v24 = vld [vmem:[#allocation4 + $0xd94] ss:$28 sps:$4 sm:$0xff]  }
 0x4d1   :  { %6055 = vmatprep.subr.bf16.mxu0 %v7839_v60  ;;  %v7897_v52 = vld [vmem:[#allocation4 + $0xa10] ss:$28 sps:$4 sm:$0xff]  }
 0x4d2   :  { %v7900_v60 = vld [vmem:[#allocation4 + $0xd90] ss:$28 sps:$4 sm:$0xff]  }
 0x4d3   :  { %6013 = vmatpush2.bf16.msra.mxu1 %v7841_v0  ;;  %v7905_v0 = vld [vmem:[#allocation4 + $0x9dc] ss:$28 sps:$4 sm:$0xff]  }
 0x4d4   :  { %6056 = vmatpush2.bf16.msra.mxu0 %v7842_v21  ;;  %6068 = vmatprep.subr.bf16.mxu1 %v7845_v34  ;;  %v7908_v21 = vld [vmem:[#allocation4 + $0xd5c] ss:$28 sps:$4 sm:$0xff]  }
 0x4d5   :  { %6111 = vmatprep.subr.bf16.mxu0 %v7848_v8  ;;  %v7903_v34 = vld [vmem:[#allocation4 + $0x9d8] ss:$28 sps:$4 sm:$0xff]  }
 0x4d6   :  { %6015 = vmatmul.mubr.bf16.vlgmr.msra.gmra.mxu1 %v8821_v32  ;;  %v7906_v8 = vld [vmem:[#allocation4 + $0xd58] ss:$28 sps:$4 sm:$0xff]  }
 0x4d7   :  { %6058 = vmatmul.mubr.bf16.vlgmr.msra.gmra.mxu0 %v8827_v11  ;;  %6069 = vmatpush1.bf16.msra.mxu1 %v7843_v16  ;;  %v7911_v16 = vld [vmem:[#allocation4 + $0x9a4] ss:$28 sps:$4 sm:$0xff]  }
 0x4d8   :  { %6112 = vmatpush1.bf16.msra.mxu0 %v7846_v18  ;;  %6070 = vmatprep.subr.bf16.mxu1 %v7851_v48  ;;  %v7914_v18 = vld [vmem:[#allocation4 + $0xd24] ss:$28 sps:$4 sm:$0xff]  }
 0x4d9   :  { %6113 = vmatprep.subr.bf16.mxu0 %v7854_v49  ;;  %6100 = vmatprep.mubr.bf16.mxu1 %v8833_v26  ;;  %v7909_v48 = vld [vmem:[#allocation4 + $0x9a0] ss:$28 sps:$4 sm:$0xff]  }
 0x4da   :  { %6143 = vmatprep.mubr.bf16.mxu0 %v8839_v63  ;;  %v7912_v49 = vld [vmem:[#allocation4 + $0xd20] ss:$28 sps:$4 sm:$0xff]  }
 0x4db   :  { %6071 = vmatpush1.bf16.msra.mxu1 %v7849_v41  ;;  %v7917_v41 = vld [vmem:[#allocation4 + $0x96c] ss:$28 sps:$4 sm:$0xff]  }
 0x4dc   :  { %6114 = vmatpush1.bf16.msra.mxu0 %v7852_v7  ;;  %6072 = vmatprep.subr.bf16.mxu1 %v7857_v39  ;;  %v7920_v7 = vld [vmem:[#allocation4 + $0xcec] ss:$28 sps:$4 sm:$0xff]  }
 0x4dd   :  { %6115 = vmatprep.subr.bf16.mxu0 %v7860_v10  ;;  %v7915_v39 = vld [vmem:[#allocation4 + $0x968] ss:$28 sps:$4 sm:$0xff]  }
 0x4de   :  { %v7918_v10 = vld [vmem:[#allocation4 + $0xce8] ss:$28 sps:$4 sm:$0xff]  }
 0x4df   :  { %6073 = vmatpush1.bf16.msra.mxu1 %v7855_v33  ;;  %v7923_v33 = vld [vmem:[#allocation4 + $0x934] ss:$28 sps:$4 sm:$0xff]  }
 0x4e0   :  { %6116 = vmatpush1.bf16.msra.mxu0 %v7858_v36  ;;  %6074 = vmatprep.subr.bf16.mxu1 %v7863_v47  ;;  %v7926_v36 = vld [vmem:[#allocation4 + $0xcb4] ss:$28 sps:$4 sm:$0xff]  }
 0x4e1   :  { %6117 = vmatprep.subr.bf16.mxu0 %v7866_v54  ;;  %v7921_v47 = vld [vmem:[#allocation4 + $0x930] ss:$28 sps:$4 sm:$0xff]  }
 0x4e2   :  { %v7924_v54 = vld [vmem:[#allocation4 + $0xcb0] ss:$28 sps:$4 sm:$0xff]  }
 0x4e3   :  { %6075 = vmatpush1.bf16.msra.mxu1 %v7861_v31  ;;  %v7929_v31 = vld [vmem:[#allocation4 + $0x8fc] ss:$28 sps:$4 sm:$0xff]  }
 0x4e4   :  { %6118 = vmatpush1.bf16.msra.mxu0 %v7864_v35  ;;  %6076 = vmatprep.subr.bf16.mxu1 %v7869_v20  ;;  %v7932_v35 = vld [vmem:[#allocation4 + $0xc7c] ss:$28 sps:$4 sm:$0xff]  }
 0x4e5   :  { %6119 = vmatprep.subr.bf16.mxu0 %v7872_v45  ;;  %v7927_v20 = vld [vmem:[#allocation4 + $0x8f8] ss:$28 sps:$4 sm:$0xff]  }
 0x4e6   :  { %v7930_v45 = vld [vmem:[#allocation4 + $0xc78] ss:$28 sps:$4 sm:$0xff]  }
 0x4e7   :  { %6077 = vmatpush1.bf16.msra.mxu1 %v7867_v6  ;;  %v7935_v6 = vld [vmem:[#allocation4 + $0x8c4] ss:$28 sps:$4 sm:$0xff]  }
 0x4e8   :  { %6120 = vmatpush1.bf16.msra.mxu0 %v7870_v46  ;;  %6078 = vmatprep.subr.bf16.mxu1 %v7875_v53  ;;  %v7938_v46 = vld [vmem:[#allocation4 + $0xc44] ss:$28 sps:$4 sm:$0xff]  }
 0x4e9   :  { %6121 = vmatprep.subr.bf16.mxu0 %v7878_v22  ;;  %v7933_v53 = vld [vmem:[#allocation4 + $0x8c0] ss:$28 sps:$4 sm:$0xff]  }
 0x4ea   :  { %v7936_v22 = vld [vmem:[#allocation4 + $0xc40] ss:$28 sps:$4 sm:$0xff]  }
 0x4eb   :  { %6079 = vmatpush1.bf16.msra.mxu1 %v7873_v40  ;;  %v7941_v40 = vld [vmem:[#allocation4 + $0x194] ss:$28 sps:$4 sm:$0xff]  }
 0x4ec   :  { %6122 = vmatpush1.bf16.msra.mxu0 %v7876_v9  ;;  %6080 = vmatprep.subr.bf16.mxu1 %v7881_v25  ;;  %v7944_v9 = vld [vmem:[#allocation4 + $0x514] ss:$28 sps:$4 sm:$0xff]   ;;  %v8849_v25 = vpack.c.bf16 %v3122_v50, %v3114_v13  ;;  %v7953_v13 = vld [vmem:[#allocation4 + $0x124] ss:$28 sps:$4 sm:$0xff]  }
 0x4ed   :  { %6123 = vmatprep.subr.bf16.mxu0 %v7884_v28  ;;  %v8855_v28 = vpack.c.bf16 %v3124_v51, %v3116_v14  ;;  %v7956_v50 = vld [vmem:[#allocation4 + $0x4a4] ss:$28 sps:$4 sm:$0xff]   ;;  %v7959_v14 = vld [vmem:[#allocation4 + $0xec] ss:$28 sps:$4 sm:$0xff]  }
 0x4ee   :  { %v7962_v51 = vld [vmem:[#allocation4 + $0x46c] ss:$28 sps:$4 sm:$0xff]  }
 0x4ef   :  { %6081 = vmatpush1.bf16.msra.mxu1 %v7879_v44  ;;  %v7939_v44 = vld [vmem:[#allocation4 + $0x190] ss:$28 sps:$4 sm:$0xff]  }
 0x4f0   :  { %6124 = vmatpush1.bf16.msra.mxu0 %v7882_v43  ;;  %6082 = vmatprep.subr.bf16.mxu1 %v7887_v55  ;;  %v7942_v43 = vld [vmem:[#allocation4 + $0x510] ss:$28 sps:$4 sm:$0xff]   ;;  %v7947_v55 = vld [vmem:[#allocation4 + $0x15c] ss:$28 sps:$4 sm:$0xff]  }
 0x4f1   :  { %6125 = vmatprep.subr.bf16.mxu0 %v7890_v61  ;;  %v7950_v61 = vld [vmem:[#allocation4 + $0x4dc] ss:$28 sps:$4 sm:$0xff]  }
 0x4f3   :  { %6083 = vmatpush1.bf16.msra.mxu1 %v7885_v57  ;;  %v7957_v57 = vld [vmem:[#allocation4 + $0xe8] ss:$28 sps:$4 sm:$0xff]  }
 0x4f4   :  { %6126 = vmatpush1.bf16.msra.mxu0 %v7888_v58  ;;  %6084 = vmatprep.subr.bf16.mxu1 %v7893_v29  ;;  %v7960_v58 = vld [vmem:[#allocation4 + $0x468] ss:$28 sps:$4 sm:$0xff]   ;;  %v7965_v29 = vld [vmem:[#allocation4 + $0xb4] ss:$28 sps:$4 sm:$0xff]  }
 0x4f5   :  { %6127 = vmatprep.subr.bf16.mxu0 %v7896_v62  ;;  %v7968_v62 = vld [vmem:[#allocation4 + $0x434] ss:$28 sps:$4 sm:$0xff]  }
 0x4f7   :  { %6085 = vmatpush2.bf16.msra.mxu1 %v7891_v27  ;;  %v7963_v27 = vld [vmem:[#allocation4 + $0xb0] ss:$28 sps:$4 sm:$0xff]  }
 0x4f8   :  { %6128 = vmatpush2.bf16.msra.mxu0 %v7894_v42  ;;  %6086 = vmatprep.subr.bf16.mxu1 %v7899_v23  ;;  %v7966_v42 = vld [vmem:[#allocation4 + $0x430] ss:$28 sps:$4 sm:$0xff]   ;;  %v7971_v23 = vld [vmem:[#allocation4 + $0x7c] ss:$28 sps:$4 sm:$0xff]  }
 0x4f9   :  { %6129 = vmatprep.subr.bf16.mxu0 %v7902_v24  ;;  %v7974_v24 = vld [vmem:[#allocation4 + $0x3fc] ss:$28 sps:$4 sm:$0xff]  }
 0x4fb   :  { %6087 = vmatpush2.bf16.msra.mxu1 %v7897_v52  ;;  %v7969_v52 = vld [vmem:[#allocation4 + $0x78] ss:$28 sps:$4 sm:$0xff]  }
 0x4fc   :  { %6130 = vmatpush2.bf16.msra.mxu0 %v7900_v60  ;;  %6088 = vmatprep.subr.bf16.mxu1 %v7905_v0  ;;  %v7972_v60 = vld [vmem:[#allocation4 + $0x3f8] ss:$28 sps:$4 sm:$0xff]   ;;  %v7977_v0 = vld [vmem:[#allocation4 + $0x44] ss:$28 sps:$4 sm:$0xff]  }
 0x4fd   :  { %6131 = vmatprep.subr.bf16.mxu0 %v7908_v21  ;;  %v7980_v21 = vld [vmem:[#allocation4 + $0x3c4] ss:$28 sps:$4 sm:$0xff]  }
 0x4ff   :  { %6089 = vmatpush2.bf16.msra.mxu1 %v7903_v34  ;;  %v7975_v34 = vld [vmem:[#allocation4 + $0x40] ss:$28 sps:$4 sm:$0xff]  }
 0x500   :  { %6132 = vmatpush2.bf16.msra.mxu0 %v7906_v8  ;;  %6090 = vmatprep.subr.bf16.mxu1 %v7911_v16  ;;  %v7978_v8 = vld [vmem:[#allocation4 + $0x3c0] ss:$28 sps:$4 sm:$0xff]   ;;  %v7983_v16 = vld [vmem:[#allocation4 + $0xc] ss:$28 sps:$4 sm:$0xff]  }
 0x501   :  { %6133 = vmatprep.subr.bf16.mxu0 %v7914_v18  ;;  %v7986_v18 = vld [vmem:[#allocation4 + $0x38c] ss:$28 sps:$4 sm:$0xff]  }
 0x503   :  { %6091 = vmatpush2.bf16.msra.mxu1 %v7909_v48  ;;  %v7981_v48 = vld [vmem:[#allocation4 + $0x8] ss:$28 sps:$4 sm:$0xff]  }
 0x504   :  { %6134 = vmatpush2.bf16.msra.mxu0 %v7912_v49  ;;  %6092 = vmatprep.subr.bf16.mxu1 %v7917_v41  ;;  %v7984_v49 = vld [vmem:[#allocation4 + $0x388] ss:$28 sps:$4 sm:$0xff]   ;;  %v7989_v41 = vld [vmem:[#allocation4 + $0x354] ss:$28 sps:$4 sm:$0xff]  }
 0x505   :  { %6135 = vmatprep.subr.bf16.mxu0 %v7920_v7  ;;  %v7992_v7 = vld [vmem:[#allocation4 + $0x6d4] ss:$28 sps:$4 sm:$0xff]  }
 0x507   :  { %6093 = vmatpush2.bf16.msra.mxu1 %v7915_v39  ;;  %v7987_v39 = vld [vmem:[#allocation4 + $0x350] ss:$28 sps:$4 sm:$0xff]  }
 0x508   :  { %6136 = vmatpush2.bf16.msra.mxu0 %v7918_v10  ;;  %6094 = vmatprep.subr.bf16.mxu1 %v7923_v33  ;;  %v7990_v10 = vld [vmem:[#allocation4 + $0x6d0] ss:$28 sps:$4 sm:$0xff]   ;;  %v7995_v33 = vld [vmem:[#allocation4 + $0x31c] ss:$28 sps:$4 sm:$0xff]  }
 0x509   :  { %6137 = vmatprep.subr.bf16.mxu0 %v7926_v36  ;;  %v7998_v36 = vld [vmem:[#allocation4 + $0x69c] ss:$28 sps:$4 sm:$0xff]  }
 0x50b   :  { %6095 = vmatpush2.bf16.msra.mxu1 %v7921_v47  ;;  %v7993_v47 = vld [vmem:[#allocation4 + $0x318] ss:$28 sps:$4 sm:$0xff]  }
 0x50c   :  { %6138 = vmatpush2.bf16.msra.mxu0 %v7924_v54  ;;  %6096 = vmatprep.subr.bf16.mxu1 %v7929_v31  ;;  %v7996_v54 = vld [vmem:[#allocation4 + $0x698] ss:$28 sps:$4 sm:$0xff]   ;;  %v8001_v31 = vld [vmem:[#allocation4 + $0x2e4] ss:$28 sps:$4 sm:$0xff]  }
 0x50d   :  { %6139 = vmatprep.subr.bf16.mxu0 %v7932_v35  ;;  %v8004_v35 = vld [vmem:[#allocation4 + $0x664] ss:$28 sps:$4 sm:$0xff]  }
 0x50f   :  { %6097 = vmatpush2.bf16.msra.mxu1 %v7927_v20  ;;  %v7999_v20 = vld [vmem:[#allocation4 + $0x2e0] ss:$28 sps:$4 sm:$0xff]  }
 0x510   :  { %6140 = vmatpush2.bf16.msra.mxu0 %v7930_v45  ;;  %6098 = vmatprep.subr.bf16.mxu1 %v7935_v6  ;;  %v8002_v45 = vld [vmem:[#allocation4 + $0x660] ss:$28 sps:$4 sm:$0xff]   ;;  %v8007_v6 = vld [vmem:[#allocation4 + $0x2ac] ss:$28 sps:$4 sm:$0xff]  }
 0x511   :  { %6141 = vmatprep.subr.bf16.mxu0 %v7938_v46  ;;  %v8010_v46 = vld [vmem:[#allocation4 + $0x62c] ss:$28 sps:$4 sm:$0xff]  }
 0x513   :  { %6099 = vmatpush2.bf16.msra.mxu1 %v7933_v53  ;;  %v8005_v53 = vld [vmem:[#allocation4 + $0x2a8] ss:$28 sps:$4 sm:$0xff]  }
 0x514   :  { %6142 = vmatpush2.bf16.msra.mxu0 %v7936_v22  ;;  %6154 = vmatprep.subr.bf16.mxu1 %v7941_v40  ;;  %v8008_v22 = vld [vmem:[#allocation4 + $0x628] ss:$28 sps:$4 sm:$0xff]   ;;  %v8013_v40 = vld [vmem:[#allocation4 + $0x274] ss:$28 sps:$4 sm:$0xff]  }
 0x515   :  { %6197 = vmatprep.subr.bf16.mxu0 %v7944_v9  ;;  %v8016_v9 = vld [vmem:[#allocation4 + $0x5f4] ss:$28 sps:$4 sm:$0xff]  }
 0x516   :  { %6101 = vmatmul.mubr.bf16.vlgmr.msra.gmra.mxu1 %v8849_v25 }
 0x517   :  { %6144 = vmatmul.mubr.bf16.vlgmr.msra.gmra.mxu0 %v8855_v28  ;;  %6155 = vmatpush1.bf16.msra.mxu1 %v7939_v44  ;;  %v8011_v44 = vld [vmem:[#allocation4 + $0x270] ss:$28 sps:$4 sm:$0xff]  }
 0x518   :  { %6198 = vmatpush1.bf16.msra.mxu0 %v7942_v43  ;;  %6156 = vmatprep.subr.bf16.mxu1 %v7947_v55  ;;  %v8014_v43 = vld [vmem:[#allocation4 + $0x5f0] ss:$28 sps:$4 sm:$0xff]   ;;  %v8019_v55 = vld [vmem:[#allocation4 + $0x23c] ss:$28 sps:$4 sm:$0xff]  }
 0x519   :  { %6199 = vmatprep.subr.bf16.mxu0 %v7950_v61  ;;  %6186 = vmatprep.mubr.bf16.mxu1 %v8807_v56  ;;  %v8022_v61 = vld [vmem:[#allocation4 + $0x5bc] ss:$28 sps:$4 sm:$0xff]  }
 0x51a   :  { %6229 = vmatprep.mubr.bf16.mxu0 %v8813_v59 }
 0x51b   :  { %6157 = vmatpush1.bf16.msra.mxu1 %v7945_v30  ;;  %v8017_v30 = vld [vmem:[#allocation4 + $0x238] ss:$28 sps:$4 sm:$0xff]  }
 0x51c   :  { %6200 = vmatpush1.bf16.msra.mxu0 %v7948_v38  ;;  %6158 = vmatprep.subr.bf16.mxu1 %v7953_v13  ;;  %v8020_v38 = vld [vmem:[#allocation4 + $0x5b8] ss:$28 sps:$4 sm:$0xff]   ;;  %v8025_v13 = vld [vmem:[#allocation4 + $0x204] ss:$28 sps:$4 sm:$0xff]  }
 0x51d   :  { %6201 = vmatprep.subr.bf16.mxu0 %v7956_v50  ;;  %v8028_v50 = vld [vmem:[#allocation4 + $0x584] ss:$28 sps:$4 sm:$0xff]  }
 0x51f   :  { %6159 = vmatpush1.bf16.msra.mxu1 %v7951_v37  ;;  %v8023_v37 = vld [vmem:[#allocation4 + $0x200] ss:$28 sps:$4 sm:$0xff]  }
 0x520   :  { %6202 = vmatpush1.bf16.msra.mxu0 %v7954_v12  ;;  %6160 = vmatprep.subr.bf16.mxu1 %v7959_v14  ;;  %v8026_v12 = vld [vmem:[#allocation4 + $0x580] ss:$28 sps:$4 sm:$0xff]   ;;  %v8031_v14 = vld [vmem:[#allocation4 + $0x1cc] ss:$28 sps:$4 sm:$0xff]  }
 0x521   :  { %6203 = vmatprep.subr.bf16.mxu0 %v7962_v51  ;;  %v8034_v51 = vld [vmem:[#allocation4 + $0x54c] ss:$28 sps:$4 sm:$0xff]  }
 0x523   :  { %6161 = vmatpush1.bf16.msra.mxu1 %v7957_v57  ;;  %v8029_v57 = vld [vmem:[#allocation4 + $0x1c8] ss:$28 sps:$4 sm:$0xff]  }
 0x524   :  { %6204 = vmatpush1.bf16.msra.mxu0 %v7960_v58  ;;  %6162 = vmatprep.subr.bf16.mxu1 %v7965_v29  ;;  %v8032_v58 = vld [vmem:[#allocation4 + $0x548] ss:$28 sps:$4 sm:$0xff]   ;;  %v8037_v29 = vld [vmem:[#allocation4 + $0x894] ss:$28 sps:$4 sm:$0xff]  }
 0x525   :  { %6205 = vmatprep.subr.bf16.mxu0 %v7968_v62  ;;  %v8040_v62 = vld [vmem:[#allocation4 + $0xc14] ss:$28 sps:$4 sm:$0xff]  }
 0x527   :  { %6163 = vmatpush1.bf16.msra.mxu1 %v7963_v27  ;;  %v8035_v27 = vld [vmem:[#allocation4 + $0x890] ss:$28 sps:$4 sm:$0xff]  }
 0x528   :  { %6206 = vmatpush1.bf16.msra.mxu0 %v7966_v42  ;;  %6164 = vmatprep.subr.bf16.mxu1 %v7971_v23  ;;  %v8038_v42 = vld [vmem:[#allocation4 + $0xc10] ss:$28 sps:$4 sm:$0xff]   ;;  %v8043_v23 = vld [vmem:[#allocation4 + $0x85c] ss:$28 sps:$4 sm:$0xff]  }
 0x529   :  { %6207 = vmatprep.subr.bf16.mxu0 %v7974_v24  ;;  %v8046_v24 = vld [vmem:[#allocation4 + $0xbdc] ss:$28 sps:$4 sm:$0xff]  }
 0x52b   :  { %6165 = vmatpush1.bf16.msra.mxu1 %v7969_v52  ;;  %v8041_v52 = vld [vmem:[#allocation4 + $0x858] ss:$28 sps:$4 sm:$0xff]  }
 0x52c   :  { %6208 = vmatpush1.bf16.msra.mxu0 %v7972_v60  ;;  %6166 = vmatprep.subr.bf16.mxu1 %v7977_v0  ;;  %v8044_v60 = vld [vmem:[#allocation4 + $0xbd8] ss:$28 sps:$4 sm:$0xff]   ;;  %v8049_v0 = vld [vmem:[#allocation4 + $0x824] ss:$28 sps:$4 sm:$0xff]  }
 0x52d   :  { %6209 = vmatprep.subr.bf16.mxu0 %v7980_v21  ;;  %v8052_v21 = vld [vmem:[#allocation4 + $0xba4] ss:$28 sps:$4 sm:$0xff]  }
 0x52f   :  { %6167 = vmatpush1.bf16.msra.mxu1 %v7975_v34  ;;  %v8047_v34 = vld [vmem:[#allocation4 + $0x820] ss:$28 sps:$4 sm:$0xff]  }
 0x530   :  { %6210 = vmatpush1.bf16.msra.mxu0 %v7978_v8  ;;  %6168 = vmatprep.subr.bf16.mxu1 %v7983_v16  ;;  %v8050_v8 = vld [vmem:[#allocation4 + $0xba0] ss:$28 sps:$4 sm:$0xff]   ;;  %v8055_v16 = vld [vmem:[#allocation4 + $0x7ec] ss:$28 sps:$4 sm:$0xff]  }
 0x531   :  { %6211 = vmatprep.subr.bf16.mxu0 %v7986_v18  ;;  %v8058_v18 = vld [vmem:[#allocation4 + $0xb6c] ss:$28 sps:$4 sm:$0xff]  }
 0x533   :  { %6169 = vmatpush1.bf16.msra.mxu1 %v7981_v48  ;;  %v8053_v48 = vld [vmem:[#allocation4 + $0x7e8] ss:$28 sps:$4 sm:$0xff]  }
 0x534   :  { %6212 = vmatpush1.bf16.msra.mxu0 %v7984_v49  ;;  %6170 = vmatprep.subr.bf16.mxu1 %v7989_v41  ;;  %v8056_v49 = vld [vmem:[#allocation4 + $0xb68] ss:$28 sps:$4 sm:$0xff]   ;;  %v8061_v41 = vld [vmem:[#allocation4 + $0x7b4] ss:$28 sps:$4 sm:$0xff]  }
 0x535   :  { %6213 = vmatprep.subr.bf16.mxu0 %v7992_v7  ;;  %v8064_v7 = vld [vmem:[#allocation4 + $0xb34] ss:$28 sps:$4 sm:$0xff]  }
 0x537   :  { %6171 = vmatpush2.bf16.msra.mxu1 %v7987_v39  ;;  %v8059_v39 = vld [vmem:[#allocation4 + $0x7b0] ss:$28 sps:$4 sm:$0xff]  }
 0x538   :  { %6214 = vmatpush2.bf16.msra.mxu0 %v7990_v10  ;;  %6172 = vmatprep.subr.bf16.mxu1 %v7995_v33  ;;  %v8062_v10 = vld [vmem:[#allocation4 + $0xb30] ss:$28 sps:$4 sm:$0xff]   ;;  %v8067_v33 = vld [vmem:[#allocation4 + $0x77c] ss:$28 sps:$4 sm:$0xff]  }
 0x539   :  { %6215 = vmatprep.subr.bf16.mxu0 %v7998_v36  ;;  %v8070_v36 = vld [vmem:[#allocation4 + $0xafc] ss:$28 sps:$4 sm:$0xff]  }
 0x53b   :  { %6173 = vmatpush2.bf16.msra.mxu1 %v7993_v47  ;;  %v8065_v47 = vld [vmem:[#allocation4 + $0x778] ss:$28 sps:$4 sm:$0xff]  }
 0x53c   :  { %6216 = vmatpush2.bf16.msra.mxu0 %v7996_v54  ;;  %6174 = vmatprep.subr.bf16.mxu1 %v8001_v31  ;;  %v8068_v54 = vld [vmem:[#allocation4 + $0xaf8] ss:$28 sps:$4 sm:$0xff]   ;;  %v8073_v31 = vld [vmem:[#allocation4 + $0x744] ss:$28 sps:$4 sm:$0xff]  }
 0x53d   :  { %6217 = vmatprep.subr.bf16.mxu0 %v8004_v35  ;;  %v8076_v35 = vld [vmem:[#allocation4 + $0xac4] ss:$28 sps:$4 sm:$0xff]  }
 0x53f   :  { %6175 = vmatpush2.bf16.msra.mxu1 %v7999_v20  ;;  %v8071_v20 = vld [vmem:[#allocation4 + $0x740] ss:$28 sps:$4 sm:$0xff]  }
 0x540   :  { %6218 = vmatpush2.bf16.msra.mxu0 %v8002_v45  ;;  %6176 = vmatprep.subr.bf16.mxu1 %v8007_v6  ;;  %v8074_v45 = vld [vmem:[#allocation4 + $0xac0] ss:$28 sps:$4 sm:$0xff]   ;;  %v8079_v6 = vld [vmem:[#allocation4 + $0x70c] ss:$28 sps:$4 sm:$0xff]  }
 0x541   :  { %6219 = vmatprep.subr.bf16.mxu0 %v8010_v46  ;;  %v8082_v46 = vld [vmem:[#allocation4 + $0xa8c] ss:$28 sps:$4 sm:$0xff]  }
 0x543   :  { %6177 = vmatpush2.bf16.msra.mxu1 %v8005_v53  ;;  %v8077_v53 = vld [vmem:[#allocation4 + $0x708] ss:$28 sps:$4 sm:$0xff]  }
 0x544   :  { %6220 = vmatpush2.bf16.msra.mxu0 %v8008_v22  ;;  %6178 = vmatprep.subr.bf16.mxu1 %v8013_v40  ;;  %v8080_v22 = vld [vmem:[#allocation4 + $0xa88] ss:$28 sps:$4 sm:$0xff]   ;;  %v8085_v40 = vld [vmem:[#allocation4 + $0xa54] ss:$28 sps:$4 sm:$0xff]  }
 0x545   :  { %6221 = vmatprep.subr.bf16.mxu0 %v8016_v9  ;;  %v8088_v9 = vld [vmem:[#allocation4 + $0xdd4] ss:$28 sps:$4 sm:$0xff]  }
 0x547   :  { %6179 = vmatpush2.bf16.msra.mxu1 %v8011_v44  ;;  %v8083_v44 = vld [vmem:[#allocation4 + $0xa50] ss:$28 sps:$4 sm:$0xff]  }
 0x548   :  { %6222 = vmatpush2.bf16.msra.mxu0 %v8014_v43  ;;  %6180 = vmatprep.subr.bf16.mxu1 %v8019_v55  ;;  %v8086_v43 = vld [vmem:[#allocation4 + $0xdd0] ss:$28 sps:$4 sm:$0xff]   ;;  %v8091_v55 = vld [vmem:[#allocation4 + $0xa1c] ss:$28 sps:$4 sm:$0xff]  }
 0x549   :  { %6223 = vmatprep.subr.bf16.mxu0 %v8022_v61  ;;  %v8094_v61 = vld [vmem:[#allocation4 + $0xd9c] ss:$28 sps:$4 sm:$0xff]  }
 0x54b   :  { %6181 = vmatpush2.bf16.msra.mxu1 %v8017_v30  ;;  %v8089_v30 = vld [vmem:[#allocation4 + $0xa18] ss:$28 sps:$4 sm:$0xff]  }
 0x54c   :  { %6224 = vmatpush2.bf16.msra.mxu0 %v8020_v38  ;;  %6182 = vmatprep.subr.bf16.mxu1 %v8025_v13  ;;  %v8092_v38 = vld [vmem:[#allocation4 + $0xd98] ss:$28 sps:$4 sm:$0xff]   ;;  %v8097_v13 = vld [vmem:[#allocation4 + $0x9e4] ss:$28 sps:$4 sm:$0xff]  }
 0x54d   :  { %6225 = vmatprep.subr.bf16.mxu0 %v8028_v50  ;;  %v8100_v50 = vld [vmem:[#allocation4 + $0xd64] ss:$28 sps:$4 sm:$0xff]  }
 0x54f   :  { %6183 = vmatpush2.bf16.msra.mxu1 %v8023_v37  ;;  %v8095_v37 = vld [vmem:[#allocation4 + $0x9e0] ss:$28 sps:$4 sm:$0xff]  }
 0x550   :  { %6226 = vmatpush2.bf16.msra.mxu0 %v8026_v12  ;;  %6184 = vmatprep.subr.bf16.mxu1 %v8031_v14  ;;  %v8098_v12 = vld [vmem:[#allocation4 + $0xd60] ss:$28 sps:$4 sm:$0xff]   ;;  %v8103_v14 = vld [vmem:[#allocation4 + $0x9ac] ss:$28 sps:$4 sm:$0xff]  }
 0x551   :  { %6227 = vmatprep.subr.bf16.mxu0 %v8034_v51  ;;  %v8106_v51 = vld [vmem:[#allocation4 + $0xd2c] ss:$28 sps:$4 sm:$0xff]  }
 0x553   :  { %6185 = vmatpush2.bf16.msra.mxu1 %v8029_v57  ;;  %v8101_v57 = vld [vmem:[#allocation4 + $0x9a8] ss:$28 sps:$4 sm:$0xff]  }
 0x554   :  { %6228 = vmatpush2.bf16.msra.mxu0 %v8032_v58  ;;  %6240 = vmatprep.subr.bf16.mxu1 %v8037_v29  ;;  %v8104_v58 = vld [vmem:[#allocation4 + $0xd28] ss:$28 sps:$4 sm:$0xff]   ;;  %v8109_v29 = vld [vmem:[#allocation4 + $0x974] ss:$28 sps:$4 sm:$0xff]  }
 0x555   :  { %6283 = vmatprep.subr.bf16.mxu0 %v8040_v62  ;;  %v8112_v62 = vld [vmem:[#allocation4 + $0xcf4] ss:$28 sps:$4 sm:$0xff]  }
 0x556   :  { %6187 = vmatmul.mubr.bf16.vlgmr.msra.gmra.mxu1 %v8821_v32 }
 0x557   :  { %6230 = vmatmul.mubr.bf16.vlgmr.msra.gmra.mxu0 %v8827_v11  ;;  %6241 = vmatpush1.bf16.msra.mxu1 %v8035_v27  ;;  %v8107_v27 = vld [vmem:[#allocation4 + $0x970] ss:$28 sps:$4 sm:$0xff]  }
 0x558   :  { %6284 = vmatpush1.bf16.msra.mxu0 %v8038_v42  ;;  %6242 = vmatprep.subr.bf16.mxu1 %v8043_v23  ;;  %v8110_v42 = vld [vmem:[#allocation4 + $0xcf0] ss:$28 sps:$4 sm:$0xff]   ;;  %v8115_v23 = vld [vmem:[#allocation4 + $0x93c] ss:$28 sps:$4 sm:$0xff]  }
 0x559   :  { %6285 = vmatprep.subr.bf16.mxu0 %v8046_v24  ;;  %6272 = vmatprep.mubr.bf16.mxu1 %v8833_v26  ;;  %v8118_v24 = vld [vmem:[#allocation4 + $0xcbc] ss:$28 sps:$4 sm:$0xff]  }
 0x55a   :  { %6315 = vmatprep.mubr.bf16.mxu0 %v8839_v63 }
 0x55b   :  { %6243 = vmatpush1.bf16.msra.mxu1 %v8041_v52  ;;  %v8113_v52 = vld [vmem:[#allocation4 + $0x938] ss:$28 sps:$4 sm:$0xff]  }
 0x55c   :  { %6286 = vmatpush1.bf16.msra.mxu0 %v8044_v60  ;;  %6244 = vmatprep.subr.bf16.mxu1 %v8049_v0  ;;  %v8116_v60 = vld [vmem:[#allocation4 + $0xcb8] ss:$28 sps:$4 sm:$0xff]   ;;  %v8121_v0 = vld [vmem:[#allocation4 + $0x904] ss:$28 sps:$4 sm:$0xff]  }
 0x55d   :  { %6287 = vmatprep.subr.bf16.mxu0 %v8052_v21  ;;  %v8124_v21 = vld [vmem:[#allocation4 + $0xc84] ss:$28 sps:$4 sm:$0xff]  }
 0x55f   :  { %6245 = vmatpush1.bf16.msra.mxu1 %v8047_v34  ;;  %v8119_v34 = vld [vmem:[#allocation4 + $0x900] ss:$28 sps:$4 sm:$0xff]  }
 0x560   :  { %6288 = vmatpush1.bf16.msra.mxu0 %v8050_v8  ;;  %6246 = vmatprep.subr.bf16.mxu1 %v8055_v16  ;;  %v8122_v8 = vld [vmem:[#allocation4 + $0xc80] ss:$28 sps:$4 sm:$0xff]   ;;  %v8127_v16 = vld [vmem:[#allocation4 + $0x8cc] ss:$28 sps:$4 sm:$0xff]  }
 0x561   :  { %6289 = vmatprep.subr.bf16.mxu0 %v8058_v18  ;;  %v8130_v18 = vld [vmem:[#allocation4 + $0xc4c] ss:$28 sps:$4 sm:$0xff]  }
 0x563   :  { %6247 = vmatpush1.bf16.msra.mxu1 %v8053_v48  ;;  %v8125_v48 = vld [vmem:[#allocation4 + $0x8c8] ss:$28 sps:$4 sm:$0xff]  }
 0x564   :  { %6290 = vmatpush1.bf16.msra.mxu0 %v8056_v49  ;;  %6248 = vmatprep.subr.bf16.mxu1 %v8061_v41  ;;  %v8128_v49 = vld [vmem:[#allocation4 + $0xc48] ss:$28 sps:$4 sm:$0xff]   ;;  %v8133_v41 = vld [vmem:[#allocation4 + $0x19c] ss:$28 sps:$4 sm:$0xff]  }
 0x565   :  { %6291 = vmatprep.subr.bf16.mxu0 %v8064_v7  ;;  %v8136_v7 = vld [vmem:[#allocation4 + $0x51c] ss:$28 sps:$4 sm:$0xff]  }
 0x567   :  { %6249 = vmatpush1.bf16.msra.mxu1 %v8059_v39  ;;  %v8866_v39 = vsub.s32 6, %v8601_v15  ;;  %v8145_v15 = vld [vmem:[#allocation4 + $0x12c] ss:$28 sps:$4 sm:$0xff]  }
 0x568   :  { %6292 = vmatpush1.bf16.msra.mxu0 %v8062_v10  ;;  %6250 = vmatprep.subr.bf16.mxu1 %v8067_v33  ;;  %v8131_v10 = vld [vmem:[#allocation4 + $0x198] ss:$28 sps:$4 sm:$0xff]  }
 0x569   :  { %6293 = vmatprep.subr.bf16.mxu0 %v8070_v36  ;;  %v8134_v33 = vld [vmem:[#allocation4 + $0x518] ss:$28 sps:$4 sm:$0xff]   ;;  %v8139_v36 = vld [vmem:[#allocation4 + $0x164] ss:$28 sps:$4 sm:$0xff]  }
 0x56b   :  { %6251 = vmatpush1.bf16.msra.mxu1 %v8065_v47  ;;  %v8142_v47 = vld [vmem:[#allocation4 + $0x4e4] ss:$28 sps:$4 sm:$0xff]  }
 0x56c   :  { %6294 = vmatpush1.bf16.msra.mxu0 %v8068_v54  ;;  %6252 = vmatprep.subr.bf16.mxu1 %v8073_v31  ;;  %v8137_v54 = vld [vmem:[#allocation4 + $0x160] ss:$28 sps:$4 sm:$0xff]  }
 0x56d   :  { %6295 = vmatprep.subr.bf16.mxu0 %v8076_v35  ;;  %v8140_v31 = vld [vmem:[#allocation4 + $0x4e0] ss:$28 sps:$4 sm:$0xff]   ;;  %v8148_v35 = vld [vmem:[#allocation4 + $0x4ac] ss:$28 sps:$4 sm:$0xff]  }
 0x56f   :  { %6253 = vmatpush1.bf16.msra.mxu1 %v8071_v20  ;;  %v8143_v20 = vld [vmem:[#allocation4 + $0x128] ss:$28 sps:$4 sm:$0xff]  }
 0x570   :  { %6296 = vmatpush1.bf16.msra.mxu0 %v8074_v45  ;;  %6254 = vmatprep.subr.bf16.mxu1 %v8079_v6  ;;  %v8146_v45 = vld [vmem:[#allocation4 + $0x4a8] ss:$28 sps:$4 sm:$0xff]   ;;  %v8151_v6 = vld [vmem:[#allocation4 + $0xf4] ss:$28 sps:$4 sm:$0xff]  }
 0x571   :  { %6297 = vmatprep.subr.bf16.mxu0 %v8082_v46  ;;  %v8154_v46 = vld [vmem:[#allocation4 + $0x474] ss:$28 sps:$4 sm:$0xff]  }
 0x573   :  { %6255 = vmatpush1.bf16.msra.mxu1 %v8077_v53  ;;  %v8149_v53 = vld [vmem:[#allocation4 + $0xf0] ss:$28 sps:$4 sm:$0xff]  }
 0x574   :  { %6298 = vmatpush1.bf16.msra.mxu0 %v8080_v22  ;;  %6256 = vmatprep.subr.bf16.mxu1 %v8085_v40  ;;  %v8152_v22 = vld [vmem:[#allocation4 + $0x470] ss:$28 sps:$4 sm:$0xff]   ;;  %v8157_v40 = vld [vmem:[#allocation4 + $0xbc] ss:$28 sps:$4 sm:$0xff]  }
 0x575   :  { %6299 = vmatprep.subr.bf16.mxu0 %v8088_v9  ;;  %v8160_v9 = vld [vmem:[#allocation4 + $0x43c] ss:$28 sps:$4 sm:$0xff]  }
 0x577   :  { %6257 = vmatpush2.bf16.msra.mxu1 %v8083_v44  ;;  %v8155_v44 = vld [vmem:[#allocation4 + $0xb8] ss:$28 sps:$4 sm:$0xff]  }
 0x578   :  { %6300 = vmatpush2.bf16.msra.mxu0 %v8086_v43  ;;  %6258 = vmatprep.subr.bf16.mxu1 %v8091_v55  ;;  %v8158_v43 = vld [vmem:[#allocation4 + $0x438] ss:$28 sps:$4 sm:$0xff]   ;;  %v8163_v55 = vld [vmem:[#allocation4 + $0x84] ss:$28 sps:$4 sm:$0xff]  }
 0x579   :  { %6301 = vmatprep.subr.bf16.mxu0 %v8094_v61  ;;  %v8166_v61 = vld [vmem:[#allocation4 + $0x404] ss:$28 sps:$4 sm:$0xff]  }
 0x57b   :  { %6259 = vmatpush2.bf16.msra.mxu1 %v8089_v30  ;;  %v8161_v30 = vld [vmem:[#allocation4 + $0x80] ss:$28 sps:$4 sm:$0xff]  }
 0x57c   :  { %6302 = vmatpush2.bf16.msra.mxu0 %v8092_v38  ;;  %6260 = vmatprep.subr.bf16.mxu1 %v8097_v13  ;;  %v8164_v38 = vld [vmem:[#allocation4 + $0x400] ss:$28 sps:$4 sm:$0xff]   ;;  %v8169_v13 = vld [vmem:[#allocation4 + $0x4c] ss:$28 sps:$4 sm:$0xff]  }
 0x57d   :  { %6303 = vmatprep.subr.bf16.mxu0 %v8100_v50  ;;  %v8172_v50 = vld [vmem:[#allocation4 + $0x3cc] ss:$28 sps:$4 sm:$0xff]  }
 0x57f   :  { %6261 = vmatpush2.bf16.msra.mxu1 %v8095_v37  ;;  %v8167_v37 = vld [vmem:[#allocation4 + $0x48] ss:$28 sps:$4 sm:$0xff]  }
 0x580   :  { %6304 = vmatpush2.bf16.msra.mxu0 %v8098_v12  ;;  %6262 = vmatprep.subr.bf16.mxu1 %v8103_v14  ;;  %v8170_v12 = vld [vmem:[#allocation4 + $0x3c8] ss:$28 sps:$4 sm:$0xff]   ;;  %v8175_v14 = vld [vmem:[#allocation4 + $0x14] ss:$28 sps:$4 sm:$0xff]  }
 0x581   :  { %6305 = vmatprep.subr.bf16.mxu0 %v8106_v51  ;;  %v8178_v51 = vld [vmem:[#allocation4 + $0x394] ss:$28 sps:$4 sm:$0xff]  }
 0x583   :  { %6263 = vmatpush2.bf16.msra.mxu1 %v8101_v57  ;;  %v8173_v57 = vld [vmem:[#allocation4 + $0x10] ss:$28 sps:$4 sm:$0xff]  }
 0x584   :  { %6306 = vmatpush2.bf16.msra.mxu0 %v8104_v58  ;;  %6264 = vmatprep.subr.bf16.mxu1 %v8109_v29  ;;  %v8176_v58 = vld [vmem:[#allocation4 + $0x390] ss:$28 sps:$4 sm:$0xff]   ;;  %v8181_v29 = vld [vmem:[#allocation4 + $0x35c] ss:$28 sps:$4 sm:$0xff]  }
 0x585   :  { %6307 = vmatprep.subr.bf16.mxu0 %v8112_v62  ;;  %v8184_v62 = vld [vmem:[#allocation4 + $0x6dc] ss:$28 sps:$4 sm:$0xff]  }
 0x587   :  { %6265 = vmatpush2.bf16.msra.mxu1 %v8107_v27  ;;  %v8179_v27 = vld [vmem:[#allocation4 + $0x358] ss:$28 sps:$4 sm:$0xff]  }
 0x588   :  { %6308 = vmatpush2.bf16.msra.mxu0 %v8110_v42  ;;  %6266 = vmatprep.subr.bf16.mxu1 %v8115_v23  ;;  %v8182_v42 = vld [vmem:[#allocation4 + $0x6d8] ss:$28 sps:$4 sm:$0xff]   ;;  %v8187_v23 = vld [vmem:[#allocation4 + $0x324] ss:$28 sps:$4 sm:$0xff]  }
 0x589   :  { %6309 = vmatprep.subr.bf16.mxu0 %v8118_v24  ;;  %v8190_v24 = vld [vmem:[#allocation4 + $0x6a4] ss:$28 sps:$4 sm:$0xff]  }
 0x58b   :  { %6267 = vmatpush2.bf16.msra.mxu1 %v8113_v52  ;;  %v8185_v52 = vld [vmem:[#allocation4 + $0x320] ss:$28 sps:$4 sm:$0xff]  }
 0x58c   :  { %6310 = vmatpush2.bf16.msra.mxu0 %v8116_v60  ;;  %6268 = vmatprep.subr.bf16.mxu1 %v8121_v0  ;;  %v8188_v60 = vld [vmem:[#allocation4 + $0x6a0] ss:$28 sps:$4 sm:$0xff]   ;;  %v8193_v0 = vld [vmem:[#allocation4 + $0x2ec] ss:$28 sps:$4 sm:$0xff]  }
 0x58d   :  { %6311 = vmatprep.subr.bf16.mxu0 %v8124_v21  ;;  %v8196_v21 = vld [vmem:[#allocation4 + $0x66c] ss:$28 sps:$4 sm:$0xff]  }
 0x58f   :  { %6269 = vmatpush2.bf16.msra.mxu1 %v8119_v34  ;;  %v8191_v34 = vld [vmem:[#allocation4 + $0x2e8] ss:$28 sps:$4 sm:$0xff]  }
 0x590   :  { %6312 = vmatpush2.bf16.msra.mxu0 %v8122_v8  ;;  %6270 = vmatprep.subr.bf16.mxu1 %v8127_v16  ;;  %v8194_v8 = vld [vmem:[#allocation4 + $0x668] ss:$28 sps:$4 sm:$0xff]   ;;  %v8199_v16 = vld [vmem:[#allocation4 + $0x2b4] ss:$28 sps:$4 sm:$0xff]  }
 0x591   :  { %6313 = vmatprep.subr.bf16.mxu0 %v8130_v18  ;;  %v8202_v18 = vld [vmem:[#allocation4 + $0x634] ss:$28 sps:$4 sm:$0xff]  }
 0x593   :  { %6271 = vmatpush2.bf16.msra.mxu1 %v8125_v48  ;;  %v8197_v48 = vld [vmem:[#allocation4 + $0x2b0] ss:$28 sps:$4 sm:$0xff]  }
 0x594   :  { %6314 = vmatpush2.bf16.msra.mxu0 %v8128_v49  ;;  %6326 = vmatprep.subr.bf16.mxu1 %v8133_v41  ;;  %v8200_v49 = vld [vmem:[#allocation4 + $0x630] ss:$28 sps:$4 sm:$0xff]   ;;  %v8205_v41 = vld [vmem:[#allocation4 + $0x27c] ss:$28 sps:$4 sm:$0xff]  }
 0x595   :  { %6369 = vmatprep.subr.bf16.mxu0 %v8136_v7  ;;  %v8208_v7 = vld [vmem:[#allocation4 + $0x5fc] ss:$28 sps:$4 sm:$0xff]  }
 0x596   :  { %6273 = vmatmul.mubr.bf16.vlgmr.msra.gmra.mxu1 %v8849_v25 }
 0x597   :  { %6316 = vmatmul.mubr.bf16.vlgmr.msra.gmra.mxu0 %v8855_v28  ;;  %6327 = vmatpush1.bf16.msra.mxu1 %v8131_v10  ;;  %v8203_v10 = vld [vmem:[#allocation4 + $0x278] ss:$28 sps:$4 sm:$0xff]  }
 0x598   :  { %6370 = vmatpush1.bf16.msra.mxu0 %v8134_v33  ;;  %6328 = vmatprep.subr.bf16.mxu1 %v8139_v36  ;;  %v8206_v33 = vld [vmem:[#allocation4 + $0x5f8] ss:$28 sps:$4 sm:$0xff]   ;;  %v8211_v36 = vld [vmem:[#allocation4 + $0x244] ss:$28 sps:$4 sm:$0xff]  }
 0x599   :  { %6371 = vmatprep.subr.bf16.mxu0 %v8142_v47  ;;  %6358 = vmatprep.mubr.bf16.mxu1 %v8807_v56  ;;  %v8214_v47 = vld [vmem:[#allocation4 + $0x5c4] ss:$28 sps:$4 sm:$0xff]  }
 0x59a   :  { %6401 = vmatprep.mubr.bf16.mxu0 %v8813_v59 }
 0x59b   :  { %6329 = vmatpush1.bf16.msra.mxu1 %v8137_v54  ;;  %v8209_v54 = vld [vmem:[#allocation4 + $0x240] ss:$28 sps:$4 sm:$0xff]  }
 0x59c   :  { %6372 = vmatpush1.bf16.msra.mxu0 %v8140_v31  ;;  %6330 = vmatprep.subr.bf16.mxu1 %v8145_v15  ;;  %v8212_v31 = vld [vmem:[#allocation4 + $0x5c0] ss:$28 sps:$4 sm:$0xff]   ;;  %v8217_v15 = vld [vmem:[#allocation4 + $0x20c] ss:$28 sps:$4 sm:$0xff]  }
 0x59d   :  { %6373 = vmatprep.subr.bf16.mxu0 %v8148_v35  ;;  %v6016_v35 = vpop.f32.mrf.mxu1 }
 0x59f   :  { %6331 = vmatpush1.bf16.msra.mxu1 %v8143_v20  ;;  %v6059_v20 = vpop.f32.mrf.mxu0 }
 0x5a0   :  { %6374 = vmatpush1.bf16.msra.mxu0 %v8146_v45  ;;  %6332 = vmatprep.subr.bf16.mxu1 %v8151_v6  ;;  %v8220_v45 = vld [vmem:[#allocation4 + $0x58c] ss:$28 sps:$4 sm:$0xff]  }
 0x5a1   :  { %6375 = vmatprep.subr.bf16.mxu0 %v8154_v46  ;;  %v8215_v6 = vld [vmem:[#allocation4 + $0x208] ss:$28 sps:$4 sm:$0xff]  }
 0x5a2   :  { %v8218_v46 = vld [vmem:[#allocation4 + $0x588] ss:$28 sps:$4 sm:$0xff]  }
 0x5a3   :  { %6333 = vmatpush1.bf16.msra.mxu1 %v8149_v53  ;;  %v8223_v53 = vld [vmem:[#allocation4 + $0x1d4] ss:$28 sps:$4 sm:$0xff]  }
 0x5a4   :  { %6376 = vmatpush1.bf16.msra.mxu0 %v8152_v22  ;;  %6334 = vmatprep.subr.bf16.mxu1 %v8157_v40  ;;  %v6018_v22 = vpop.f32.mrf.mxu1  ;;  %v6061_v40 = vpop.f32.mrf.mxu0 }
 0x5a5   :  { %6377 = vmatprep.subr.bf16.mxu0 %v8160_v9  ;;  %v8226_v9 = vld [vmem:[#allocation4 + $0x554] ss:$28 sps:$4 sm:$0xff]  }
 0x5a7   :  { %6335 = vmatpush1.bf16.msra.mxu1 %v8155_v44  ;;  %v3653_v44 = vrot.slane %v8604_v17, %v8866_v39 }
 0x5a8   :  { %6378 = vmatpush1.bf16.msra.mxu0 %v8158_v43  ;;  %6336 = vmatprep.subr.bf16.mxu1 %v8163_v55  ;;  %v8221_v43 = vld [vmem:[#allocation4 + $0x1d0] ss:$28 sps:$4 sm:$0xff]  }
 0x5a9   :  { %6379 = vmatprep.subr.bf16.mxu0 %v8166_v61  ;;  %v8224_v55 = vld [vmem:[#allocation4 + $0x550] ss:$28 sps:$4 sm:$0xff]   ;;  %v3657_v61 = vrot.slane %v8607_v19, %v8866_v39  ;;  %v8238_v19 = vld [vmem:[#allocation4 + $0xbe4] ss:$28 sps:$4 sm:$0xff]  }
 0x5ab   :  { %6337 = vmatpush1.bf16.msra.mxu1 %v8161_v30  ;;  %v8229_v30 = vld [vmem:[#allocation4 + $0x89c] ss:$28 sps:$4 sm:$0xff]  }
 0x5ac   :  { %6380 = vmatpush1.bf16.msra.mxu0 %v8164_v38  ;;  %6338 = vmatprep.subr.bf16.mxu1 %v8169_v13  ;;  %v6020_v38 = vpop.f32.mrf.mxu1  ;;  %v6063_v13 = vpop.f32.mrf.mxu0 }
 0x5ad   :  { %6381 = vmatprep.subr.bf16.mxu0 %v8172_v50  ;;  %v8232_v50 = vld [vmem:[#allocation4 + $0xc1c] ss:$28 sps:$4 sm:$0xff]  }
 0x5ae   :  { %v6022_v17 = vpop.f32.mrf.mxu1 }
 0x5af   :  { %6339 = vmatpush1.bf16.msra.mxu1 %v8167_v37  ;;  %v6017_v37 = vadd.f32 %v6016_v35, %v3653_v44  ;;  %v8250_v35 = vld [vmem:[#allocation4 + $0xb74] ss:$28 sps:$4 sm:$0xff]  }
 0x5b0   :  { %6382 = vmatpush1.bf16.msra.mxu0 %v8170_v12  ;;  %6340 = vmatprep.subr.bf16.mxu1 %v8175_v14  ;;  %v6019_v12 = vadd.f32 %v6018_v22, %v3657_v61  ;;  %v8227_v14 = vld [vmem:[#allocation4 + $0x898] ss:$28 sps:$4 sm:$0xff]   ;;  %v8248_v22 = vld [vmem:[#allocation4 + $0xb70] ss:$28 sps:$4 sm:$0xff]  }
 0x5b1   :  { %6383 = vmatprep.subr.bf16.mxu0 %v8178_v51  ;;  %v8230_v51 = vld [vmem:[#allocation4 + $0xc18] ss:$28 sps:$4 sm:$0xff]  }
 0x5b3   :  { %6341 = vmatpush1.bf16.msra.mxu1 %v8173_v57  ;;  %v6065_v57 = vpop.f32.mrf.mxu0 }
 0x5b4   :  { %6384 = vmatpush1.bf16.msra.mxu0 %v8176_v58  ;;  %6342 = vmatprep.subr.bf16.mxu1 %v8181_v29  ;;  %v8235_v58 = vld [vmem:[#allocation4 + $0x864] ss:$28 sps:$4 sm:$0xff]   ;;  %v6060_v29 = vadd.f32 %v6059_v20, %v6017_v37  ;;  %v8268_v37 = vld [vmem:[#allocation4 + $0xacc] ss:$28 sps:$4 sm:$0xff]  }
 0x5b5   :  { %6385 = vmatprep.subr.bf16.mxu0 %v8184_v62  ;;  %v6021_v62 = vadd.f32 %v6020_v38, %v3653_v44  ;;  %v8251_v44 = vld [vmem:[#allocation4 + $0x7b8] ss:$28 sps:$4 sm:$0xff]   ;;  %v8260_v38 = vld [vmem:[#allocation4 + $0xb00] ss:$28 sps:$4 sm:$0xff]  }
 0x5b7   :  { %6343 = vmatpush2.bf16.msra.mxu1 %v8179_v27 }
 0x5b8   :  { %6386 = vmatpush2.bf16.msra.mxu0 %v8182_v42  ;;  %6344 = vmatprep.subr.bf16.mxu1 %v8187_v23  ;;  %v6062_v23 = vadd.f32 %v6061_v40, %v6019_v12  ;;  %v8253_v40 = vld [vmem:[#allocation4 + $0x7bc] ss:$28 sps:$4 sm:$0xff]  }
 0x5b9   :  { %6387 = vmatprep.subr.bf16.mxu0 %v8190_v24  ;;  %v6023_v24 = vadd.f32 %v6022_v17, %v3657_v61  ;;  %v8262_v61 = vld [vmem:[#allocation4 + $0xb04] ss:$28 sps:$4 sm:$0xff]  }
 0x5bb   :  { %6345 = vmatpush2.bf16.msra.mxu1 %v8185_v52 }
 0x5bc   :  { %6388 = vmatpush2.bf16.msra.mxu0 %v8188_v60  ;;  %6346 = vmatprep.subr.bf16.mxu1 %v8193_v0  ;;  %v8233_v60 = vld [vmem:[#allocation4 + $0x860] ss:$28 sps:$4 sm:$0xff]  }
 0x5bd   :  { %6389 = vmatprep.subr.bf16.mxu0 %v8196_v21  ;;  %v8236_v0 = vld [vmem:[#allocation4 + $0xbe0] ss:$28 sps:$4 sm:$0xff]  }
 0x5bf   :  { %6347 = vmatpush2.bf16.msra.mxu1 %v8191_v34 }
 0x5c0   :  { %6390 = vmatpush2.bf16.msra.mxu0 %v8194_v8  ;;  %6348 = vmatprep.subr.bf16.mxu1 %v8199_v16  ;;  %v8241_v8 = vld [vmem:[#allocation4 + $0x82c] ss:$28 sps:$4 sm:$0xff]  }
 0x5c1   :  { %6391 = vmatprep.subr.bf16.mxu0 %v8202_v18  ;;  %v8244_v16 = vld [vmem:[#allocation4 + $0xbac] ss:$28 sps:$4 sm:$0xff]   ;;  %v6064_v18 = vadd.f32 %v6063_v13, %v6021_v62 }
 0x5c2   :  { %v8272_v62 = vld [vmem:[#allocation4 + $0xa90] ss:$28 sps:$4 sm:$0xff]  }
 0x5c3   :  { %6349 = vmatpush2.bf16.msra.mxu1 %v8197_v48 }
 0x5c4   :  { %6392 = vmatpush2.bf16.msra.mxu0 %v8200_v49  ;;  %6350 = vmatprep.subr.bf16.mxu1 %v8205_v41 }
 0x5c5   :  { %6393 = vmatprep.subr.bf16.mxu0 %v8208_v7 }
 0x5c7   :  { %6351 = vmatpush2.bf16.msra.mxu1 %v8203_v10  ;;  %v6066_v10 = vadd.f32 %v6065_v57, %v6023_v24  ;;  %v8271_v57 = vld [vmem:[#allocation4 + $0x714] ss:$28 sps:$4 sm:$0xff]  }
 0x5c8   :  { %6394 = vmatpush2.bf16.msra.mxu0 %v8206_v33  ;;  %6352 = vmatprep.subr.bf16.mxu1 %v8211_v36  ;;  %v8278_v24 = vld [vmem:[#allocation4 + $0xdd8] ss:$28 sps:$4 sm:$0xff]  }
 0x5c9   :  { %6395 = vmatprep.subr.bf16.mxu0 %v8214_v47  ;;  %v8239_v47 = vld [vmem:[#allocation4 + $0x828] ss:$28 sps:$4 sm:$0xff]  }
 0x5cb   :  { %6353 = vmatpush2.bf16.msra.mxu1 %v8209_v54  ;;  %v8242_v54 = vld [vmem:[#allocation4 + $0xba8] ss:$28 sps:$4 sm:$0xff]  }
 0x5cc   :  { %6396 = vmatpush2.bf16.msra.mxu0 %v8212_v31  ;;  %6354 = vmatprep.subr.bf16.mxu1 %v8217_v15  ;;  %v8247_v15 = vld [vmem:[#allocation4 + $0x7f4] ss:$28 sps:$4 sm:$0xff]  }
 0x5cd   :  { %6397 = vmatprep.subr.bf16.mxu0 %v8220_v45 }
 0x5cf   :  { %6355 = vmatpush2.bf16.msra.mxu1 %v8215_v6 }
 0x5d0   :  { %6398 = vmatpush2.bf16.msra.mxu0 %v8218_v46  ;;  %6356 = vmatprep.subr.bf16.mxu1 %v8223_v53  ;;  %v8245_v53 = vld [vmem:[#allocation4 + $0x7f0] ss:$28 sps:$4 sm:$0xff]  }
 0x5d1   :  { %6399 = vmatprep.subr.bf16.mxu0 %v8226_v9  ;;  %v8256_v9 = vld [vmem:[#allocation4 + $0xb3c] ss:$28 sps:$4 sm:$0xff]  }
 0x5d3   :  { %6357 = vmatpush2.bf16.msra.mxu1 %v8221_v43  ;;  %v8254_v43 = vld [vmem:[#allocation4 + $0xb38] ss:$28 sps:$4 sm:$0xff]  }
 0x5d4   :  { %6400 = vmatpush2.bf16.msra.mxu0 %v8224_v55  ;;  %6412 = vmatprep.subr.bf16.mxu1 %v8229_v30  ;;  %v8259_v55 = vld [vmem:[#allocation4 + $0x784] ss:$28 sps:$4 sm:$0xff]  }
 0x5d5   :  { %6455 = vmatprep.subr.bf16.mxu0 %v8232_v50  ;;  %v8257_v30 = vld [vmem:[#allocation4 + $0x780] ss:$28 sps:$4 sm:$0xff]   ;;  %v8265_v50 = vld [vmem:[#allocation4 + $0x74c] ss:$28 sps:$4 sm:$0xff]  }
 0x5d6   :  { %v6102_v27 = vpop.f32.mrf.mxu1  ;;  %6359 = vmatmul.mubr.bf16.vlgmr.msra.gmra.mxu1 %v8821_v32 }
 0x5d7   :  { %v6145_v42 = vpop.f32.mrf.mxu0  ;;  %6402 = vmatmul.mubr.bf16.vlgmr.msra.gmra.mxu0 %v8827_v11  ;;  %v6103_v52 = vadd.f32 %v6102_v27, %v6060_v29  ;;  %6413 = vmatpush1.bf16.msra.mxu1 %v8227_v14  ;;  %v8263_v14 = vld [vmem:[#allocation4 + $0x748] ss:$28 sps:$4 sm:$0xff]   ;;  %v8269_v29 = vld [vmem:[#allocation4 + $0x710] ss:$28 sps:$4 sm:$0xff]   ;;  %v8277_v27 = vld [vmem:[#allocation4 + $0xa5c] ss:$28 sps:$4 sm:$0xff]  }
 0x5d8   :  { %6456 = vmatpush1.bf16.msra.mxu0 %v8230_v51  ;;  %v6104_v21 = vpop.f32.mrf.mxu1  ;;  %6414 = vmatprep.subr.bf16.mxu1 %v8235_v58  ;;  %v8266_v51 = vld [vmem:[#allocation4 + $0xac8] ss:$28 sps:$4 sm:$0xff]   ;;  %v8274_v58 = vld [vmem:[#allocation4 + $0xa94] ss:$28 sps:$4 sm:$0xff]  }
 0x5d9   :  { %v6147_v34 = vpop.f32.mrf.mxu0  ;;  %6457 = vmatprep.subr.bf16.mxu0 %v8238_v19  ;;  %v6146_v48 = vadd.f32 %v6145_v42, %v6103_v52  ;;  %v6105_v49 = vadd.f32 %v6104_v21, %v6062_v23  ;;  %6444 = vmatprep.mubr.bf16.mxu1 %v8833_v26  ;;  %v8280_v42 = vld [vmem:[#allocation4 + $0xddc] ss:$28 sps:$4 sm:$0xff]   ;;  %v8283_v52 = vld [vmem:[#allocation4 + $0xa24] ss:$28 sps:$4 sm:$0xff]  }
 0x5da   :  { %6487 = vmatprep.mubr.bf16.mxu0 %v8839_v63  ;;  %v6106_v41 = vpop.f32.mrf.mxu1  ;;  %v8275_v23 = vld [vmem:[#allocation4 + $0xa58] ss:$28 sps:$4 sm:$0xff]   ;;  %v8284_v21 = vld [vmem:[#allocation4 + $0xda0] ss:$28 sps:$4 sm:$0xff]  }
 0x5db   :  { %v6149_v7 = vpop.f32.mrf.mxu0  ;;  %8387 = vtanh.f32 %v6146_v48  ;;  %v6148_v33 = vadd.f32 %v6147_v34, %v6105_v49  ;;  %v6107_v36 = vadd.f32 %v6106_v41, %v6064_v18  ;;  %6415 = vmatpush1.bf16.msra.mxu1 %v8233_v60  ;;  %v8286_v60 = vld [vmem:[#allocation4 + $0xda4] ss:$28 sps:$4 sm:$0xff]   ;;  %v8289_v34 = vld [vmem:[#allocation4 + $0x9ec] ss:$28 sps:$4 sm:$0xff]   ;;  %v8295_v48 = vld [vmem:[#allocation4 + $0x9b4] ss:$28 sps:$4 sm:$0xff]  }
 0x5dc   :  { %6458 = vmatpush1.bf16.msra.mxu0 %v8236_v0  ;;  %v6108_v31 = vpop.f32.mrf.mxu1  ;;  %6416 = vmatprep.subr.bf16.mxu1 %v8241_v8  ;;  %v8281_v0 = vld [vmem:[#allocation4 + $0xa20] ss:$28 sps:$4 sm:$0xff]   ;;  %v8292_v8 = vld [vmem:[#allocation4 + $0xd6c] ss:$28 sps:$4 sm:$0xff]   ;;  %v8298_v49 = vld [vmem:[#allocation4 + $0xd34] ss:$28 sps:$4 sm:$0xff]  }
 0x5dd   :  { %6459 = vmatprep.subr.bf16.mxu0 %v8244_v16  ;;  %8389 = vtanh.f32 %v6148_v33  ;;  %v6150_v20 = vadd.f32 %v6149_v7, %v6107_v36  ;;  %v6109_v45 = vadd.f32 %v6108_v31, %v6066_v10  ;;  %v6151_v6 = vpop.f32.mrf.mxu0  ;;  %v8287_v16 = vld [vmem:[#allocation4 + $0x9e8] ss:$28 sps:$4 sm:$0xff]   ;;  %v8293_v41 = vld [vmem:[#allocation4 + $0x9b0] ss:$28 sps:$4 sm:$0xff]   ;;  %v8301_v10 = vld [vmem:[#allocation4 + $0x97c] ss:$28 sps:$4 sm:$0xff]  }
 0x5de   :  { %v8290_v18 = vld [vmem:[#allocation4 + $0xd68] ss:$28 sps:$4 sm:$0xff]   ;;  %v8296_v7 = vld [vmem:[#allocation4 + $0xd30] ss:$28 sps:$4 sm:$0xff]   ;;  %v8304_v33 = vld [vmem:[#allocation4 + $0xcfc] ss:$28 sps:$4 sm:$0xff]  }
 0x5df   :  { %8391 = vtanh.f32 %v6150_v20  ;;  %v6152_v46 = vadd.f32 %v6151_v6, %v6109_v45  ;;  %6417 = vmatpush1.bf16.msra.mxu1 %v8239_v47  ;;  %v8299_v36 = vld [vmem:[#allocation4 + $0x978] ss:$28 sps:$4 sm:$0xff]   ;;  %v8310_v31 = vld [vmem:[#allocation4 + $0xcc4] ss:$28 sps:$4 sm:$0xff]   ;;  %v8313_v20 = vld [vmem:[#allocation4 + $0x90c] ss:$28 sps:$4 sm:$0xff]  }
 0x5e0   :  { %6460 = vmatpush1.bf16.msra.mxu0 %v8242_v54  ;;  %6418 = vmatprep.subr.bf16.mxu1 %v8247_v15  ;;  %v8302_v47 = vld [vmem:[#allocation4 + $0xcf8] ss:$28 sps:$4 sm:$0xff]   ;;  %v8307_v54 = vld [vmem:[#allocation4 + $0x944] ss:$28 sps:$4 sm:$0xff]   ;;  %v8316_v45 = vld [vmem:[#allocation4 + $0xc8c] ss:$28 sps:$4 sm:$0xff]  }
 0x5e1   :  { %6461 = vmatprep.subr.bf16.mxu0 %v8250_v35  ;;  %8393 = vtanh.f32 %v6152_v46  ;;  %v8305_v15 = vld [vmem:[#allocation4 + $0x940] ss:$28 sps:$4 sm:$0xff]   ;;  %v8311_v6 = vld [vmem:[#allocation4 + $0x908] ss:$28 sps:$4 sm:$0xff]  }
 0x5e2   :  { %v8308_v35 = vld [vmem:[#allocation4 + $0xcc0] ss:$28 sps:$4 sm:$0xff]   ;;  %v8314_v46 = vld [vmem:[#allocation4 + $0xc88] ss:$28 sps:$4 sm:$0xff]  }
 0x5e3   :  { %6419 = vmatpush1.bf16.msra.mxu1 %v8245_v53  ;;  %v8319_v53 = vld [vmem:[#allocation4 + $0x8d4] ss:$28 sps:$4 sm:$0xff]  }
 0x5e4   :  { %6462 = vmatpush1.bf16.msra.mxu0 %v8248_v22  ;;  %6420 = vmatprep.subr.bf16.mxu1 %v8253_v40  ;;  %v8322_v22 = vld [vmem:[#allocation4 + $0xc54] ss:$28 sps:$4 sm:$0xff]  }
 0x5e5   :  { %6463 = vmatprep.subr.bf16.mxu0 %v8256_v9  ;;  %v8317_v40 = vld [vmem:[#allocation4 + $0x8d0] ss:$28 sps:$4 sm:$0xff]  }
 0x5e6   :  { %v8320_v9 = vld [vmem:[#allocation4 + $0xc50] ss:$28 sps:$4 sm:$0xff]  }
 0x5e7   :  { %6421 = vmatpush1.bf16.msra.mxu1 %v8251_v44  ;;  %v8323_v44 = vld [vmem:[#allocation4 + $0x360] ss:$28 sps:$4 sm:$0xff]  }
 0x5e8   :  { %6464 = vmatpush1.bf16.msra.mxu0 %v8254_v43  ;;  %v8388_v13 = vpop.eup %8387  ;;  %6422 = vmatprep.subr.bf16.mxu1 %v8259_v55  ;;  %v8324_v43 = vld [vmem:[#allocation4 + $0x6e0] ss:$28 sps:$4 sm:$0xff]  }
 0x5e9   :  { %6465 = vmatprep.subr.bf16.mxu0 %v8262_v61  ;;  %6676 = vst [vmem:[%s8948_s6] sm:$0xff] %v8388_v13  ;;  %v8325_v55 = vld [vmem:[#allocation4 + $0x1a0] ss:$28 sps:$4 sm:$0xff]   ;;  %v8329_v13 = vld [vmem:[#allocation4 + $0x168] ss:$28 sps:$4 sm:$0xff]  }
 0x5ea   :  { %v8390_v12 = vpop.eup %8389  ;;  %v8326_v61 = vld [vmem:[#allocation4 + $0x520] ss:$28 sps:$4 sm:$0xff]  }
 0x5eb   :  { %6677 = vst [vmem:[%s8948_s6 + $0x8] sm:$0xff] %v8390_v12  ;;  %6423 = vmatpush1.bf16.msra.mxu1 %v8257_v30  ;;  %v8327_v30 = vld [vmem:[#allocation4 + $0x328] ss:$28 sps:$4 sm:$0xff]   ;;  %v8332_v12 = vld [vmem:[#allocation4 + $0x670] ss:$28 sps:$4 sm:$0xff]  }
 0x5ec   :  { %6466 = vmatpush1.bf16.msra.mxu0 %v8260_v38  ;;  %v8392_v17 = vpop.eup %8391  ;;  %6424 = vmatprep.subr.bf16.mxu1 %v8265_v50  ;;  %v8328_v38 = vld [vmem:[#allocation4 + $0x6a8] ss:$28 sps:$4 sm:$0xff]  }
 0x5ed   :  { %6467 = vmatprep.subr.bf16.mxu0 %v8268_v37  ;;  %6683 = vst [vmem:[%s8948_s6 + $0x38] sm:$0xff] %v8392_v17  ;;  %v8330_v50 = vld [vmem:[#allocation4 + $0x4e8] ss:$28 sps:$4 sm:$0xff]   ;;  %v8331_v37 = vld [vmem:[#allocation4 + $0x2f0] ss:$28 sps:$4 sm:$0xff]  }
 0x5ee   :  { %v8394_v19 = vpop.eup %8393  ;;  %v8335_v17 = vld [vmem:[#allocation4 + $0x2b8] ss:$28 sps:$4 sm:$0xff]  }
 0x5ef   :  { %6684 = vst [vmem:[%s8948_s6 + $0x40] sm:$0xff] %v8394_v19  ;;  %6425 = vmatpush1.bf16.msra.mxu1 %v8263_v14  ;;  %v8333_v14 = vld [vmem:[#allocation4 + $0x130] ss:$28 sps:$4 sm:$0xff]   ;;  %v8338_v19 = vld [vmem:[#allocation4 + $0x478] ss:$28 sps:$4 sm:$0xff]  }
 0x5f0   :  { %6468 = vmatpush1.bf16.msra.mxu0 %v8266_v51  ;;  %6426 = vmatprep.subr.bf16.mxu1 %v8271_v57  ;;  %v8334_v51 = vld [vmem:[#allocation4 + $0x4b0] ss:$28 sps:$4 sm:$0xff]   ;;  %v8336_v57 = vld [vmem:[#allocation4 + $0x638] ss:$28 sps:$4 sm:$0xff]  }
 0x5f1   :  { %6469 = vmatprep.subr.bf16.mxu0 %v8274_v58  ;;  %v8337_v58 = vld [vmem:[#allocation4 + $0xf8] ss:$28 sps:$4 sm:$0xff]  }
 0x5f3   :  { %6427 = vmatpush1.bf16.msra.mxu1 %v8269_v29  ;;  %v8339_v29 = vld [vmem:[#allocation4 + $0x280] ss:$28 sps:$4 sm:$0xff]  }
 0x5f4   :  { %6470 = vmatpush1.bf16.msra.mxu0 %v8272_v62  ;;  %6428 = vmatprep.subr.bf16.mxu1 %v8277_v27  ;;  %v8340_v62 = vld [vmem:[#allocation4 + $0x600] ss:$28 sps:$4 sm:$0xff]   ;;  %v8343_v27 = vld [vmem:[#allocation4 + $0x248] ss:$28 sps:$4 sm:$0xff]  }
 0x5f5   :  { %6471 = vmatprep.subr.bf16.mxu0 %v8280_v42  ;;  %v8344_v42 = vld [vmem:[#allocation4 + $0x5c8] ss:$28 sps:$4 sm:$0xff]  }
 0x5f7   :  { %6429 = vmatpush2.bf16.msra.mxu1 %v8275_v23  ;;  %v8345_v23 = vld [vmem:[#allocation4 + $0x88] ss:$28 sps:$4 sm:$0xff]  }
 0x5f8   :  { %6472 = vmatpush2.bf16.msra.mxu0 %v8278_v24  ;;  %6430 = vmatprep.subr.bf16.mxu1 %v8283_v52  ;;  %v8346_v24 = vld [vmem:[#allocation4 + $0x408] ss:$28 sps:$4 sm:$0xff]   ;;  %v8347_v52 = vld [vmem:[#allocation4 + $0x210] ss:$28 sps:$4 sm:$0xff]  }
 0x5f9   :  { %6473 = vmatprep.subr.bf16.mxu0 %v8286_v60  ;;  %v8348_v60 = vld [vmem:[#allocation4 + $0x590] ss:$28 sps:$4 sm:$0xff]  }
 0x5fb   :  { %6431 = vmatpush2.bf16.msra.mxu1 %v8281_v0  ;;  %v8349_v0 = vld [vmem:[#allocation4 + $0x50] ss:$28 sps:$4 sm:$0xff]  }
 0x5fc   :  { %6474 = vmatpush2.bf16.msra.mxu0 %v8284_v21  ;;  %6432 = vmatprep.subr.bf16.mxu1 %v8289_v34  ;;  %v8350_v21 = vld [vmem:[#allocation4 + $0x3d0] ss:$28 sps:$4 sm:$0xff]   ;;  %v8351_v34 = vld [vmem:[#allocation4 + $0x1d8] ss:$28 sps:$4 sm:$0xff]  }
 0x5fd   :  { %6475 = vmatprep.subr.bf16.mxu0 %v8292_v8  ;;  %v8352_v8 = vld [vmem:[#allocation4 + $0x558] ss:$28 sps:$4 sm:$0xff]  }
 0x5ff   :  { %6433 = vmatpush2.bf16.msra.mxu1 %v8287_v16  ;;  %v8353_v16 = vld [vmem:[#allocation4 + $0x18] ss:$28 sps:$4 sm:$0xff]  }
 0x600   :  { %6476 = vmatpush2.bf16.msra.mxu0 %v8290_v18  ;;  %6434 = vmatprep.subr.bf16.mxu1 %v8295_v48  ;;  %v8354_v18 = vld [vmem:[#allocation4 + $0x398] ss:$28 sps:$4 sm:$0xff]   ;;  %v8355_v48 = vld [vmem:[#allocation4 + $0xa60] ss:$28 sps:$4 sm:$0xff]  }
 0x601   :  { %6477 = vmatprep.subr.bf16.mxu0 %v8298_v49  ;;  %v8356_v49 = vld [vmem:[#allocation4 + $0xde0] ss:$28 sps:$4 sm:$0xff]  }
 0x603   :  { %6435 = vmatpush2.bf16.msra.mxu1 %v8293_v41  ;;  %v8357_v41 = vld [vmem:[#allocation4 + $0x8a0] ss:$28 sps:$4 sm:$0xff]  }
 0x604   :  { %6478 = vmatpush2.bf16.msra.mxu0 %v8296_v7  ;;  %6436 = vmatprep.subr.bf16.mxu1 %v8301_v10  ;;  %v8358_v7 = vld [vmem:[#allocation4 + $0xc20] ss:$28 sps:$4 sm:$0xff]   ;;  %v8359_v10 = vld [vmem:[#allocation4 + $0xa28] ss:$28 sps:$4 sm:$0xff]  }
 0x605   :  { %6479 = vmatprep.subr.bf16.mxu0 %v8304_v33  ;;  %v8360_v33 = vld [vmem:[#allocation4 + $0xda8] ss:$28 sps:$4 sm:$0xff]  }
 0x607   :  { %6437 = vmatpush2.bf16.msra.mxu1 %v8299_v36  ;;  %v8361_v36 = vld [vmem:[#allocation4 + $0x868] ss:$28 sps:$4 sm:$0xff]  }
 0x608   :  { %6480 = vmatpush2.bf16.msra.mxu0 %v8302_v47  ;;  %6438 = vmatprep.subr.bf16.mxu1 %v8307_v54  ;;  %v8362_v47 = vld [vmem:[#allocation4 + $0xbe8] ss:$28 sps:$4 sm:$0xff]   ;;  %v8363_v54 = vld [vmem:[#allocation4 + $0x9f0] ss:$28 sps:$4 sm:$0xff]  }
 0x609   :  { %6481 = vmatprep.subr.bf16.mxu0 %v8310_v31  ;;  %v8364_v31 = vld [vmem:[#allocation4 + $0xd70] ss:$28 sps:$4 sm:$0xff]  }
 0x60b   :  { %6439 = vmatpush2.bf16.msra.mxu1 %v8305_v15  ;;  %v8365_v15 = vld [vmem:[#allocation4 + $0x830] ss:$28 sps:$4 sm:$0xff]  }
 0x60c   :  { %6482 = vmatpush2.bf16.msra.mxu0 %v8308_v35  ;;  %6440 = vmatprep.subr.bf16.mxu1 %v8313_v20  ;;  %v8366_v35 = vld [vmem:[#allocation4 + $0xbb0] ss:$28 sps:$4 sm:$0xff]   ;;  %v8369_v20 = vld [vmem:[#allocation4 + $0x7f8] ss:$28 sps:$4 sm:$0xff]  }
 0x60d   :  { %6483 = vmatprep.subr.bf16.mxu0 %v8316_v45  ;;  %v8370_v45 = vld [vmem:[#allocation4 + $0xb78] ss:$28 sps:$4 sm:$0xff]  }
 0x60f   :  { %6441 = vmatpush2.bf16.msra.mxu1 %v8311_v6  ;;  %v8371_v6 = vld [vmem:[#allocation4 + $0x980] ss:$28 sps:$4 sm:$0xff]  }
 0x610   :  { %6484 = vmatpush2.bf16.msra.mxu0 %v8314_v46  ;;  %6442 = vmatprep.subr.bf16.mxu1 %v8319_v53  ;;  %v8372_v46 = vld [vmem:[#allocation4 + $0xd00] ss:$28 sps:$4 sm:$0xff]   ;;  %v8375_v53 = vld [vmem:[#allocation4 + $0x948] ss:$28 sps:$4 sm:$0xff]  }
 0x611   :  { %6485 = vmatprep.subr.bf16.mxu0 %v8322_v22  ;;  %v8376_v22 = vld [vmem:[#allocation4 + $0xcc8] ss:$28 sps:$4 sm:$0xff]  }
 0x613   :  { %6443 = vmatpush2.bf16.msra.mxu1 %v8317_v40  ;;  %v8377_v40 = vld [vmem:[#allocation4 + $0x788] ss:$28 sps:$4 sm:$0xff]  }
 0x614   :  { %6486 = vmatpush2.bf16.msra.mxu0 %v8320_v9  ;;  %7503 = vmatprep.subr.bf16.mxu1 %v8323_v44  ;;  %v8378_v9 = vld [vmem:[#allocation4 + $0xb08] ss:$28 sps:$4 sm:$0xff]  }
 0x615   :  { %7525 = vmatprep.subr.bf16.mxu0 %v8324_v43 }
 0x616   :  { %6445 = vmatmul.mubr.bf16.vlgmr.msra.gmra.mxu1 %v8849_v25  ;;  %v6188_v44 = vpop.f32.mrf.mxu1 }
 0x617   :  { %6488 = vmatmul.mubr.bf16.vlgmr.msra.gmra.mxu0 %v8855_v28  ;;  %7504 = vmatpush3.bf16.msra.mxu1 %v8325_v55  ;;  %v6231_v43 = vpop.f32.mrf.mxu0  ;;  %v8379_v55 = vld [vmem:[#allocation4 + $0x910] ss:$28 sps:$4 sm:$0xff]  }
 0x618   :  { %7526 = vmatpush3.bf16.msra.mxu0 %v8326_v61  ;;  %7505 = vmatprep.subr.bf16.mxu1 %v8327_v30  ;;  %v8380_v61 = vld [vmem:[#allocation4 + $0xc90] ss:$28 sps:$4 sm:$0xff]  }
 0x619   :  { %7527 = vmatprep.subr.bf16.mxu0 %v8328_v38  ;;  %6530 = vmatprep.mubr.bf16.mxu1 %v8807_v56  ;;  %v8341_v56 = vld [vmem:[#allocation4 + $0xc0] ss:$28 sps:$4 sm:$0xff]   ;;  %v8381_v30 = vld [vmem:[#allocation4 + $0x750] ss:$28 sps:$4 sm:$0xff]  }
 0x61a   :  { %6571 = vmatprep.mubr.bf16.mxu0 %v8813_v59  ;;  %v8342_v59 = vld [vmem:[#allocation4 + $0x440] ss:$28 sps:$4 sm:$0xff]   ;;  %v8382_v38 = vld [vmem:[#allocation4 + $0xad0] ss:$28 sps:$4 sm:$0xff]  }
 0x61b   :  { %7506 = vmatpush3.bf16.msra.mxu1 %v8329_v13  ;;  %v6190_v13 = vpop.f32.mrf.mxu1 }
 0x61c   :  { %7528 = vmatpush3.bf16.msra.mxu0 %v8330_v50  ;;  %7507 = vmatprep.subr.bf16.mxu1 %v8331_v37  ;;  %v6233_v50 = vpop.f32.mrf.mxu0  ;;  %v8383_v37 = vld [vmem:[#allocation4 + $0x8d8] ss:$28 sps:$4 sm:$0xff]  }
 0x61d   :  { %7529 = vmatprep.subr.bf16.mxu0 %v8332_v12  ;;  %v8384_v12 = vld [vmem:[#allocation4 + $0xc58] ss:$28 sps:$4 sm:$0xff]  }
 0x61f   :  { %7508 = vmatpush3.bf16.msra.mxu1 %v8333_v14  ;;  %v3661_v14 = vrot.slane %v8574_v1, %v8866_v39 }
 0x620   :  { %7530 = vmatpush3.bf16.msra.mxu0 %v8334_v51  ;;  %7509 = vmatprep.subr.bf16.mxu1 %v8335_v17  ;;  %v3665_v51 = vrot.slane %v8576_v2, %v8866_v39  ;;  %v8385_v17 = vld [vmem:[#allocation4 + $0x718] ss:$28 sps:$4 sm:$0xff]  }
 0x621   :  { %7531 = vmatprep.subr.bf16.mxu0 %v8336_v57  ;;  %v8386_v57 = vld [vmem:[#allocation4 + $0xa98] ss:$28 sps:$4 sm:$0xff]  }
 0x623   :  { %7510 = vmatpush3.bf16.msra.mxu1 %v8337_v58  ;;  %v6192_v58 = vpop.f32.mrf.mxu1 }
 0x624   :  { %7532 = vmatpush3.bf16.msra.mxu0 %v8338_v19  ;;  %7511 = vmatprep.subr.bf16.mxu1 %v8339_v29  ;;  %v6235_v19 = vpop.f32.mrf.mxu0  ;;  %v6189_v29 = vadd.f32 %v6188_v44, %v3661_v14 }
 0x625   :  { %7533 = vmatprep.subr.bf16.mxu0 %v8340_v62  ;;  %v6191_v62 = vadd.f32 %v6190_v13, %v3665_v51 }
 0x627   :  { %7512 = vmatpush3.bf16.msra.mxu1 %v8341_v56  ;;  %v6194_v56 = vpop.f32.mrf.mxu1  ;;  %v6234_v2 = vadd.f32 %v6233_v50, %v6191_v62 }
 0x628   :  { %7534 = vmatpush3.bf16.msra.mxu0 %v8342_v59  ;;  %7513 = vmatprep.subr.bf16.mxu1 %v8343_v27  ;;  %v6237_v59 = vpop.f32.mrf.mxu0  ;;  %v6232_v27 = vadd.f32 %v6231_v43, %v6189_v29 }
 0x629   :  { %7535 = vmatprep.subr.bf16.mxu0 %v8344_v42  ;;  %v6193_v42 = vadd.f32 %v6192_v58, %v3661_v14 }
 0x62b   :  { %7514 = vmatpush3.bf16.msra.mxu1 %v8345_v23 }
 0x62c   :  { %7536 = vmatpush3.bf16.msra.mxu0 %v8346_v24  ;;  %7515 = vmatprep.subr.bf16.mxu1 %v8347_v52  ;;  %v6195_v24 = vadd.f32 %v6194_v56, %v3665_v51 }
 0x62d   :  { %7537 = vmatprep.subr.bf16.mxu0 %v8348_v60 }
 0x62f   :  { %7516 = vmatpush3.bf16.msra.mxu1 %v8349_v0 }
 0x630   :  { %7538 = vmatpush3.bf16.msra.mxu0 %v8350_v21  ;;  %7517 = vmatprep.subr.bf16.mxu1 %v8351_v34  ;;  %v6236_v21 = vadd.f32 %v6235_v19, %v6193_v42 }
 0x631   :  { %7539 = vmatprep.subr.bf16.mxu0 %v8352_v8 }
 0x633   :  { %7518 = vmatpush3.bf16.msra.mxu1 %v8353_v16 }
 0x634   :  { %7540 = vmatpush3.bf16.msra.mxu0 %v8354_v18  ;;  %7547 = vmatprep.subr.bf16.mxu1 %v8355_v48  ;;  %v6238_v48 = vadd.f32 %v6237_v59, %v6195_v24 }
 0x635   :  { %7569 = vmatprep.subr.bf16.mxu0 %v8356_v49 }
 0x636   :  { %6531 = vmatmul.mubr.bf16.vlgmr.msra.gmra.mxu1 %v8821_v32  ;;  %v8367_v32 = vld [vmem:[#allocation4 + $0x9b8] ss:$28 sps:$4 sm:$0xff]  }
 0x637   :  { %6572 = vmatmul.mubr.bf16.vlgmr.msra.gmra.mxu0 %v8827_v11  ;;  %7548 = vmatpush3.bf16.msra.mxu1 %v8357_v41  ;;  %v8368_v11 = vld [vmem:[#allocation4 + $0xd38] ss:$28 sps:$4 sm:$0xff]  }
 0x638   :  { %7570 = vmatpush3.bf16.msra.mxu0 %v8358_v7  ;;  %7549 = vmatprep.subr.bf16.mxu1 %v8359_v10 }
 0x639   :  { %7571 = vmatprep.subr.bf16.mxu0 %v8360_v33  ;;  %6612 = vmatprep.mubr.bf16.mxu1 %v8833_v26  ;;  %v8373_v26 = vld [vmem:[#allocation4 + $0x7c0] ss:$28 sps:$4 sm:$0xff]  }
 0x63a   :  { %6653 = vmatprep.mubr.bf16.mxu0 %v8839_v63  ;;  %v8374_v63 = vld [vmem:[#allocation4 + $0xb40] ss:$28 sps:$4 sm:$0xff]  }
 0x63b   :  { %7550 = vmatpush3.bf16.msra.mxu1 %v8361_v36 }
 0x63c   :  { %7572 = vmatpush3.bf16.msra.mxu0 %v8362_v47  ;;  %7551 = vmatprep.subr.bf16.mxu1 %v8363_v54 }
 0x63d   :  { %7573 = vmatprep.subr.bf16.mxu0 %v8364_v31 }
 0x63f   :  { %7552 = vmatpush3.bf16.msra.mxu1 %v8365_v15 }
 0x640   :  { %7574 = vmatpush3.bf16.msra.mxu0 %v8366_v35  ;;  %7553 = vmatprep.subr.bf16.mxu1 %v8367_v32 }
 0x641   :  { %7575 = vmatprep.subr.bf16.mxu0 %v8368_v11 }
 0x643   :  { %7554 = vmatpush3.bf16.msra.mxu1 %v8369_v20  ;;  %v3669_v20 = vrot.slane %v8578_v3, %v8866_v39 }
 0x644   :  { %7576 = vmatpush3.bf16.msra.mxu0 %v8370_v45  ;;  %7555 = vmatprep.subr.bf16.mxu1 %v8371_v6  ;;  %v3673_v45 = vrot.slane %v8580_v4, %v8866_v39 }
 0x645   :  { %7577 = vmatprep.subr.bf16.mxu0 %v8372_v46 }
 0x647   :  { %7556 = vmatpush3.bf16.msra.mxu1 %v8373_v26 }
 0x648   :  { %7578 = vmatpush3.bf16.msra.mxu0 %v8374_v63  ;;  %7557 = vmatprep.subr.bf16.mxu1 %v8375_v53 }
 0x649   :  { %7579 = vmatprep.subr.bf16.mxu0 %v8376_v22 }
 0x64b   :  { %7558 = vmatpush3.bf16.msra.mxu1 %v8377_v40 }
 0x64c   :  { %7580 = vmatpush3.bf16.msra.mxu0 %v8378_v9  ;;  %7559 = vmatprep.subr.bf16.mxu1 %v8379_v55 }
 0x64d   :  { %7581 = vmatprep.subr.bf16.mxu0 %v8380_v61 }
 0x64f   :  { %7560 = vmatpush3.bf16.msra.mxu1 %v8381_v30 }
 0x650   :  { %7582 = vmatpush3.bf16.msra.mxu0 %v8382_v38  ;;  %7561 = vmatprep.subr.bf16.mxu1 %v8383_v37 }
 0x651   :  { %7583 = vmatprep.subr.bf16.mxu0 %v8384_v12 }
 0x653   :  { %7562 = vmatpush3.bf16.msra.mxu1 %v8385_v17 }
 0x654   :  { %7584 = vmatpush3.bf16.msra.mxu0 %v8386_v57 }
 0x656   :  { %v6274_v1 = vpop.f32.mrf.mxu1  ;;  %6613 = vmatmul.mubr.bf16.vlgmr.msra.gmra.mxu1 %v8849_v25 }
 0x657   :  { %v6317_v23 = vpop.f32.mrf.mxu0  ;;  %6654 = vmatmul.mubr.bf16.vlgmr.msra.gmra.mxu0 %v8855_v28  ;;  %v6275_v52 = vadd.f32 %v6274_v1, %v6232_v27 }
 0x658   :  { %v6276_v60 = vpop.f32.mrf.mxu1 }
 0x659   :  { %v6319_v0 = vpop.f32.mrf.mxu0  ;;  %v6318_v34 = vadd.f32 %v6317_v23, %v6275_v52  ;;  %v6277_v8 = vadd.f32 %v6276_v60, %v6234_v2 }
 0x65a   :  { %v6278_v16 = vpop.f32.mrf.mxu1 }
 0x65b   :  { %v6321_v18 = vpop.f32.mrf.mxu0  ;;  %8395 = vtanh.f32 %v6318_v34  ;;  %v6320_v49 = vadd.f32 %v6319_v0, %v6277_v8  ;;  %v6279_v41 = vadd.f32 %v6278_v16, %v6236_v21  ;;  %v3677_v0 = vrot.slane %v8582_v5, %v8866_v39 }
 0x65c   :  { %v6280_v7 = vpop.f32.mrf.mxu1 }
 0x65d   :  { %8397 = vtanh.f32 %v6320_v49  ;;  %v6322_v10 = vadd.f32 %v6321_v18, %v6279_v41  ;;  %v6281_v25 = vadd.f32 %v6280_v7, %v6238_v48  ;;  %v6323_v33 = vpop.f32.mrf.mxu0 }
 0x65f   :  { %8399 = vtanh.f32 %v6322_v10  ;;  %v6324_v28 = vadd.f32 %v6323_v33, %v6281_v25 }
 0x661   :  { %8401 = vtanh.f32 %v6324_v28 }
 0x668   :  { %v8396_v36 = vpop.eup %8395 }
 0x669   :  { %6678 = vst [vmem:[%s8948_s6 + $0x10] sm:$0xff] %v8396_v36 }
 0x66a   :  { %v8398_v47 = vpop.eup %8397 }
 0x66b   :  { %6679 = vst [vmem:[%s8948_s6 + $0x18] sm:$0xff] %v8398_v47 }
 0x66c   :  { %v8400_v54 = vpop.eup %8399 }
 0x66d   :  { %6685 = vst [vmem:[%s8948_s6 + $0x48] sm:$0xff] %v8400_v54 }
 0x66e   :  { %v8402_v31 = vpop.eup %8401 }
 0x66f   :  { %6686 = vst [vmem:[%s8948_s6 + $0x50] sm:$0xff] %v8402_v31 }
 0x696   :  { %v6360_v15 = vpop.f32.mrf.mxu1 }
 0x697   :  { %v6403_v35 = vpop.f32.mrf.mxu0  ;;  %v6361_v26 = vadd.f32 %v6360_v15, %v3669_v20 }
 0x698   :  { %v6362_v32 = vpop.f32.mrf.mxu1 }
 0x699   :  { %v6405_v11 = vpop.f32.mrf.mxu0  ;;  %v6363_v63 = vadd.f32 %v6362_v32, %v3673_v45  ;;  %v6404_v40 = vadd.f32 %v6403_v35, %v6361_v26 }
 0x69a   :  { %v6364_v6 = vpop.f32.mrf.mxu1 }
 0x69b   :  { %v6407_v46 = vpop.f32.mrf.mxu0  ;;  %v6365_v9 = vadd.f32 %v6364_v6, %v3669_v20  ;;  %v6406_v55 = vadd.f32 %v6405_v11, %v6363_v63 }
 0x69c   :  { %v6366_v53 = vpop.f32.mrf.mxu1 }
 0x69d   :  { %v6409_v22 = vpop.f32.mrf.mxu0  ;;  %v6367_v61 = vadd.f32 %v6366_v53, %v3673_v45  ;;  %v6408_v50 = vadd.f32 %v6407_v46, %v6365_v9 }
 0x69f   :  { %v6410_v14 = vadd.f32 %v6409_v22, %v6367_v61 }
 0x6d6   :  { %v6446_v44 = vpop.f32.mrf.mxu1 }
 0x6d7   :  { %v6489_v43 = vpop.f32.mrf.mxu0  ;;  %v6447_v30 = vadd.f32 %v6446_v44, %v6404_v40 }
 0x6d8   :  { %v6448_v38 = vpop.f32.mrf.mxu1 }
 0x6d9   :  { %v6491_v13 = vpop.f32.mrf.mxu0  ;;  %v6490_v3 = vadd.f32 %v6489_v43, %v6447_v30  ;;  %v6449_v37 = vadd.f32 %v6448_v38, %v6406_v55 }
 0x6da   :  { %v6450_v12 = vpop.f32.mrf.mxu1 }
 0x6db   :  { %v6493_v4 = vpop.f32.mrf.mxu0  ;;  %8403 = vtanh.f32 %v6490_v3  ;;  %v6492_v51 = vadd.f32 %v6491_v13, %v6449_v37  ;;  %v6451_v17 = vadd.f32 %v6450_v12, %v6408_v50 }
 0x6dc   :  { %v6452_v57 = vpop.f32.mrf.mxu1 }
 0x6dd   :  { %8405 = vtanh.f32 %v6492_v51  ;;  %v6494_v58 = vadd.f32 %v6493_v4, %v6451_v17  ;;  %v6453_v19 = vadd.f32 %v6452_v57, %v6410_v14  ;;  %v6495_v29 = vpop.f32.mrf.mxu0 }
 0x6df   :  { %8407 = vtanh.f32 %v6494_v58  ;;  %v6496_v62 = vadd.f32 %v6495_v29, %v6453_v19 }
 0x6e1   :  { %8409 = vtanh.f32 %v6496_v62 }
 0x6e8   :  { %v8404_v56 = vpop.eup %8403 }
 0x6e9   :  { %6680 = vst [vmem:[%s8948_s6 + $0x20] sm:$0xff] %v8404_v56 }
 0x6ea   :  { %v8406_v59 = vpop.eup %8405 }
 0x6eb   :  { %6681 = vst [vmem:[%s8948_s6 + $0x28] sm:$0xff] %v8406_v59 }
 0x6ec   :  { %v8408_v27 = vpop.eup %8407 }
 0x6ed   :  { %6687 = vst [vmem:[%s8948_s6 + $0x58] sm:$0xff] %v8408_v27 }
 0x6ee   :  { %v8410_v42 = vpop.eup %8409 }
 0x6ef   :  { %6688 = vst [vmem:[%s8948_s6 + $0x60] sm:$0xff] %v8410_v42 }
 0x6f6   :  { %v7519_v1 = vpop.f32.mrf.mxu1 }
 0x6f7   :  { %v7541_v23 = vpop.f32.mrf.mxu0 }
 0x6f8   :  { %v7520_v2 = vpop.f32.mrf.mxu1 }
 0x6f9   :  { %v7542_v24 = vpop.f32.mrf.mxu0  ;;  %v7521_v21 = vadd.f32 %v7520_v2, %v7519_v1 }
 0x6fa   :  { %v7522_v52 = vpop.f32.mrf.mxu1  ;;  %v7543_v18 = vadd.f32 %v7542_v24, %v7541_v23 }
 0x6fb   :  { %v7544_v60 = vpop.f32.mrf.mxu0  ;;  %v6533_v16 = vadd.f32 %v7521_v21, %v3677_v0 }
 0x6fc   :  { %v7523_v34 = vpop.f32.mrf.mxu1 }
 0x6fd   :  { %v7545_v8 = vpop.f32.mrf.mxu0  ;;  %v7524_v48 = vadd.f32 %v7523_v34, %v7522_v52  ;;  %v6574_v25 = vadd.f32 %v7543_v18, %v6533_v16 }
 0x6fe   :  { %v7546_v54 = vadd.f32 %v7545_v8, %v7544_v60 }
 0x6ff   :  { %v6536_v33 = vadd.f32 %v7524_v48, %v3677_v0 }
 0x701   :  { %v6577_v39 = vadd.f32 %v7546_v54, %v6536_v33 }
 0x716   :  { %v7563_v49 = vpop.f32.mrf.mxu1 }
 0x717   :  { %v7585_v41 = vpop.f32.mrf.mxu0 }
 0x718   :  { %v7564_v7 = vpop.f32.mrf.mxu1 }
 0x719   :  { %v7586_v10 = vpop.f32.mrf.mxu0  ;;  %v7565_v28 = vadd.f32 %v7564_v7, %v7563_v49 }
 0x71a   :  { %v7566_v36 = vpop.f32.mrf.mxu1  ;;  %v7587_v15 = vadd.f32 %v7586_v10, %v7585_v41 }
 0x71b   :  { %v7588_v47 = vpop.f32.mrf.mxu0  ;;  %v6615_v31 = vadd.f32 %v7565_v28, %v6574_v25 }
 0x71c   :  { %v7567_v35 = vpop.f32.mrf.mxu1 }
 0x71d   :  { %v7589_v5 = vpop.f32.mrf.mxu0  ;;  %v6656_v32 = vadd.f32 %v7587_v15, %v6615_v31  ;;  %v7568_v11 = vadd.f32 %v7567_v35, %v7566_v36 }
 0x71e   :  { %v7590_v45 = vadd.f32 %v7589_v5, %v7588_v47 }
 0x71f   :  { %8411 = vtanh.f32 %v6656_v32  ;;  %v6618_v20 = vadd.f32 %v7568_v11, %v6577_v39 }
 0x721   :  { %v6659_v6 = vadd.f32 %v7590_v45, %v6618_v20 }
 0x723   :  { %8413 = vtanh.f32 %v6659_v6 }
 0x72c   :  { %v8412_v46 = vpop.eup %8411 }
 0x72d   :  { %6682 = vst [vmem:[%s8948_s6 + $0x30] sm:$0xff] %v8412_v46 }
 0x730   :  { %v8414_v26 = vpop.eup %8413 }
 0x731   :  { %6689 = vst [vmem:[%s8948_s6 + $0x68] sm:$0xff] %v8414_v26 }
 0x732   :  { %6694 = vsyncpa [#allocation7], 1 }
 0x733   :  { %6695 = vsyncpa [#allocation9], 1 }
 0x734   :  { %6696 = vsyncmov [#allocation5] }
 0x737   :  { %s6697_s3 = vpop.sfrf %6696 }
 0x738   :  { %p7500_p11 = scmp.ne.s32.totalorder %s6697_s3, 0 }
 0x73a   :  { %6701 = shalt.err (%p7500_p11)  }
 0x73b   :  { %6703 = vsyncmov [#allocation5 + $0x1] }
 0x73e   :  { %s6704_s23 = vpop.sfrf %6703 }
 0x73f   :  { %p7501_p12 = scmp.ne.s32.totalorder %s6704_s23, 0 }
 0x741   :  { %6708 = shalt.err (%p7501_p12)  }
 0x742   :  { %6710 = vsyncmov [#allocation5 + $0x2] }
 0x745   :  { %s6711_s4 = vpop.sfrf %6710 }
 0x746   :  { %p7502_p13 = scmp.ne.s32.totalorder %s6711_s4, 0 }
 0x748   :  { %6715 = shalt.err (%p7502_p13)  }

</bundles_post_ra>
